<compile_context>
chip_gen: v5e
topology: v5e:2x2
jax: 0.10.0
libtpu: 0.0.40
codegen_flags: <defaults>
</compile_context>

<pallas_src>
import functools
import math

import jax
import jax.numpy as jnp
import numpy as np
from jax import lax
from jax.experimental import pallas as pl
from jax.experimental.pallas import tpu as pltpu


def _self_attn_kernel(x_ref, gamma_ref, beta_ref,
                      wqkv_ref, bqkv_ref, wo_ref, bo_ref,
                      o_ref, *, nhead: int, eps: float = 1e-5):
    # One grid step == one batch element.  All refs live in VMEM.
    x = x_ref[0].astype(jnp.float32)                 # (L, D)
    gamma = gamma_ref[...].astype(jnp.float32)       # (1, D)
    beta = beta_ref[...].astype(jnp.float32)         # (1, D)

    L, D = x.shape
    hd = D // nhead

    # ---- LayerNorm over last dim (f32, eps = 1e-5, PyTorch default) ----
    mean = jnp.mean(x, axis=-1, keepdims=True)
    var = jnp.mean((x - mean) ** 2, axis=-1, keepdims=True)
    xn = (x - mean) * lax.rsqrt(var + eps) * gamma + beta          # (L, D) f32

    # ---- fused QKV projection: ONE bf16 MXU matmul with f32 accumulation ----
    # wqkv_ref is pre-transposed (D, 3D); pe@Wq^T, pe@Wk^T, the biases and the
    # 1/sqrt(hd) query scale are already folded into bqkv (L, 3D) wrapper-side.
    xb = xn.astype(jnp.bfloat16)
    qkv = jnp.dot(xb, wqkv_ref[...], preferred_element_type=jnp.float32)
    qkv = qkv + bqkv_ref[...].astype(jnp.float32)                  # (L, 3D) f32

    wo = wo_ref[...]                                               # (D, D) bf16, pre-transposed
    acc = jnp.zeros((L, D), jnp.float32)

    # Heads are contiguous 128-lane-aligned slices of the fused projection, so this static
    # loop unrolls into lane-dense MXU matmuls; the output projection is folded per head
    # (no concat / lane relayout, each head's activations die immediately).
    # TODO(synk): for long sequences, tile K/V with an online-softmax (flash) inner loop
    # instead of materializing the per-head (L, L) score matrix.
    for h in range(nhead):
        qh = qkv[:, h * hd:(h + 1) * hd].astype(jnp.bfloat16)              # (L, hd)
        kh = qkv[:, D + h * hd:D + (h + 1) * hd].astype(jnp.bfloat16)      # (L, hd)
        vh = qkv[:, 2 * D + h * hd:2 * D + (h + 1) * hd].astype(jnp.bfloat16)

        # scores = q @ k^T via dot_general contracting the last dims (no materialized .T);
        # the 1/sqrt(hd) scale is already inside q.
        s = lax.dot_general(qh, kh, (((1,), (1,)), ((), ())),
                            preferred_element_type=jnp.float32)            # (L, L) f32
        s = s - jnp.max(s, axis=-1, keepdims=True)
        p = jnp.exp(s)
        p = p * pl.reciprocal(jnp.sum(p, axis=-1, keepdims=True), approx=True)

        oh = jnp.dot(p.astype(jnp.bfloat16), vh,
                     preferred_element_type=jnp.float32)                   # (L, hd)
        # This head's slice of the (pre-transposed) output projection; rows 128-aligned.
        acc = acc + jnp.dot(oh.astype(jnp.bfloat16), wo[h * hd:(h + 1) * hd, :],
                            preferred_element_type=jnp.float32)

    out = acc + bo_ref[...].astype(jnp.float32)
    # Residual with the *normed* x (matches `r = x` taken after self.norm in the module).
    o_ref[0] = (xn + out).astype(o_ref.dtype)


def self_attention_pallas(x, pe, params, nhead):
    """x: (B, L, D), pe: (1, L, D). params in PyTorch (out_features, in_features) convention."""
    B, L, D = x.shape
    hd = D // nhead
    scale = 1.0 / math.sqrt(hd)
    gamma, beta, wq, wk, wv, bq, bk, bv, wo, bo = params

    # ---- wrapper-side, batch-invariant layout plumbing (free at kernel time) ----
    pe0 = pe[0].astype(jnp.float32)                                    # (L, D)
    # pre-transposed fused QKV weight; the query scale is folded into Wq.
    wqkv_t = jnp.concatenate([wq.T * scale, wk.T, wv.T], axis=1)       # (D, 3D)
    # pe only added to q and k (add_pe_to_qkv = [True, True, False]); fold it into biases.
    bq_eff = (pe0 @ wq.T + bq) * scale                                 # (L, D)
    bk_eff = pe0 @ wk.T + bk                                           # (L, D)
    bv_eff = jnp.broadcast_to(bv, (L, D))                              # (L, D)
    bqkv = jnp.concatenate([bq_eff, bk_eff, bv_eff], axis=1)           # (L, 3D) f32
    wo_t = wo.T                                                        # (D, D)

    # bf16 MXU operands; biases / LayerNorm params stay f32 (explicit accumulation dtype).
    wqkv_t = wqkv_t.astype(jnp.bfloat16)
    wo_t = wo_t.astype(jnp.bfloat16)
    bqkv = bqkv.astype(jnp.float32)

    const2d = lambda shape: pl.BlockSpec(shape, lambda b: (0, 0))
    grid_spec = pltpu.PrefetchScalarGridSpec(
        num_scalar_prefetch=0,
        grid=(B,),
        in_specs=[
            pl.BlockSpec((1, L, D), lambda b: (b, 0, 0)),   # x
            const2d((1, D)),                                # gamma
            const2d((1, D)),                                # beta
            const2d((D, 3 * D)),                            # fused W_qkv^T (bf16, q pre-scaled)
            const2d((L, 3 * D)),                            # fused bias (+pe folded, f32)
            const2d((D, D)),                                # W_o^T (bf16)
            const2d((1, D)),                                # b_o
        ],
        out_specs=pl.BlockSpec((1, L, D), lambda b: (b, 0, 0)),
    )
    kernel = functools.partial(_self_attn_kernel, nhead=nhead)
    return pl.pallas_call(
        kernel,
        out_shape=jax.ShapeDtypeStruct((B, L, D), x.dtype),
        grid_spec=grid_spec,
        compiler_params=pltpu.CompilerParams(
            dimension_semantics=("parallel",),
            vmem_limit_bytes=64 * 1024 * 1024,
        ),
    )(x, gamma, beta, wqkv_t, bqkv, wo_t, bo)


def reference_jax(x, pe, params, nhead, eps=1e-5):
    # Faithful f32 re-implementation of the PyTorch module's forward.
    gamma, beta, wq, wk, wv, bq, bk, bv, wo, bo = params
    mean = x.mean(-1, keepdims=True)
    var = ((x - mean) ** 2).mean(-1, keepdims=True)
    xn = (x - mean) / jnp.sqrt(var + eps) * gamma + beta
    x_pe = xn + pe
    q = x_pe @ wq.T + bq
    k = x_pe @ wk.T + bk
    v = xn @ wv.T + bv
    B, L, D = x.shape
    hd = D // nhead
    qh = q.reshape(B, L, nhead, hd).transpose(0, 2, 1, 3)
    kh = k.reshape(B, L, nhead, hd).transpose(0, 2, 1, 3)
    vh = v.reshape(B, L, nhead, hd).transpose(0, 2, 1, 3)
    scores = (qh @ kh.transpose(0, 1, 3, 2)) / math.sqrt(hd)
    p = jax.nn.softmax(scores, axis=-1)
    o = (p @ vh).transpose(0, 2, 1, 3).reshape(B, L, D)
    return xn + (o @ wo.T + bo)


if __name__ == "__main__":
    # hd = D // nhead = 128 -> head slices and the output block are 128-lane aligned.
    B, L, D, nhead = 2, 128, 256, 2

    key = jax.random.PRNGKey(0)
    ks = jax.random.split(key, 8)

    x = jax.random.normal(ks[0], (B, L, D), jnp.float32)
    pe = jax.random.normal(ks[1], (1, L, D), jnp.float32)

    # Deterministic synthetic parameters (shapes per nn.MultiheadAttention / nn.LayerNorm).
    gamma = jnp.ones((1, D), jnp.float32)            # LayerNorm default init
    beta = jnp.zeros((1, D), jnp.float32)
    in_proj_w = jax.random.normal(ks[2], (3 * D, D), jnp.float32) * 0.05
    in_proj_b = jax.random.normal(ks[3], (3 * D,), jnp.float32) * 0.01
    wq, wk, wv = in_proj_w[:D], in_proj_w[D:2 * D], in_proj_w[2 * D:]
    bq = in_proj_b[:D].reshape(1, D)
    bk = in_proj_b[D:2 * D].reshape(1, D)
    bv = in_proj_b[2 * D:].reshape(1, D)
    wo = jax.random.normal(ks[4], (D, D), jnp.float32) * 0.05
    bo = jax.random.normal(ks[5], (1, D), jnp.float32) * 0.01

    params = (gamma, beta, wq, wk, wv, bq, bk, bv, wo, bo)

    out = jax.block_until_ready(self_attention_pallas(x, pe, params, nhead))
    ref = jax.block_until_ready(reference_jax(x, pe, params, nhead))

    # bf16 matmul operands + approx reciprocal vs. a pure-f32 reference -> loose tolerance.
    np.testing.assert_allclose(np.asarray(out), np.asarray(ref), rtol=2e-2, atol=2e-2)

    print("KERNEL_OK")
</pallas_src>

<mosaic_0001>
module attributes {stable_mosaic.version = 11 : i64} {
  func.func @_self_attn_kernel(%arg0: i32, %arg1: memref<1x128x256xf32, #tpu.memory_space<vmem>>, %arg2: memref<1x256xf32, #tpu.memory_space<vmem>>, %arg3: memref<1x256xf32, #tpu.memory_space<vmem>>, %arg4: memref<256x768xbf16, #tpu.memory_space<vmem>>, %arg5: memref<128x768xf32, #tpu.memory_space<vmem>>, %arg6: memref<256x256xbf16, #tpu.memory_space<vmem>>, %arg7: memref<1x256xf32, #tpu.memory_space<vmem>>, %arg8: memref<1x128x256xf32, #tpu.memory_space<vmem>>) attributes {dimension_semantics = [#tpu.dimension_semantics<parallel>], iteration_bounds = array<i64: 2>, scalar_prefetch = 0 : i64, scratch_operands = 0 : i64, tpu.core_type = #tpu.core_type<tc>, window_params = [{transform_indices = @transform_0, window_bounds = array<i64: 1, 128, 256>}, {pipeline_mode = #tpu.pipeline_mode<synchronous>, transform_indices = @transform_1, window_bounds = array<i64: 1, 256>}, {pipeline_mode = #tpu.pipeline_mode<synchronous>, transform_indices = @transform_2, window_bounds = array<i64: 1, 256>}, {pipeline_mode = #tpu.pipeline_mode<synchronous>, transform_indices = @transform_3, window_bounds = array<i64: 256, 768>}, {pipeline_mode = #tpu.pipeline_mode<synchronous>, transform_indices = @transform_4, window_bounds = array<i64: 128, 768>}, {pipeline_mode = #tpu.pipeline_mode<synchronous>, transform_indices = @transform_5, window_bounds = array<i64: 256, 256>}, {pipeline_mode = #tpu.pipeline_mode<synchronous>, transform_indices = @transform_6, window_bounds = array<i64: 1, 256>}, {transform_indices = @transform_7, window_bounds = array<i64: 1, 128, 256>}]} {
    %c0 = arith.constant 0 : index
    %c0_0 = arith.constant 0 : index
    %c0_1 = arith.constant 0 : index
    %0 = vector.load %arg1[%c0, %c0_0, %c0_1] : memref<1x128x256xf32, #tpu.memory_space<vmem>>, vector<1x128x256xf32>
    %1 = vector.shape_cast %0 : vector<1x128x256xf32> to vector<128x256xf32>
    %c0_2 = arith.constant 0 : index
    %c0_3 = arith.constant 0 : index
    %2 = vector.load %arg2[%c0_2, %c0_3] : memref<1x256xf32, #tpu.memory_space<vmem>>, vector<1x256xf32>
    %c0_4 = arith.constant 0 : index
    %c0_5 = arith.constant 0 : index
    %3 = vector.load %arg3[%c0_4, %c0_5] : memref<1x256xf32, #tpu.memory_space<vmem>>, vector<1x256xf32>
    %cst = arith.constant dense<0.000000e+00> : vector<128xf32>
    %4 = vector.multi_reduction <add>, %1, %cst [1] : vector<128x256xf32> to vector<128xf32>
    %5 = vector.shape_cast %4 : vector<128xf32> to vector<128x1xf32>
    %cst_6 = arith.constant 2.560000e+02 : f32
    %6 = vector.broadcast %cst_6 : f32 to vector<128x1xf32>
    %7 = arith.divf %5, %6 : vector<128x1xf32>
    %8 = vector.broadcast %7 : vector<128x1xf32> to vector<128x256xf32>
    %9 = arith.subf %1, %8 : vector<128x256xf32>
    %10 = arith.mulf %9, %9 : vector<128x256xf32>
    %cst_7 = arith.constant dense<0.000000e+00> : vector<128xf32>
    %11 = vector.multi_reduction <add>, %10, %cst_7 [1] : vector<128x256xf32> to vector<128xf32>
    %12 = vector.shape_cast %11 : vector<128xf32> to vector<128x1xf32>
    %cst_8 = arith.constant 2.560000e+02 : f32
    %13 = vector.broadcast %cst_8 : f32 to vector<128x1xf32>
    %14 = arith.divf %12, %13 : vector<128x1xf32>
    %15 = vector.broadcast %7 : vector<128x1xf32> to vector<128x256xf32>
    %16 = arith.subf %1, %15 : vector<128x256xf32>
    %cst_9 = arith.constant 9.99999974E-6 : f32
    %17 = vector.broadcast %cst_9 : f32 to vector<128x1xf32>
    %18 = arith.addf %14, %17 : vector<128x1xf32>
    %19 = math.rsqrt %18 : vector<128x1xf32>
    %20 = vector.broadcast %19 : vector<128x1xf32> to vector<128x256xf32>
    %21 = arith.mulf %16, %20 : vector<128x256xf32>
    %22 = vector.broadcast %2 : vector<1x256xf32> to vector<128x256xf32>
    %23 = arith.mulf %21, %22 : vector<128x256xf32>
    %24 = vector.broadcast %3 : vector<1x256xf32> to vector<128x256xf32>
    %25 = arith.addf %23, %24 : vector<128x256xf32>
    %26 = arith.truncf %25 : vector<128x256xf32> to vector<128x256xbf16>
    %c0_10 = arith.constant 0 : index
    %c0_11 = arith.constant 0 : index
    %27 = vector.load %arg4[%c0_10, %c0_11] : memref<256x768xbf16, #tpu.memory_space<vmem>>, vector<256x768xbf16>
    %cst_12 = arith.constant dense<0.000000e+00> : vector<128x768xf32>
    %28 = tpu.matmul %26, %27, %cst_12 {dimension_numbers = #tpu.dot_dimension_numbers<[1], [0], [0], [1], [0, 0, 1, 1], [], []>} : vector<128x256xbf16>, vector<256x768xbf16>, vector<128x768xf32> -> vector<128x768xf32>
    %c0_13 = arith.constant 0 : index
    %c0_14 = arith.constant 0 : index
    %29 = vector.load %arg5[%c0_13, %c0_14] : memref<128x768xf32, #tpu.memory_space<vmem>>, vector<128x768xf32>
    %30 = arith.addf %28, %29 : vector<128x768xf32>
    %c0_15 = arith.constant 0 : index
    %c0_16 = arith.constant 0 : index
    %31 = vector.load %arg6[%c0_15, %c0_16] : memref<256x256xbf16, #tpu.memory_space<vmem>>, vector<256x256xbf16>
    %cst_17 = arith.constant 0.000000e+00 : f32
    %32 = vector.broadcast %cst_17 : f32 to vector<128x256xf32>
    %33 = vector.extract_strided_slice %30 {offsets = [0, 0], sizes = [128, 128], strides = [1, 1]} : vector<128x768xf32> to vector<128x128xf32>
    %34 = arith.truncf %33 : vector<128x128xf32> to vector<128x128xbf16>
    %35 = vector.extract_strided_slice %30 {offsets = [0, 256], sizes = [128, 128], strides = [1, 1]} : vector<128x768xf32> to vector<128x128xf32>
    %36 = arith.truncf %35 : vector<128x128xf32> to vector<128x128xbf16>
    %37 = vector.extract_strided_slice %30 {offsets = [0, 512], sizes = [128, 128], strides = [1, 1]} : vector<128x768xf32> to vector<128x128xf32>
    %38 = arith.truncf %37 : vector<128x128xf32> to vector<128x128xbf16>
    %cst_18 = arith.constant dense<0.000000e+00> : vector<128x128xf32>
    %39 = tpu.matmul %34, %36, %cst_18 {dimension_numbers = #tpu.dot_dimension_numbers<[1], [1], [0], [0], [0, 0, 1, 0], [], []>} : vector<128x128xbf16>, vector<128x128xbf16>, vector<128x128xf32> -> vector<128x128xf32>
    %cst_19 = arith.constant dense<0xFF800000> : vector<128xf32>
    %40 = vector.multi_reduction <maximumf>, %39, %cst_19 [1] : vector<128x128xf32> to vector<128xf32>
    %41 = vector.shape_cast %40 : vector<128xf32> to vector<128x1xf32>
    %42 = vector.broadcast %41 : vector<128x1xf32> to vector<128x128xf32>
    %43 = arith.subf %39, %42 : vector<128x128xf32>
    %44 = math.exp %43 : vector<128x128xf32>
    %cst_20 = arith.constant dense<0.000000e+00> : vector<128xf32>
    %45 = vector.multi_reduction <add>, %44, %cst_20 [1] : vector<128x128xf32> to vector<128xf32>
    %46 = vector.shape_cast %45 : vector<128xf32> to vector<128x1xf32>
    %47 = tpu.reciprocal %46 {approx = true} : vector<128x1xf32> -> vector<128x1xf32>
    %48 = vector.broadcast %47 : vector<128x1xf32> to vector<128x128xf32>
    %49 = arith.mulf %44, %48 : vector<128x128xf32>
    %50 = arith.truncf %49 : vector<128x128xf32> to vector<128x128xbf16>
    %cst_21 = arith.constant dense<0.000000e+00> : vector<128x128xf32>
    %51 = tpu.matmul %50, %38, %cst_21 {dimension_numbers = #tpu.dot_dimension_numbers<[1], [0], [0], [1], [0, 0, 1, 1], [], []>} : vector<128x128xbf16>, vector<128x128xbf16>, vector<128x128xf32> -> vector<128x128xf32>
    %52 = arith.truncf %51 : vector<128x128xf32> to vector<128x128xbf16>
    %53 = vector.extract_strided_slice %31 {offsets = [0, 0], sizes = [128, 256], strides = [1, 1]} : vector<256x256xbf16> to vector<128x256xbf16>
    %cst_22 = arith.constant dense<0.000000e+00> : vector<128x256xf32>
    %54 = tpu.matmul %52, %53, %cst_22 {dimension_numbers = #tpu.dot_dimension_numbers<[1], [0], [0], [1], [0, 0, 1, 1], [], []>} : vector<128x128xbf16>, vector<128x256xbf16>, vector<128x256xf32> -> vector<128x256xf32>
    %55 = arith.addf %32, %54 : vector<128x256xf32>
    %56 = vector.extract_strided_slice %30 {offsets = [0, 128], sizes = [128, 128], strides = [1, 1]} : vector<128x768xf32> to vector<128x128xf32>
    %57 = arith.truncf %56 : vector<128x128xf32> to vector<128x128xbf16>
    %58 = vector.extract_strided_slice %30 {offsets = [0, 384], sizes = [128, 128], strides = [1, 1]} : vector<128x768xf32> to vector<128x128xf32>
    %59 = arith.truncf %58 : vector<128x128xf32> to vector<128x128xbf16>
    %60 = vector.extract_strided_slice %30 {offsets = [0, 640], sizes = [128, 128], strides = [1, 1]} : vector<128x768xf32> to vector<128x128xf32>
    %61 = arith.truncf %60 : vector<128x128xf32> to vector<128x128xbf16>
    %cst_23 = arith.constant dense<0.000000e+00> : vector<128x128xf32>
    %62 = tpu.matmul %57, %59, %cst_23 {dimension_numbers = #tpu.dot_dimension_numbers<[1], [1], [0], [0], [0, 0, 1, 0], [], []>} : vector<128x128xbf16>, vector<128x128xbf16>, vector<128x128xf32> -> vector<128x128xf32>
    %cst_24 = arith.constant dense<0xFF800000> : vector<128xf32>
    %63 = vector.multi_reduction <maximumf>, %62, %cst_24 [1] : vector<128x128xf32> to vector<128xf32>
    %64 = vector.shape_cast %63 : vector<128xf32> to vector<128x1xf32>
    %65 = vector.broadcast %64 : vector<128x1xf32> to vector<128x128xf32>
    %66 = arith.subf %62, %65 : vector<128x128xf32>
    %67 = math.exp %66 : vector<128x128xf32>
    %cst_25 = arith.constant dense<0.000000e+00> : vector<128xf32>
    %68 = vector.multi_reduction <add>, %67, %cst_25 [1] : vector<128x128xf32> to vector<128xf32>
    %69 = vector.shape_cast %68 : vector<128xf32> to vector<128x1xf32>
    %70 = tpu.reciprocal %69 {approx = true} : vector<128x1xf32> -> vector<128x1xf32>
    %71 = vector.broadcast %70 : vector<128x1xf32> to vector<128x128xf32>
    %72 = arith.mulf %67, %71 : vector<128x128xf32>
    %73 = arith.truncf %72 : vector<128x128xf32> to vector<128x128xbf16>
    %cst_26 = arith.constant dense<0.000000e+00> : vector<128x128xf32>
    %74 = tpu.matmul %73, %61, %cst_26 {dimension_numbers = #tpu.dot_dimension_numbers<[1], [0], [0], [1], [0, 0, 1, 1], [], []>} : vector<128x128xbf16>, vector<128x128xbf16>, vector<128x128xf32> -> vector<128x128xf32>
    %75 = arith.truncf %74 : vector<128x128xf32> to vector<128x128xbf16>
    %76 = vector.extract_strided_slice %31 {offsets = [128, 0], sizes = [128, 256], strides = [1, 1]} : vector<256x256xbf16> to vector<128x256xbf16>
    %cst_27 = arith.constant dense<0.000000e+00> : vector<128x256xf32>
    %77 = tpu.matmul %75, %76, %cst_27 {dimension_numbers = #tpu.dot_dimension_numbers<[1], [0], [0], [1], [0, 0, 1, 1], [], []>} : vector<128x128xbf16>, vector<128x256xbf16>, vector<128x256xf32> -> vector<128x256xf32>
    %78 = arith.addf %55, %77 : vector<128x256xf32>
    %c0_28 = arith.constant 0 : index
    %c0_29 = arith.constant 0 : index
    %79 = vector.load %arg7[%c0_28, %c0_29] : memref<1x256xf32, #tpu.memory_space<vmem>>, vector<1x256xf32>
    %80 = vector.broadcast %79 : vector<1x256xf32> to vector<128x256xf32>
    %81 = arith.addf %78, %80 : vector<128x256xf32>
    %82 = arith.addf %25, %81 : vector<128x256xf32>
    %c0_30 = arith.constant 0 : index
    %c0_31 = arith.constant 0 : index
    %c0_32 = arith.constant 0 : index
    %83 = vector.load %arg8[%c0_30, %c0_31, %c0_32] : memref<1x128x256xf32, #tpu.memory_space<vmem>>, vector<1x128x256xf32>
    %84 = vector.shape_cast %83 : vector<1x128x256xf32> to vector<128x256xf32>
    %85 = vector.shape_cast %82 : vector<128x256xf32> to vector<1x128x256xf32>
    tpu.vector_store %arg8[%c0_30, %c0_31, %c0_32], %85 {strides = array<i32>} : memref<1x128x256xf32, #tpu.memory_space<vmem>>, vector<1x128x256xf32>,
    return
  }
  func.func @transform_0(%arg0: i32) -> (i32, i32, i32) {
    %c0_i32 = arith.constant 0 : i32
    %c0_i32_0 = arith.constant 0 : i32
    %c0_i32_1 = arith.constant 0 : i32
    return %arg0, %c0_i32, %c0_i32_0 : i32, i32, i32
  }
  func.func @transform_1(%arg0: i32) -> (i32, i32) {
    %c0_i32 = arith.constant 0 : i32
    %c0_i32_0 = arith.constant 0 : i32
    %c0_i32_1 = arith.constant 0 : i32
    return %c0_i32, %c0_i32_0 : i32, i32
  }
  func.func @transform_2(%arg0: i32) -> (i32, i32) {
    %c0_i32 = arith.constant 0 : i32
    %c0_i32_0 = arith.constant 0 : i32
    %c0_i32_1 = arith.constant 0 : i32
    return %c0_i32, %c0_i32_0 : i32, i32
  }
  func.func @transform_3(%arg0: i32) -> (i32, i32) {
    %c0_i32 = arith.constant 0 : i32
    %c0_i32_0 = arith.constant 0 : i32
    %c0_i32_1 = arith.constant 0 : i32
    return %c0_i32, %c0_i32_0 : i32, i32
  }
  func.func @transform_4(%arg0: i32) -> (i32, i32) {
    %c0_i32 = arith.constant 0 : i32
    %c0_i32_0 = arith.constant 0 : i32
    %c0_i32_1 = arith.constant 0 : i32
    return %c0_i32, %c0_i32_0 : i32, i32
  }
  func.func @transform_5(%arg0: i32) -> (i32, i32) {
    %c0_i32 = arith.constant 0 : i32
    %c0_i32_0 = arith.constant 0 : i32
    %c0_i32_1 = arith.constant 0 : i32
    return %c0_i32, %c0_i32_0 : i32, i32
  }
  func.func @transform_6(%arg0: i32) -> (i32, i32) {
    %c0_i32 = arith.constant 0 : i32
    %c0_i32_0 = arith.constant 0 : i32
    %c0_i32_1 = arith.constant 0 : i32
    return %c0_i32, %c0_i32_0 : i32, i32
  }
  func.func @transform_7(%arg0: i32) -> (i32, i32, i32) {
    %c0_i32 = arith.constant 0 : i32
    %c0_i32_0 = arith.constant 0 : i32
    %c0_i32_1 = arith.constant 0 : i32
    return %arg0, %c0_i32, %c0_i32_0 : i32, i32, i32
  }
}

</mosaic_0001>

<bundles_post_ra>
// kernel: tpu_custom_call.1
= control target key start
LH: loop header
LB: loop body
LE: loop exit
PB: predicated region body
PF: predicated region fallthrough
CT: control target
= control target key end

     0   :  { %s6321_s0 = inlined_call_operand.hbm [shape: f32[2,128,256], index: 0, kind: input, shape index: {}]   ;;  %s6322_s1 = inlined_call_operand.hbm [shape: f32[1,256], index: 1, kind: input, shape index: {}]   ;;  %s6323_s2 = inlined_call_operand.hbm [shape: f32[1,256], index: 2, kind: input, shape index: {}]   ;;  %s6324_s3 = inlined_call_operand.hbm [shape: bf16[256,768], index: 3, kind: input, shape index: {}]   ;;  %s6325_s4 = inlined_call_operand.hbm [shape: f32[128,768], index: 4, kind: input, shape index: {}]   ;;  %s6326_s5 = inlined_call_operand.hbm [shape: bf16[256,256], index: 5, kind: input, shape index: {}]   ;;  %s6327_s6 = inlined_call_operand.vmem [shape: f32[1,256], index: 6, kind: input, shape index: {}]   ;;  %s6328_s7 = inlined_call_operand.hbm [shape: f32[2,128,256], index: 7, kind: output, shape index: {}]  }
   0x1   :  { %6377 = sst [smem:[#allocation102_spill]] %s6322_s1 }
   0x2   :  { %6378 = sst [smem:[#allocation103_spill]] %s6323_s2 }
   0x3   :  { %12 = vsyncpa [#allocation3], 0 }
   0x4   :  { %14 = vsyncpa [#allocation3 + $0x1], 0 }
   0x5   :  { %15 = vsyncpa [#allocation6], 0 }
   0x6   :  { %16 = vsyncpa [#allocation9], 0 }
   0x7   :  { %17 = vsyncpa [#allocation12], 0 }
   0x8   :  { %18 = vsyncpa [#allocation4], 0 }
   0x9   :  { %20 = vsyncpa [#allocation4 + $0x1], 0  ;;  %s4612_s24 = smov 0   ;;  %s4614_s25 = smov 0  }
   0xa   :  { %s4616_s26 = smov 0   ;;  %s4618_s27 = smov 0  }
   0xb LB: > { %s6379_s1 = sld [smem:[#allocation102_spill]]  ;;  %s4636_s8 = sadd.s32 4294967295, %s4554_s27   ;;  %s4554_s27 = sphi %s4618_s27, %s6580_s27   ;;  %s4550_s26 = sphi %s4616_s26, %s6579_s26   ;;  %s4546_s25 = sphi %s4614_s25, %s6578_s25   ;;  %s4542_s24 = sphi %s4612_s24, %s6577_s24  }
   0xc   : > { %p3361_p0 = scmp.ge.s32.totalorder %s4554_s27, 1  ;;  %p47_p1 = scmp.eq.s32.totalorder %s4636_s8, 0 }
   0xd   : > { %p209_p2 = scmp.lt.s32.totalorder %s4554_s27, 3  ;;  %s4556_s10 = smov [#allocation5]  }
   0xe   : > { %s223_s11 = sshll.u32 %s4556_s10, 4  ;;  %s244_s14 = sshll.u32 %s6324_s3, 4  ;;  %s224_s11 = int_to_ptr.vmem [resolvable:$true] %s223_s11  ;;  %s245_s14 = int_to_ptr.hbm [resolvable:$true] %s244_s14 }
   0xf   : > { %p4641_p3 = pnand %p3361_p0, %p209_p2  ;;  %s4557_s16 = smov [#allocation8]  }
  0x10   : > { %s246_s17 = sshll.u32 %s4557_s16, 4  ;;  %s4558_s18 = smov 384   ;;  %s247_s17 = int_to_ptr.vmem [resolvable:$true] %s246_s17 }
  0x11   : > { %s221_s30 = sshll.u32 %s6379_s1, 4  ;;  %p4050_p5 = pneg %p4641_p3  ;;  %s222_s30 = int_to_ptr.hbm [resolvable:$true] %s221_s30 }
  0x12   : > { %s4559_s19 = smov 24   ;;  %s6382_s2 = sld [smem:[#allocation103_spill]] }
  0x13   : > { %p4653_p6 = pnand %p4050_p5, %p47_p1  ;;  %s4560_s23 = smov [#allocation7]  }
  0x14   : > { %s235_s28 = sshll.u32 %s4560_s23, 4  ;;  %s258_s12 = sshll.u32 %s6325_s4, 4  ;;  %s236_s28 = int_to_ptr.vmem [resolvable:$true] %s235_s28  ;;  %s259_s12 = int_to_ptr.hbm [resolvable:$true] %s258_s12 }
  0x15   : > { %4053 = dma.hbm_to_vmem [thread:$0]  (!%p4653_p6), %s222_s30, 32, %s224_s11, [#allocation6]  }
  0x16   : > { %4059 = dma.hbm_to_vmem [thread:$0]  (!%p4653_p6), %s245_s14, 12288, %s247_s17, [#allocation9], %s4558_s18, %s4558_s18, %s4559_s19  }
  0x17   : > { %s4561_s30 = smov [#allocation10]   ;;  %s4562_s13 = smov 768  }
  0x18   : > { %s233_s22 = sshll.u32 %s6382_s2, 4  ;;  %s260_s11 = sshll.u32 %s4561_s30, 4  ;;  %s234_s22 = int_to_ptr.hbm [resolvable:$true] %s233_s22  ;;  %s261_s11 = int_to_ptr.vmem [resolvable:$true] %s260_s11 }
  0x19   : > { %4056 = dma.hbm_to_vmem [thread:$0]  (!%p4653_p6), %s234_s22, 32, %s236_s28, [#allocation6]  }
  0x1a   : > { %s4563_s14 = smov 48   ;;  %s272_s18 = sshll.u32 %s6326_s5, 4  ;;  %s273_s18 = int_to_ptr.hbm [resolvable:$true] %s272_s18 }
  0x1b   : > { %4062 = dma.hbm_to_vmem [thread:$0]  (!%p4653_p6), %s259_s12, 12288, %s261_s11, [#allocation9], %s4562_s13, %s4562_s13, %s4563_s14  }
  0x1c   : > { %s4564_s19 = smov [#allocation11]   ;;  %s4565_s21 = smov 128  }
  0x1d   : > { %s274_s20 = sshll.u32 %s4564_s19, 4  ;;  %s4566_s22 = smov 8   ;;  %s275_s20 = int_to_ptr.vmem [resolvable:$true] %s274_s20 }
  0x1e   : > { %4065 = dma.hbm_to_vmem [thread:$0]  (!%p4653_p6), %s273_s18, 4096, %s275_s20, [#allocation12], %s4565_s21, %s4565_s21, %s4566_s22  }
  0x1f   : > { %s3360_s23 = sadd.s32 4294967294, %s4554_s27   ;;  %s4678_s28 = sadd.s32 1, %s4554_s27  }
  0x20   : > { %s33_s29 = sadd.s32 1, %s4550_s26  ;;  %s30_s10 = ssub.s32 %s4554_s27, %s4678_s28 }
  0x21   : > { %p40_p7 = scmp.ne.s32.totalorder %s4550_s26, %s4546_s25  ;;  %p31_p8 = scmp.eq.s32.totalorder %s30_s10, 0 }
  0x22   : > { %p41_p9 = scmp.eq.s32.totalorder %s4554_s27, 0  ;;  %p46_p10 = scmp.ne.s32.totalorder %s4546_s25, %s4542_s24 }
  0x23   : > { %p196_p11 = scmp.eq.s32.totalorder %s4636_s8, 1  ;;  %p202_p2 = scmp.eq.s32.totalorder %s3360_s23, 1 }
  0x24   : > { %s4690_s12 = scalar_select %p31_p8, %s4550_s26, %s33_s29  }
  0x25   : > { %p4692_p12 = por %p41_p9, %p40_p7  ;;  %p4698_p13 = por %p47_p1, %p46_p10 }
  0x26   : > { %p4702_p0 = por %p196_p11, %p40_p7  ;;  %p4079_p5 = scmp.lt.s32.totalorder %s4554_s27, 2 }
  0x27   : > { %s291_s13 = sand.u32 1, %s4550_s26   ;;  %p4708_p6 = por %p202_p2, %p46_p10 }
  0x28   : > { %s3368_s16 = sshll.u32 %s291_s13, 8  ;;  %s3896_s17 = sshll.u32 %s4554_s27, 8 }
  0x29   : > { %s300_s20 = scalar_lea.hbm %s6321_s0, %s3896_s17  ;;  %s295_s22 = scalar_lea.vmem [#allocation2], %s3368_s16 }
  0x2a   : > { %s301_s21 = sshll.u32 %s300_s20, 4  ;;  %s303_s29 = sshll.u32 %s295_s22, 4  ;;  %s302_s21 = int_to_ptr.hbm [resolvable:$true] %s301_s21  ;;  %s304_s29 = int_to_ptr.vmem [resolvable:$true] %s303_s29 }
  0x2b   : > { %p4718_p7 = pnand %p4079_p5, %p4692_p12  ;;  %s292_s10 = scalar_lea.sflag [#allocation3], %s291_s13 }
  0x2c   : > { %s4446_s1 = sshra.s32 %s302_s21, 4  ;;  %s4453_s18 = scalar_lea.hbm %s6321_s0, 512  ;;  %s4447_s1 = int_to_ptr.hbm [resolvable:$true] %s4446_s1 }
  0x2d   : > { %s4448_s2 = scalar_lea.hbm %s4447_s1, 256  ;;  %p4450_p9 = pneg %p4718_p7 }
  0x2e   : > { %p4449_p8 = scmp.ne.s32.totalorder %s4447_s1, %s4448_s2  ;;  %p4454_p12 = scmp.lt.s32.totalorder %s4447_s1, %s6321_s0 }
  0x2f   : > { %p4455_p2 = scmp.lt.s32.totalorder %s4453_s18, %s4448_s2 }
  0x30   : > { %p4451_p10 = pnand %p4450_p9, %p4449_p8 }
  0x31   : > { %p4456_p5 = por %p4455_p2, %p4454_p12 }
  0x32   : > { %p4452_p11 = pneg %p4451_p10 }
  0x34   : > { %p4457_p4 = pnand %p4456_p5, %p4452_p11 }
  0x36   : > { %4460 = shalt.err (!%p4457_p4)
}
  0x37   : > { %s4567_s13 = smov 256   ;;  %s4568_s20 = smov 16  }
  0x38   : > { %4069 = dma.hbm_to_vmem [thread:$0]  (!%p4718_p7), %s302_s21, 4096, %s304_s29, %s292_s10, %s4567_s13, %s4567_s13, %s4568_s20  }
  0x39   : > { %315 = sbr.rel (%p4641_p3) target bundleno = 1740 (0x6cc), region = 48 }
  0x3e   : > { %s4735_s22 = sand.u32 1, %s4546_s25  }
  0x3f   : > { %s3372_s1 = sshll.u32 %s4735_s22, 8  ;;  %s318_s2 = scalar_lea.sflag [#allocation3], %s4735_s22 }
  0x40   : > { %s4741_s17 = scalar_lea.vmem [#allocation2], %s3372_s1 }
  0x41   : > { %4521 = dma.done.wait (%p4698_p13), %s318_s2, 4096  }
  0x42   : > { %4523 = vsyncadd (%p4698_p13), %s318_s2, 4294963200 }
  0x43   : > { %4525 = dma.done.wait (%p47_p1), [#allocation6], 64  }
  0x44   : > { %4527 = vsyncadd (%p47_p1), [#allocation6], 4294967232 }
  0x45   : > { %4529 = dma.done.wait (%p47_p1), [#allocation9], 24576  }
  0x46   : > { %4531 = vsyncadd (%p47_p1), [#allocation9], 4294942720 }
  0x47   : > { %4533 = dma.done.wait (%p47_p1), [#allocation12], 4096  }
  0x48   : > { %4535 = vsyncadd (%p47_p1), [#allocation12], 4294963200  ;;  %v4760_v0 = vld [vmem:[%s4741_s17 + $0x20] sm:$0xff]  ;;  %v4763_v1 = vld [vmem:[%s4741_s17 + $0x28] sm:$0xff]  ;;  %v4569_v27 = vmov 256.0   ;;  %s6188_s21 = scalar_lea.vmem [#allocation13], %s3372_s1 }
  0x49   : > { %v378_v2 = vld [vmem:[%s4741_s17] sm:$0xff]  ;;  %v418_v3 = vadd.f32 %v4763_v1, %v4760_v0  ;;  %v379_v4 = vld [vmem:[%s4741_s17 + $0x8] sm:$0xff]  ;;  %v384_v8 = vld [vmem:[%s4741_s17 + $0x30] sm:$0xff]  ;;  %4134 = vrcp.f32 %v4569_v27  ;;  %s4025_s29 = sshll.u32 %s4636_s8, 8  ;;  %s3236_s8 = sshll.u32 %s6188_s21, 4  ;;  %s3237_s8 = int_to_ptr.vmem [resolvable:$true] %s3236_s8 }
  0x4a   : > { %v412_v5 = vadd.f32 %v379_v4, %v378_v2  ;;  %v386_v6 = vld [vmem:[%s4741_s17 + $0x40] sm:$0xff]  ;;  %v387_v7 = vld [vmem:[%s4741_s17 + $0x48] sm:$0xff]  ;;  %v385_v9 = vld [vmem:[%s4741_s17 + $0x38] sm:$0xff]  ;;  %s3235_s16 = scalar_lea.hbm %s6328_s7, %s4025_s29  ;;  %s3224_s19 = scalar_lea.sflag [#allocation4], %s4735_s22 }
  0x4b   : > { %419 = vadd.xlane.f32.xlu1 %v418_v3  ;;  %v424_v10 = vadd.f32 %v387_v7, %v386_v6  ;;  %v380_v11 = vld [vmem:[%s4741_s17 + $0x10] sm:$0xff]  ;;  %v381_v12 = vld [vmem:[%s4741_s17 + $0x18] sm:$0xff]  ;;  %v421_v13 = vadd.f32 %v385_v9, %v384_v8  ;;  %v4790_v20 = vld [vmem:[%s4741_s17 + $0x60] sm:$0xff]  ;;  %s3238_s18 = sshll.u32 %s3235_s16, 4  ;;  %s4496_s2 = scalar_lea.hbm %s6328_s7, 512  ;;  %s3239_s18 = int_to_ptr.hbm [resolvable:$true] %s3238_s18 }
  0x4c   : > { %413 = vadd.xlane.f32.xlu0 %v412_v5  ;;  %v4776_v14 = vld [vmem:[%s4741_s17 + $0x50] sm:$0xff]  ;;  %v4779_v15 = vld [vmem:[%s4741_s17 + $0x58] sm:$0xff]  ;;  %v415_v16 = vadd.f32 %v381_v12, %v380_v11  ;;  %v4793_v21 = vld [vmem:[%s4741_s17 + $0x68] sm:$0xff]  ;;  %s4490_s30 = sshra.s32 %s3239_s18, 4  ;;  %s4491_s30 = int_to_ptr.hbm [resolvable:$true] %s4490_s30 }
  0x4d   : > { %425 = vadd.xlane.f32.xlu2 %v424_v10  ;;  %v427_v17 = vadd.f32 %v4779_v15, %v4776_v14  ;;  %v4784_v18 = vld [vmem:[%s4741_s17 + $0x70] sm:$0xff]  ;;  %v4787_v19 = vld [vmem:[%s4741_s17 + $0x78] sm:$0xff]  ;;  %v430_v23 = vadd.f32 %v4793_v21, %v4790_v20  ;;  %v4800_v24 = vld [vmem:[%s4741_s17 + $0x80] sm:$0xff]  ;;  %s4492_s13 = scalar_lea.hbm %s4491_s30, 256  ;;  %p4497_p13 = scmp.lt.s32.totalorder %s4491_s30, %s6328_s7 }
  0x4e   : > { %v433_v22 = vadd.f32 %v4787_v19, %v4784_v18  ;;  %v4803_v25 = vld [vmem:[%s4741_s17 + $0x88] sm:$0xff]  ;;  %v4821_v47 = vld [vmem:[%s4741_s17 + $0x90] sm:$0xff]  ;;  %v4824_v48 = vld [vmem:[%s4741_s17 + $0x98] sm:$0xff]  ;;  %p4493_p1 = scmp.ne.s32.totalorder %s4491_s30, %s4492_s13  ;;  %p4498_p7 = scmp.lt.s32.totalorder %s4496_s2, %s4492_s13 }
  0x4f   : > { %v436_v26 = vadd.f32 %v4803_v25, %v4800_v24  ;;  %v4135_v28 = vpop.eup %4134  ;;  %v439_v55 = vadd.f32 %v4824_v48, %v4821_v47  ;;  %v4891_v27 = vld [vmem:[%s4741_s17 + $0xb0] sm:$0xff] }
  0x50   : > { %v461_v29 = vmul.f32 256.0, %v4135_v28  ;;  %vm465_vm0 = vweird.f32 %v4135_v28  ;;  %p4494_p3 = pnand %p4493_p1, %p4702_p0  ;;  %p4499_p8 = por %p4498_p7, %p4497_p13 }
  0x52   : > { %v462_v30 = vsub.f32 1.0, %v461_v29  ;;  %p4495_p4 = pneg %p4494_p3 }
  0x53   : > { %422 = vadd.xlane.f32.xlu1 %v421_v13 }
  0x54   : > { %416 = vadd.xlane.f32.xlu0 %v415_v16  ;;  %v463_v31 = vmul.f32 %v4135_v28, %v462_v30  ;;  %p4500_p9 = pnand %p4499_p8, %p4495_p4 }
  0x55   : > { %428 = vadd.xlane.f32.xlu2 %v427_v17 }
  0x56   : > { %v464_v32 = vadd.f32 %v4135_v28, %v463_v31 }
  0x58   : > { %v4807_v33 = vsel %vm465_vm0, %v4135_v28, %v464_v32  ;;  %v4894_v28 = vld [vmem:[%s4741_s17 + $0xb8] sm:$0xff] }
  0x5b   : > { %434 = vadd.xlane.f32.xlu1 %v433_v22 }
  0x5c   : > { %431 = vadd.xlane.f32.xlu0 %v430_v23  ;;  %v4881_v23 = vld [vmem:[%s4741_s17 + $0xd0] sm:$0xff] }
  0x63   : > { %437 = vadd.xlane.f32.xlu1 %v436_v26  ;;  %v4884_v26 = vld [vmem:[%s4741_s17 + $0xd8] sm:$0xff] }
  0x64   : > { %v451_v29 = vadd.f32 %v4884_v26, %v4881_v23 }
  0xbe   : > { %v420_v34 = vpop.xlane.xlu1 %419 }
  0xbf   : > { %v414_v35 = vpop.xlane.xlu0 %413  ;;  %v469_v49 = vmul.f32 %v4807_v33, %v420_v34 }
  0xc0   : > { %v467_v36 = vmul.f32 %v4807_v33, %v414_v35  ;;  %v426_v39 = vpop.xlane.xlu2 %425  ;;  %v445_v35 = vadd.f32 %v4894_v28, %v4891_v27 }
  0xc1   : > { %v471_v46 = vmul.f32 %v4807_v33, %v426_v39  ;;  %v4847_v60 = vsub.f32 %v4760_v0, %v469_v49  ;;  %v4850_v61 = vsub.f32 %v4763_v1, %v469_v49  ;;  %v4908_v39 = vld [vmem:[%s4741_s17 + $0xe0] sm:$0xff] }
  0xc2   : > { %v4810_v37 = vsub.f32 %v378_v2, %v467_v36  ;;  %v4812_v38 = vsub.f32 %v379_v4, %v467_v36 }
  0xc3   : > { %v4838_v56 = vsub.f32 %v386_v6, %v471_v46  ;;  %v4840_v57 = vsub.f32 %v387_v7, %v471_v46  ;;  %v519_v6 = vmul.f32 %v4847_v60, %v4847_v60  ;;  %v520_v7 = vmul.f32 %v4850_v61, %v4850_v61 }
  0xc4   : > { %v515_v40 = vmul.f32 %v4810_v37, %v4810_v37  ;;  %v516_v41 = vmul.f32 %v4812_v38, %v4812_v38 }
  0xc5   : > { %v523_v5 = vmul.f32 %v4838_v56, %v4838_v56  ;;  %v524_v0 = vmul.f32 %v4840_v57, %v4840_v57  ;;  %v553_v16 = vadd.f32 %v520_v7, %v519_v6  ;;  %v3741_v6 = vld [vmem:[#allocation8 + $0x2d0] sm:$0xf] }
  0xc6   : > { %v423_v42 = vpop.xlane.xlu1 %422  ;;  %v547_v43 = vadd.f32 %v516_v41, %v515_v40  ;;  %v4911_v40 = vld [vmem:[%s4741_s17 + $0xe8] sm:$0xff]  ;;  %v4918_v41 = vld [vmem:[%s4741_s17 + $0xc0] sm:$0xff] }
  0xc7   : > { %v470_v44 = vmul.f32 %v4807_v33, %v423_v42  ;;  %v417_v45 = vpop.xlane.xlu0 %416  ;;  %v559_v10 = vadd.f32 %v524_v0, %v523_v5  ;;  %v4921_v42 = vld [vmem:[%s4741_s17 + $0xc8] sm:$0xff] }
  0xc8   : > { %v468_v50 = vmul.f32 %v4807_v33, %v417_v45  ;;  %548 = vadd.xlane.f32.xlu2 %v547_v43  ;;  %v429_v3 = vpop.xlane.xlu2 %428  ;;  %v454_v43 = vadd.f32 %v4911_v40, %v4908_v39  ;;  %v448_v46 = vadd.f32 %v4921_v42, %v4918_v41 }
  0xc9   : > { %v4828_v51 = vsub.f32 %v384_v8, %v470_v44  ;;  %v4830_v52 = vsub.f32 %v385_v9, %v470_v44  ;;  %v472_v1 = vmul.f32 %v4807_v33, %v429_v3  ;;  %v4866_v8 = vld [vmem:[%s4741_s17 + $0xa0] sm:$0xff]  ;;  %v4869_v9 = vld [vmem:[%s4741_s17 + $0xa8] sm:$0xff] }
  0xca   : > { %v4832_v53 = vsub.f32 %v380_v11, %v468_v50  ;;  %v4834_v54 = vsub.f32 %v381_v12, %v468_v50  ;;  %v442_v13 = vadd.f32 %v4869_v9, %v4866_v8 }
  0xcb   : > { %v521_v58 = vmul.f32 %v4828_v51, %v4828_v51  ;;  %v522_v59 = vmul.f32 %v4830_v52, %v4830_v52  ;;  %v4872_v11 = vsub.f32 %v4776_v14, %v472_v1  ;;  %v4875_v12 = vsub.f32 %v4779_v15, %v472_v1  ;;  %v3549_v1 = vld [vmem:[#allocation8 + $0x150] sm:$0xf] }
  0xcc   : > { %v517_v62 = vmul.f32 %v4832_v53, %v4832_v53  ;;  %v518_v63 = vmul.f32 %v4834_v54, %v4834_v54 }
  0xcd   : > { %v556_v2 = vadd.f32 %v522_v59, %v521_v58  ;;  %v525_v14 = vmul.f32 %v4872_v11, %v4872_v11  ;;  %v526_v15 = vmul.f32 %v4875_v12, %v4875_v12  ;;  %v4939_v59 = vld [vmem:[%s4741_s17 + $0xf0] sm:$0xff] }
  0xce   : > { %v550_v4 = vadd.f32 %v518_v63, %v517_v62  ;;  %v435_v30 = vpop.xlane.xlu1 %434 }
  0xcf   : > { %557 = vadd.xlane.f32.xlu1 %v556_v2  ;;  %v432_v17 = vpop.xlane.xlu0 %431  ;;  %v562_v34 = vadd.f32 %v526_v15, %v525_v14  ;;  %v474_v36 = vmul.f32 %v4807_v33, %v435_v30  ;;  %v3743_v14 = vld [vmem:[#allocation8 + $0x2e8] sm:$0xf0]  ;;  %v3936_v30 = vld [vmem:[#allocation8 + $0x134] sm:$0xf0] }
  0xd0   : > { %440 = vadd.xlane.f32.xlu2 %v439_v55  ;;  %551 = vadd.xlane.f32.xlu0 %v550_v4  ;;  %v473_v22 = vmul.f32 %v4807_v33, %v432_v17 }
  0xd1   : > { %v4926_v44 = vsub.f32 %v4784_v18, %v474_v36  ;;  %v4929_v45 = vsub.f32 %v4787_v19, %v474_v36  ;;  %v4942_v19 = vld [vmem:[%s4741_s17 + $0xf8] sm:$0xff] }
  0xd2   : > { %v4899_v31 = vsub.f32 %v4790_v20, %v473_v22  ;;  %v4902_v32 = vsub.f32 %v4793_v21, %v473_v22  ;;  %v457_v3 = vadd.f32 %v4942_v19, %v4939_v59  ;;  %v3987_v22 = vld [vmem:[#allocation8 + $0x2d4] sm:$0xf]  ;;  %v3984_v36 = vld [vmem:[#allocation8 + $0x2b4] sm:$0xf0] }
  0xd3   : > { %v529_v58 = vmul.f32 %v4926_v44, %v4926_v44  ;;  %v530_v18 = vmul.f32 %v4929_v45, %v4929_v45  ;;  %v3746_v15 = vor.u32 %v3987_v22, %v3743_v14  ;;  %v3972_v22 = vld [vmem:[#allocation8 + $0x254] sm:$0xf0]  ;;  %v3921_v14 = vld [vmem:[#allocation8 + $0xc4] sm:$0xf] }
  0xd4   : > { %v527_v20 = vmul.f32 %v4899_v31, %v4899_v31  ;;  %v528_v21 = vmul.f32 %v4902_v32, %v4902_v32 }
  0xd5   : > { %v568_v2 = vadd.f32 %v530_v18, %v529_v58  ;;  %1728 = vmatpush.bf16.msra.mxu3 %v3746_v15  ;;  %v3501_v58 = vld [vmem:[#allocation8 + $0xf0] sm:$0xf]  ;;  %v3930_v18 = vld [vmem:[#allocation8 + $0x104] sm:$0xf0]  ;;  %v3479_v15 = vld [vmem:[#allocation8 + $0xd8] sm:$0xf0] }
  0xd6   : > { %v565_v49 = vadd.f32 %v528_v21, %v527_v20  ;;  %v438_v50 = vpop.xlane.xlu1 %437  ;;  %v3933_v20 = vld [vmem:[#allocation8 + $0x124] sm:$0xf]  ;;  %v3527_v21 = vld [vmem:[#allocation8 + $0x138] sm:$0xf0] }
  0xd7   : > { %560 = vadd.xlane.f32.xlu1 %v559_v10  ;;  %v475_v55 = vmul.f32 %v4807_v33, %v438_v50  ;;  %v3939_v10 = vld [vmem:[#allocation8 + $0x154] sm:$0xf]  ;;  %v3719_v50 = vld [vmem:[#allocation8 + $0x2b8] sm:$0xf0] }
  0xd8   : > { %443 = vadd.xlane.f32.xlu2 %v442_v13  ;;  %554 = vadd.xlane.f32.xlu0 %v553_v16  ;;  %v3551_v13 = vld [vmem:[#allocation8 + $0x168] sm:$0xf0] }
  0xd9   : > { %v4945_v62 = vsub.f32 %v4800_v24, %v475_v55  ;;  %v4948_v63 = vsub.f32 %v4803_v25, %v475_v55  ;;  %v3942_v24 = vld [vmem:[#allocation8 + $0x164] sm:$0xf0]  ;;  %v3554_v17 = vor.u32 %v3939_v10, %v3551_v13  ;;  %v3477_v10 = vld [vmem:[#allocation8 + $0xc0] sm:$0xf]  ;;  %v3924_v13 = vld [vmem:[#allocation8 + $0xd4] sm:$0xf0] }
  0xda   : > { %v3550_v7 = vor.u32 %v3942_v24, %v3549_v1  ;;  %v3990_v25 = vld [vmem:[#allocation8 + $0x2e4] sm:$0xf0] }
  0xdb   : > { %v531_v4 = vmul.f32 %v4945_v62, %v4945_v62  ;;  %v532_v5 = vmul.f32 %v4948_v63, %v4948_v63  ;;  %v3742_v16 = vor.u32 %v3990_v25, %v3741_v6  ;;  %1679 = vmatpush.bf16.msra.mxu2 %v3554_v17  ;;  %v3975_v6 = vld [vmem:[#allocation8 + $0x274] sm:$0xf]  ;;  %v3478_v17 = vor.u32 %v3924_v13, %v3477_v10 }
  0xdc   : > { %1581 = vmatpush.bf16.msra.mxu0 %v3550_v7  ;;  %v3695_v7 = vld [vmem:[#allocation8 + $0x288] sm:$0xf0] }
  0xdd   : > { %v571_v0 = vadd.f32 %v532_v5, %v531_v4  ;;  %1630 = vmatpush.bf16.msra.mxu1 %v3742_v16  ;;  %v3978_v4 = vld [vmem:[#allocation8 + $0x284] sm:$0xf0]  ;;  %v3927_v5 = vld [vmem:[#allocation8 + $0xf4] sm:$0xf]  ;;  %v3698_v25 = vor.u32 %v3975_v6, %v3695_v7  ;;  %v3669_v16 = vld [vmem:[#allocation8 + $0x240] sm:$0xf] }
  0xde   : > { %v3960_v6 = vld [vmem:[#allocation8 + $0x1f4] sm:$0xf0]  ;;  %v3909_v7 = vld [vmem:[#allocation8 + $0x64] sm:$0xf] }
  0xdf   : > { %452 = vadd.xlane.f32.xlu1 %v451_v29  ;;  %v3525_v29 = vld [vmem:[#allocation8 + $0x120] sm:$0xf] }
  0xe0   : > { %563 = vadd.xlane.f32.xlu2 %v562_v34  ;;  %446 = vadd.xlane.f32.xlu0 %v445_v35  ;;  %v3717_v34 = vld [vmem:[#allocation8 + $0x2a0] sm:$0xf]  ;;  %v3526_v35 = vor.u32 %v3936_v30, %v3525_v29  ;;  %v3670_v29 = vor.u32 %v3972_v22, %v3669_v16  ;;  %v3482_v30 = vor.u32 %v3921_v14, %v3479_v15  ;;  %v3957_v16 = vld [vmem:[#allocation8 + $0x1e4] sm:$0xf]  ;;  %v3405_v15 = vld [vmem:[#allocation8 + $0x30] sm:$0xf] }
  0xe2   : > { %1582 = vmatpush.bf16.msra.mxu0 %v3526_v35  ;;  %v3671_v35 = vld [vmem:[#allocation8 + $0x258] sm:$0xf0] }
  0xe7   : > { %455 = vadd.xlane.f32.xlu1 %v454_v43  ;;  %v3718_v43 = vor.u32 %v3984_v36, %v3717_v34  ;;  %v3969_v34 = vld [vmem:[#allocation8 + $0x244] sm:$0xf] }
  0xe8   : > { %449 = vadd.xlane.f32.xlu0 %v448_v46  ;;  %566 = vadd.xlane.f32.xlu2 %v565_v49  ;;  %v3530_v46 = vor.u32 %v3933_v20, %v3527_v21  ;;  %v3981_v49 = vld [vmem:[#allocation8 + $0x2a4] sm:$0xf]  ;;  %v3674_v36 = vor.u32 %v3969_v34, %v3671_v35  ;;  %v3453_v20 = vld [vmem:[#allocation8 + $0x90] sm:$0xf]  ;;  %v3918_v21 = vld [vmem:[#allocation8 + $0xa4] sm:$0xf0] }
  0xe9   : > { %v3722_v55 = vor.u32 %v3981_v49, %v3719_v50  ;;  %1631 = vmatpush.bf16.msra.mxu1 %v3718_v43  ;;  %v3645_v43 = vld [vmem:[#allocation8 + $0x210] sm:$0xf]  ;;  %v3966_v49 = vld [vmem:[#allocation8 + $0x224] sm:$0xf0]  ;;  %v3915_v50 = vld [vmem:[#allocation8 + $0x94] sm:$0xf] }
  0xea   : > { %1680 = vmatpush.bf16.msra.mxu2 %v3530_v46  ;;  %v3454_v46 = vor.u32 %v3918_v21, %v3453_v20  ;;  %v3903_v20 = vld [vmem:[#allocation8 + $0x34] sm:$0xf]  ;;  %v3407_v21 = vld [vmem:[#allocation8 + $0x48] sm:$0xf0] }
  0xeb   : > { %1729 = vmatpush.bf16.msra.mxu3 %v3722_v55  ;;  %v3455_v55 = vld [vmem:[#allocation8 + $0xa8] sm:$0xf0] }
  0xef   : > { %1730 = vmatpush.bf16.msra.mxu3 %v3698_v25  ;;  %v3431_v25 = vld [vmem:[#allocation8 + $0x78] sm:$0xf0] }
  0xf0   : > { %569 = vadd.xlane.f32.xlu0 %v568_v2  ;;  %458 = vadd.xlane.f32.xlu2 %v457_v3  ;;  %v3693_v2 = vld [vmem:[#allocation8 + $0x270] sm:$0xf]  ;;  %v3502_v3 = vor.u32 %v3930_v18, %v3501_v58  ;;  %v3646_v58 = vor.u32 %v3966_v49, %v3645_v43  ;;  %v3458_v18 = vor.u32 %v3915_v50, %v3455_v55  ;;  %v3951_v49 = vld [vmem:[#allocation8 + $0x1b4] sm:$0xf]  ;;  %v3599_v50 = vld [vmem:[#allocation8 + $0x1c8] sm:$0xf0] }
  0xf1   : > { %v3694_v1 = vor.u32 %v3978_v4, %v3693_v2  ;;  %v3963_v2 = vld [vmem:[#allocation8 + $0x214] sm:$0xf]  ;;  %v3434_v13 = vor.u32 %v3909_v7, %v3431_v25 }
  0xf2   : > { %1583 = vmatpush.bf16.msra.mxu0 %v3502_v3  ;;  %v3647_v3 = vld [vmem:[#allocation8 + $0x228] sm:$0xf0] }
  0xf3   : > { %1632 = vmatpush.bf16.msra.mxu1 %v3694_v1  ;;  %1731 = vmatpush.bf16.msra.mxu3 %v3674_v36  ;;  %v3650_v4 = vor.u32 %v3963_v2, %v3647_v3  ;;  %v3621_v1 = vld [vmem:[#allocation8 + $0x1e0] sm:$0xf]  ;;  %v3954_v36 = vld [vmem:[#allocation8 + $0x1c4] sm:$0xf0] }
  0xf4   : > { %v3622_v10 = vor.u32 %v3960_v6, %v3621_v1 }
  0xf6   : > { %1584 = vmatpush.bf16.msra.mxu0 %v3478_v17  ;;  %v3623_v17 = vld [vmem:[#allocation8 + $0x1f8] sm:$0xf0] }
  0xf7   : > { %1633 = vmatpush.bf16.msra.mxu1 %v3670_v29  ;;  %1732 = vmatpush.bf16.msra.mxu3 %v3650_v4  ;;  %v3626_v22 = vor.u32 %v3957_v16, %v3623_v17  ;;  %v3906_v29 = vld [vmem:[#allocation8 + $0x44] sm:$0xf0] }
  0xf8   : > { %572 = vadd.xlane.f32.xlu0 %v571_v0  ;;  %v3503_v0 = vld [vmem:[#allocation8 + $0x108] sm:$0xf0]  ;;  %v3406_v35 = vor.u32 %v3906_v29, %v3405_v15 }
  0xf9   : > { %v3506_v24 = vor.u32 %v3927_v5, %v3503_v0  ;;  %v3429_v5 = vld [vmem:[#allocation8 + $0x60] sm:$0xf]  ;;  %v3912_v0 = vld [vmem:[#allocation8 + $0x74] sm:$0xf0] }
  0xfa   : > { %1585 = vmatpush.bf16.msra.mxu0 %v3454_v46  ;;  %v3410_v46 = vor.u32 %v3903_v20, %v3407_v21 }
  0xfb   : > { %1681 = vmatpush.bf16.msra.mxu2 %v3506_v24  ;;  %1634 = vmatpush.bf16.msra.mxu1 %v3646_v58  ;;  %v3430_v24 = vor.u32 %v3912_v0, %v3429_v5  ;;  %v3602_v58 = vor.u32 %v3951_v49, %v3599_v50  ;;  %v3945_v50 = vld [vmem:[#allocation8 + $0x184] sm:$0xf] }
  0xfc   : > { %1733 = vmatpush.bf16.msra.mxu3 %v3626_v22  ;;  %v3900_v22 = vld [vmem:[#allocation8 + $0x14] sm:$0xf0] }
  0xfe   : > { %1586 = vmatpush.bf16.msra.mxu0 %v3430_v24 }
  0xff   : > { %1682 = vmatpush.bf16.msra.mxu2 %v3482_v30  ;;  %1635 = vmatpush.bf16.msra.mxu1 %v3622_v10  ;;  %v3597_v30 = vld [vmem:[#allocation8 + $0x1b0] sm:$0xf] }
 0x100   : > { %v3598_v43 = vor.u32 %v3954_v36, %v3597_v30  ;;  %1734 = vmatpush.bf16.msra.mxu3 %v3602_v58  ;;  %v3948_v30 = vld [vmem:[#allocation8 + $0x194] sm:$0xf0]  ;;  %v3575_v58 = vld [vmem:[#allocation8 + $0x198] sm:$0xf0] }
 0x102   : > { %1587 = vmatpush.bf16.msra.mxu0 %v3406_v35  ;;  %v3383_v35 = vld [vmem:[#allocation8 + $0x18] sm:$0xf0] }
 0x103   : > { %1683 = vmatpush.bf16.msra.mxu2 %v3458_v18  ;;  %1636 = vmatpush.bf16.msra.mxu1 %v3598_v43 }
 0x107   : > { %1684 = vmatpush.bf16.msra.mxu2 %v3434_v13 }
 0x10b   : > { %1685 = vmatpush.bf16.msra.mxu2 %v3410_v46 }
 0x13b   : > { %v549_v14 = vpop.xlane.xlu2 %548 }
 0x13c   : > { %v595_v34 = vmul.f32 %v549_v14, %v4807_v33  ;;  %v3573_v14 = vld [vmem:[#allocation8 + $0x180] sm:$0xf] }
 0x13d   : > { %v3574_v46 = vor.u32 %v3948_v30, %v3573_v14 }
 0x13e   : > { %v4957_v55 = vadd.f32 1e-05, %v595_v34  ;;  %v3897_v34 = vld [vmem:[#allocation8 + $0x4] sm:$0xf] }
 0x13f   : > { %v3386_v49 = vor.u32 %v3897_v34, %v3383_v35  ;;  %1637 = vmatpush.bf16.msra.mxu1 %v3574_v46  ;;  %v411_v46 = vld [vmem:[#allocation7] sm:$0x3] }
 0x140   : > { %4136 = vrsqrt.f32 %v4957_v55  ;;  %vm633_vm2 = vweird.f32 %v4957_v55 }
 0x141   : > { %1686 = vmatpush.bf16.msra.mxu2 %v3386_v49 }
 0x142   : > { %v558_v18 = vpop.xlane.xlu1 %557 }
 0x143   : > { %v598_v2 = vmul.f32 %v558_v18, %v4807_v33  ;;  %v441_v3 = vpop.xlane.xlu2 %440  ;;  %v552_v4 = vpop.xlane.xlu0 %551 }
 0x144   : > { %v476_v5 = vmul.f32 %v4807_v33, %v441_v3  ;;  %v596_v0 = vmul.f32 %v552_v4, %v4807_v33  ;;  %v3578_v3 = vor.u32 %v3945_v50, %v3575_v58 }
 0x145   : > { %v4963_v1 = vadd.f32 1e-05, %v598_v2 }
 0x146   : > { %v4137_v24 = vpop.eup %4136  ;;  %v4966_v6 = vsub.f32 %v4821_v47, %v476_v5  ;;  %v4969_v7 = vsub.f32 %v4824_v48, %v476_v5  ;;  %v4971_v25 = vadd.f32 1e-05, %v596_v0  ;;  %v3381_v47 = vld [vmem:[#allocation8] sm:$0xf]  ;;  %1735 = vmatpush.bf16.msra.mxu3 %v3578_v3 }
 0x147   : > { %v628_v10 = vmul.f32 %v4137_v24, %v4957_v55  ;;  %4138 = vrsqrt.f32 %v4963_v1  ;;  %v3382_v29 = vor.u32 %v3900_v22, %v3381_v47  ;;  %vm634_vm1 = vweird.f32 %v4137_v24 }
 0x148   : > { %4140 = vrsqrt.f32 %v4971_v25  ;;  %v533_v13 = vmul.f32 %v4966_v6, %v4966_v6  ;;  %v534_v16 = vmul.f32 %v4969_v7, %v4969_v7  ;;  %vm635_vm3 = vmor %vm633_vm2, %vm634_vm1  ;;  %vm643_vm5 = vweird.f32 %v4971_v25 }
 0x149   : > { %v629_v17 = vmul.f32 %v4137_v24, %v628_v10  ;;  %1588 = vmatpush.bf16.msra.mxu0 %v3382_v29  ;;  %vm663_vm6 = vweird.f32 %v4963_v1 }
 0x14a   : > { %v561_v48 = vpop.xlane.xlu1 %560  ;;  %v574_v15 = vadd.f32 %v534_v16, %v533_v13 }
 0x14b   : > { %v630_v36 = vmul.f32 0.5, %v629_v17  ;;  %v599_v20 = vmul.f32 %v561_v48, %v4807_v33  ;;  %v444_v21 = vpop.xlane.xlu2 %443  ;;  %v555_v43 = vpop.xlane.xlu0 %554 }
 0x14c   : > { %v477_v18 = vmul.f32 %v4807_v33, %v444_v21  ;;  %v597_v2 = vmul.f32 %v555_v43, %v4807_v33  ;;  %575 = vadd.xlane.f32.xlu1 %v574_v15 }
 0x14d   : > { %v4983_v4 = vpop.eup %4138  ;;  %v631_v5 = vsub.f32 1.5, %v630_v36  ;;  %v4985_v0 = vadd.f32 1e-05, %v599_v20 }
 0x14e   : > { %v4141_v10 = vpop.eup %4140  ;;  %v658_v13 = vmul.f32 %v4983_v4, %v4963_v1  ;;  %v4990_v16 = vsub.f32 %v4866_v8, %v477_v18  ;;  %v4993_v17 = vsub.f32 %v4869_v9, %v477_v18  ;;  %v4998_v48 = vadd.f32 1e-05, %v597_v2  ;;  %v410_v9 = vld [vmem:[#allocation5] sm:$0x3] }
 0x14f   : > { %v632_v47 = vmul.f32 %v4137_v24, %v631_v5  ;;  %v638_v22 = vmul.f32 %v4141_v10, %v4971_v25  ;;  %4142 = vrsqrt.f32 %v4985_v0  ;;  %v5007_v49 = vperm.slane %v410_v9, 0 }
 0x150   : > { %v659_v14 = vmul.f32 %v4983_v4, %v658_v13  ;;  %v535_v15 = vmul.f32 %v4990_v16, %v4990_v16  ;;  %v536_v8 = vmul.f32 %v4993_v17, %v4993_v17  ;;  %4144 = vrsqrt.f32 %v4998_v48 }
 0x151   : > { %v639_v29 = vmul.f32 %v4141_v10, %v638_v22  ;;  %v636_v30 = vsel %vm635_vm3, %v4137_v24, %v632_v47  ;;  %vm644_vm4 = vweird.f32 %v4141_v10  ;;  %v5010_v18 = vperm.slane %v410_v9, 1 }
 0x152   : > { %v577_v36 = vadd.f32 %v536_v8, %v535_v15  ;;  %v660_v20 = vmul.f32 0.5, %v659_v14  ;;  %v453_v21 = vpop.xlane.xlu1 %452  ;;  %v787_v50 = vmul.f32 %v636_v30, %v4810_v37  ;;  %v788_v24 = vmul.f32 %v636_v30, %v4812_v38  ;;  %vm645_vm7 = vmor %vm643_vm5, %vm644_vm4 }
 0x153   : > { %v640_v34 = vmul.f32 0.5, %v639_v29  ;;  %v564_v55 = vpop.xlane.xlu2 %563  ;;  %v447_v35 = vpop.xlane.xlu0 %446  ;;  %v5018_v47 = vperm.slane %v411_v46, 0  ;;  %v5020_v22 = vperm.slane %v411_v46, 1  ;;  %v480_v29 = vmul.f32 %v4807_v33, %v453_v21 }
 0x154   : > { %v600_v43 = vmul.f32 %v564_v55, %v4807_v33  ;;  %578 = vadd.xlane.f32.xlu2 %v577_v36  ;;  %v661_v37 = vsub.f32 1.5, %v660_v20  ;;  %v824_v14 = vmul.f32 %v5007_v49, %v787_v50  ;;  %v825_v25 = vmul.f32 %v5010_v18, %v788_v24 }
 0x155   : > { %v641_v58 = vsub.f32 1.5, %v640_v34  ;;  %v5013_v2 = vpop.eup %4142  ;;  %vm664_vm8 = vweird.f32 %v4983_v4  ;;  %v478_v46 = vmul.f32 %v4807_v33, %v447_v35  ;;  %vm653_vm10 = vweird.f32 %v4998_v48 }
 0x156   : > { %v5016_v5 = vadd.f32 1e-05, %v600_v43  ;;  %v4145_v13 = vpop.eup %4144  ;;  %v668_v30 = vmul.f32 %v5013_v2, %v4985_v0  ;;  %v662_v36 = vmul.f32 %v4983_v4, %v661_v37  ;;  %v5037_v43 = vadd.f32 %v5018_v47, %v824_v14  ;;  %vm665_vm9 = vmor %vm663_vm6, %vm664_vm8 }
 0x157   : > { %v642_v3 = vmul.f32 %v4141_v10, %v641_v58  ;;  %v648_v38 = vmul.f32 %v4145_v13, %v4998_v48  ;;  %v5046_v50 = vadd.f32 %v5020_v22, %v825_v25  ;;  %vm654_vm11 = vweird.f32 %v4145_v13 }
 0x158   : > { %4146 = vrsqrt.f32 %v5016_v5  ;;  %6388 = vst [vmem:[#allocation19_spill] sm:$0xff] %v5037_v43  ;;  %v669_v1 = vmul.f32 %v5013_v2, %v668_v30  ;;  %v5075_v48 = vsub.f32 %v4894_v28, %v478_v46  ;;  %vm655_vm12 = vmor %vm653_vm10, %vm654_vm11  ;;  %vm683_vm13 = vweird.f32 %v5016_v5 }
 0x159   : > { %v646_v15 = vsel %vm645_vm7, %v4141_v10, %v642_v3  ;;  %v649_v34 = vmul.f32 %v4145_v13, %v648_v38  ;;  %6389 = vst [vmem:[#allocation20_spill] sm:$0xff] %v5046_v50  ;;  %v5067_v38 = vsub.f32 %v4884_v26, %v480_v29  ;;  %vm673_vm15 = vweird.f32 %v4985_v0 }
 0x15a   : > { %v789_v8 = vmul.f32 %v646_v15, %v4832_v53  ;;  %v790_v9 = vmul.f32 %v646_v15, %v4834_v54  ;;  %v5042_v54 = vsub.f32 %v4881_v23, %v480_v29  ;;  %v456_v3 = vpop.xlane.xlu1 %455  ;;  %v666_v23 = vsel %vm665_vm9, %v4983_v4, %v662_v36 }
 0x15b   : > { %v567_v55 = vpop.xlane.xlu2 %566  ;;  %v450_v10 = vpop.xlane.xlu0 %449  ;;  %v650_v53 = vmul.f32 0.5, %v649_v34  ;;  %v481_v4 = vmul.f32 %v4807_v33, %v456_v3  ;;  %v794_v28 = vmul.f32 %v666_v23, %v4830_v52  ;;  %vm674_vm0 = vweird.f32 %v5013_v2 }
 0x15c   : > { %v826_v20 = vmul.f32 %v5007_v49, %v789_v8  ;;  %v827_v21 = vmul.f32 %v5010_v18, %v790_v9  ;;  %v601_v37 = vmul.f32 %v567_v55, %v4807_v33  ;;  %v5072_v9 = vsub.f32 %v4891_v27, %v478_v46  ;;  %vm675_vm2 = vmor %vm673_vm15, %vm674_vm0 }
 0x15d   : > { %v651_v14 = vsub.f32 1.5, %v650_v53  ;;  %v479_v26 = vmul.f32 %v4807_v33, %v450_v10  ;;  %v541_v29 = vmul.f32 %v5042_v54, %v5042_v54  ;;  %v793_v27 = vmul.f32 %v666_v23, %v4828_v51 }
 0x15e   : > { %v5049_v58 = vadd.f32 %v5018_v47, %v826_v20  ;;  %v5052_v24 = vadd.f32 %v5020_v22, %v827_v21  ;;  %v5069_v25 = vpop.eup %4146  ;;  %v5080_v34 = vadd.f32 1e-05, %v601_v37  ;;  %v670_v55 = vmul.f32 0.5, %v669_v1 }
 0x15f   : > { %v652_v8 = vmul.f32 %v4145_v13, %v651_v14  ;;  %v678_v30 = vmul.f32 %v5069_v25, %v5016_v5  ;;  %v542_v53 = vmul.f32 %v5067_v38, %v5067_v38  ;;  %v5097_v51 = vsub.f32 %v4908_v39, %v481_v4 }
 0x160   : > { %6390 = vst [vmem:[#allocation21_spill] sm:$0xff] %v5049_v58  ;;  %v5060_v35 = vpack.c.bf16 %v5049_v58, %v5037_v43  ;;  %v5064_v15 = vpack.c.bf16 %v5052_v24, %v5046_v50  ;;  %v5100_v52 = vsub.f32 %v4911_v40, %v481_v4  ;;  %4148 = vrsqrt.f32 %v5080_v34  ;;  %v3934_v50 = vld [vmem:[#allocation8 + $0x12c] sm:$0xf] }
 0x161   : > { %6391 = vst [vmem:[#allocation22_spill] sm:$0xff] %v5052_v24  ;;  %v656_v36 = vsel %vm655_vm12, %v4145_v13, %v652_v8  ;;  %v679_v10 = vmul.f32 %v5069_v25, %v678_v30  ;;  %v5108_v37 = vsub.f32 %v4918_v41, %v479_v26  ;;  %v586_v1 = vadd.f32 %v542_v53, %v541_v29 }
 0x162   : > { %1589 = vmatmul.bf16.vlgmr.msra.gmra.mxu0 %v5060_v35  ;;  %1638 = vmatmul.bf16.vlgmr.msra.gmra.mxu1 %v5064_v15  ;;  %v791_v20 = vmul.f32 %v656_v36, %v4847_v60  ;;  %v792_v21 = vmul.f32 %v656_v36, %v4850_v61  ;;  %v537_v60 = vmul.f32 %v5072_v9, %v5072_v9  ;;  %v671_v29 = vsub.f32 1.5, %v670_v55 }
 0x163   : > { %1687 = vmatmul.bf16.vlgmr.msra.gmra.mxu2 %v5060_v35  ;;  %1736 = vmatmul.bf16.vlgmr.msra.gmra.mxu3 %v5064_v15  ;;  %v459_v46 = vpop.xlane.xlu2 %458  ;;  %v570_v3 = vpop.xlane.xlu0 %569  ;;  %v538_v61 = vmul.f32 %v5075_v48, %v5075_v48  ;;  %v680_v13 = vmul.f32 0.5, %v679_v10  ;;  %v5111_v14 = vsub.f32 %v4921_v42, %v479_v26  ;;  %v830_v8 = vmul.f32 %v5007_v49, %v793_v27 }
 0x164   : > { %v482_v40 = vmul.f32 %v4807_v33, %v459_v46  ;;  %v602_v23 = vmul.f32 %v570_v3, %v4807_v33  ;;  %v828_v4 = vmul.f32 %v5007_v49, %v791_v20  ;;  %v829_v30 = vmul.f32 %v5010_v18, %v792_v21  ;;  %587 = vadd.xlane.f32.xlu2 %v586_v1 }
 0x165   : > { %v580_v39 = vadd.f32 %v538_v61, %v537_v60  ;;  %v831_v36 = vmul.f32 %v5010_v18, %v794_v28  ;;  %v681_v41 = vsub.f32 1.5, %v680_v13  ;;  %v543_v42 = vmul.f32 %v5097_v51, %v5097_v51 }
 0x166   : > { %v544_v26 = vmul.f32 %v5100_v52, %v5100_v52  ;;  %vm684_vm14 = vweird.f32 %v5069_v25  ;;  %v618_v27 = vadd.f32 1e-05, %v602_v23  ;;  %v5126_v20 = vsub.f32 %v4939_v59, %v482_v40  ;;  %v4149_v53 = vpop.eup %4148 }
 0x167   : > { %581 = vadd.xlane.f32.xlu0 %v580_v39  ;;  %v5129_v21 = vsub.f32 %v4942_v19, %v482_v40  ;;  %v539_v28 = vmul.f32 %v5108_v37, %v5108_v37  ;;  %v540_v10 = vmul.f32 %v5111_v14, %v5111_v14  ;;  %v5137_v55 = vadd.f32 %v5018_v47, %v828_v4  ;;  %vm685_vm1 = vmor %vm683_vm13, %vm684_vm14 }
 0x168   : > { %v5140_v46 = vadd.f32 %v5020_v22, %v829_v30  ;;  %4150 = vrsqrt.f32 %v618_v27  ;;  %v682_v59 = vmul.f32 %v5069_v25, %v681_v41  ;;  %v589_v19 = vadd.f32 %v544_v26, %v543_v42 }
 0x169   : > { %6392 = vst [vmem:[#allocation23_spill] sm:$0xff] %v5137_v55  ;;  %v583_v3 = vadd.f32 %v540_v10, %v539_v28  ;;  %v5145_v60 = vadd.f32 %v5018_v47, %v830_v8  ;;  %v5148_v61 = vadd.f32 %v5020_v22, %v831_v36  ;;  %v672_v13 = vmul.f32 %v5013_v2, %v671_v29 }
 0x16a   : > { %6393 = vst [vmem:[#allocation24_spill] sm:$0xff] %v5140_v46  ;;  %v688_v1 = vmul.f32 %v4149_v53, %v5080_v34  ;;  %v545_v39 = vmul.f32 %v5126_v20, %v5126_v20  ;;  %v546_v40 = vmul.f32 %v5129_v21, %v5129_v21  ;;  %v686_v8 = vsel %vm685_vm1, %v5069_v25, %v682_v59 }
 0x16b   : > { %6394 = vst [vmem:[#allocation25_spill] sm:$0xff] %v5145_v60  ;;  %584 = vadd.xlane.f32.xlu1 %v583_v3  ;;  %v5164_v23 = vpack.c.bf16 %v5145_v60, %v5137_v55  ;;  %v5168_v5 = vpack.c.bf16 %v5148_v61, %v5140_v46  ;;  %v676_v30 = vsel %vm675_vm2, %v5013_v2, %v672_v13  ;;  %vm703_vm3 = vweird.f32 %v618_v27 }
 0x16c   : > { %6395 = vst [vmem:[#allocation26_spill] sm:$0xff] %v5148_v61  ;;  %v689_v0 = vmul.f32 %v4149_v53, %v688_v1  ;;  %v592_v41 = vadd.f32 %v546_v40, %v545_v39  ;;  %v797_v42 = vmul.f32 %v686_v8, %v4872_v11  ;;  %v798_v26 = vmul.f32 %v686_v8, %v4875_v12  ;;  %v3749_v61 = vld [vmem:[#allocation8 + $0x2d8] sm:$0xf] }
 0x16d   : > { %v795_v29 = vmul.f32 %v676_v30, %v4838_v56  ;;  %v796_v28 = vmul.f32 %v676_v30, %v4840_v57  ;;  %vm693_vm5 = vweird.f32 %v5080_v34  ;;  %vm694_vm6 = vweird.f32 %v4149_v53 }
 0x16e   : > { %v4151_v4 = vpop.eup %4150  ;;  %v690_v10 = vmul.f32 0.5, %v689_v0  ;;  %v834_v2 = vmul.f32 %v5007_v49, %v797_v42  ;;  %vm695_vm8 = vmor %vm693_vm5, %vm694_vm6 }
 0x16f   : > { %590 = vadd.xlane.f32.xlu0 %v589_v19  ;;  %v698_v36 = vmul.f32 %v4151_v4, %v618_v27  ;;  %v835_v19 = vmul.f32 %v5010_v18, %v798_v26  ;;  %v832_v13 = vmul.f32 %v5007_v49, %v795_v29  ;;  %v833_v11 = vmul.f32 %v5010_v18, %v796_v28 }
 0x170   : > { %v691_v1 = vsub.f32 1.5, %v690_v10  ;;  %vm704_vm4 = vweird.f32 %v4151_v4  ;;  %v5185_v12 = vadd.f32 %v5018_v47, %v834_v2 }
 0x171   : > { %v699_v25 = vmul.f32 %v4151_v4, %v698_v36  ;;  %v5188_v56 = vadd.f32 %v5020_v22, %v835_v19  ;;  %v5192_v39 = vadd.f32 %v5018_v47, %v832_v13  ;;  %vm705_vm7 = vmor %vm703_vm3, %vm704_vm4  ;;  %v5195_v40 = vadd.f32 %v5020_v22, %v833_v11 }
 0x172   : > { %1594 = vmatmul.bf16.gmra.mxu0 %v5164_v23  ;;  %1643 = vmatmul.bf16.gmra.mxu1 %v5168_v5  ;;  %6396 = vst [vmem:[#allocation27_spill] sm:$0xff] %v5185_v12  ;;  %v692_v8 = vmul.f32 %v4149_v53, %v691_v1 }
 0x173   : > { %1692 = vmatmul.bf16.gmra.mxu2 %v5164_v23  ;;  %1741 = vmatmul.bf16.gmra.mxu3 %v5168_v5  ;;  %v700_v59 = vmul.f32 0.5, %v699_v25  ;;  %6397 = vst [vmem:[#allocation28_spill] sm:$0xff] %v5188_v56  ;;  %v5199_v27 = vpack.c.bf16 %v5185_v12, %v5192_v39  ;;  %v5203_v30 = vpack.c.bf16 %v5188_v56, %v5195_v40  ;;  %v3727_v12 = vld [vmem:[#allocation8 + $0x2c0] sm:$0xf0] }
 0x174   : > { %593 = vadd.xlane.f32.xlu1 %v592_v41  ;;  %6398 = vst [vmem:[#allocation29_spill] sm:$0xff] %v5192_v39  ;;  %v696_v0 = vsel %vm695_vm8, %v4149_v53, %v692_v8 }
 0x175   : > { %v701_v3 = vsub.f32 1.5, %v700_v59  ;;  %6399 = vst [vmem:[#allocation30_spill] sm:$0xff] %v5195_v40  ;;  %v799_v42 = vmul.f32 %v696_v0, %v4899_v31  ;;  %v800_v26 = vmul.f32 %v696_v0, %v4902_v32  ;;  %v573_v59 = vpop.xlane.xlu0 %572  ;;  %v3943_v40 = vld [vmem:[#allocation8 + $0x16c] sm:$0xf0] }
 0x176   : > { %v603_v2 = vmul.f32 %v573_v59, %v4807_v33 }
 0x177   : > { %v702_v57 = vmul.f32 %v4151_v4, %v701_v3  ;;  %v836_v53 = vmul.f32 %v5007_v49, %v799_v42  ;;  %v837_v29 = vmul.f32 %v5010_v18, %v800_v26 }
 0x178   : > { %v619_v19 = vadd.f32 1e-05, %v603_v2 }
 0x179   : > { %v706_v34 = vsel %vm705_vm7, %v4151_v4, %v702_v57  ;;  %v5227_v31 = vadd.f32 %v5020_v22, %v837_v29 }
 0x17a   : > { %v801_v36 = vmul.f32 %v706_v34, %v4926_v44  ;;  %v802_v41 = vmul.f32 %v706_v34, %v4929_v45  ;;  %v5224_v45 = vadd.f32 %v5018_v47, %v836_v53  ;;  %4152 = vrsqrt.f32 %v619_v19 }
 0x17b   : > { %6403 = vst [vmem:[#allocation34_spill] sm:$0xff] %v5227_v31  ;;  %vm713_vm9 = vweird.f32 %v619_v19 }
 0x17c   : > { %v838_v25 = vmul.f32 %v5007_v49, %v801_v36  ;;  %v839_v4 = vmul.f32 %v5010_v18, %v802_v41  ;;  %6402 = vst [vmem:[#allocation33_spill] sm:$0xff] %v5224_v45 }
 0x17e   : > { %v5218_v28 = vadd.f32 %v5018_v47, %v838_v25  ;;  %v5221_v44 = vadd.f32 %v5020_v22, %v839_v4 }
 0x180   : > { %6400 = vst [vmem:[#allocation31_spill] sm:$0xff] %v5218_v28  ;;  %v5231_v32 = vpack.c.bf16 %v5218_v28, %v5224_v45  ;;  %v5235_v10 = vpack.c.bf16 %v5221_v44, %v5227_v31  ;;  %v4153_v3 = vpop.eup %4152 }
 0x181   : > { %6401 = vst [vmem:[#allocation32_spill] sm:$0xff] %v5221_v44  ;;  %v708_v13 = vmul.f32 %v4153_v3, %v619_v19  ;;  %vm714_vm10 = vweird.f32 %v4153_v3 }
 0x182   : > { %1599 = vmatmul.bf16.gmra.mxu0 %v5199_v27  ;;  %1648 = vmatmul.bf16.gmra.mxu1 %v5203_v30  ;;  %vm715_vm11 = vmor %vm713_vm9, %vm714_vm10 }
 0x183   : > { %1697 = vmatmul.bf16.gmra.mxu2 %v5199_v27  ;;  %1746 = vmatmul.bf16.gmra.mxu3 %v5203_v30  ;;  %v709_v11 = vmul.f32 %v4153_v3, %v708_v13 }
 0x185   : > { %v710_v34 = vmul.f32 0.5, %v709_v11 }
 0x187   : > { %v711_v0 = vsub.f32 1.5, %v710_v34 }
 0x189   : > { %v712_v26 = vmul.f32 %v4153_v3, %v711_v0 }
 0x18b   : > { %v716_v29 = vsel %vm715_vm11, %v4153_v3, %v712_v26 }
 0x18c   : > { %v803_v13 = vmul.f32 %v716_v29, %v4945_v62  ;;  %v804_v19 = vmul.f32 %v716_v29, %v4948_v63 }
 0x18e   : > { %v840_v0 = vmul.f32 %v5007_v49, %v803_v13  ;;  %v841_v3 = vmul.f32 %v5010_v18, %v804_v19 }
 0x192   : > { %1604 = vmatmul.bf16.gmra.mxu0 %v5231_v32  ;;  %1653 = vmatmul.bf16.gmra.mxu1 %v5235_v10 }
 0x193   : > { %1702 = vmatmul.bf16.gmra.mxu2 %v5231_v32  ;;  %1751 = vmatmul.bf16.gmra.mxu3 %v5235_v10 }
 0x1bf   : > { %v576_v1 = vpop.xlane.xlu1 %575 }
 0x1c0   : > { %v604_v57 = vmul.f32 %v576_v1, %v4807_v33 }
 0x1c2   : > { %v620_v8 = vadd.f32 1e-05, %v604_v57 }
 0x1c4   : > { %4154 = vrsqrt.f32 %v620_v8  ;;  %vm723_vm13 = vweird.f32 %v620_v8 }
 0x1c7   : > { %v579_v36 = vpop.xlane.xlu2 %578 }
 0x1c8   : > { %v605_v41 = vmul.f32 %v579_v36, %v4807_v33 }
 0x1ca   : > { %v4155_v42 = vpop.eup %4154  ;;  %v5244_v4 = vadd.f32 1e-05, %v605_v41 }
 0x1cb   : > { %v718_v25 = vmul.f32 %v4155_v42, %v620_v8  ;;  %vm724_vm12 = vweird.f32 %v4155_v42  ;;  %v5261_v8 = vadd.f32 %v5018_v47, %v840_v0 }
 0x1cc   : > { %4156 = vrsqrt.f32 %v5244_v4  ;;  %vm725_vm14 = vmor %vm723_vm13, %vm724_vm12  ;;  %vm733_vm15 = vweird.f32 %v5244_v4 }
 0x1cd   : > { %v719_v53 = vmul.f32 %v4155_v42, %v718_v25  ;;  %6404 = vst [vmem:[#allocation35_spill] sm:$0xff] %v5261_v8 }
 0x1cf   : > { %v720_v59 = vmul.f32 0.5, %v719_v53 }
 0x1d1   : > { %v721_v2 = vsub.f32 1.5, %v720_v59 }
 0x1d2   : > { %v5249_v11 = vpop.eup %4156 }
 0x1d3   : > { %v722_v1 = vmul.f32 %v4155_v42, %v721_v2  ;;  %v728_v34 = vmul.f32 %v5249_v11, %v5244_v4  ;;  %vm734_vm0 = vweird.f32 %v5249_v11 }
 0x1d4   : > { %vm735_vm1 = vmor %vm733_vm15, %vm734_vm0 }
 0x1d5   : > { %v726_v57 = vsel %vm725_vm14, %v4155_v42, %v722_v1  ;;  %v729_v26 = vmul.f32 %v5249_v11, %v728_v34  ;;  %v5264_v42 = vadd.f32 %v5020_v22, %v841_v3  ;;  %v1005_v1 = vld [vmem:[#allocation10] sm:$0xff] }
 0x1d6   : > { %v805_v36 = vmul.f32 %v726_v57, %v4966_v6  ;;  %v806_v41 = vmul.f32 %v726_v57, %v4969_v7 }
 0x1d7   : > { %6405 = vst [vmem:[#allocation36_spill] sm:$0xff] %v5264_v42  ;;  %v588_v6 = vpop.xlane.xlu2 %587  ;;  %v730_v13 = vmul.f32 0.5, %v729_v26 }
 0x1d8   : > { %v842_v62 = vmul.f32 %v5007_v49, %v805_v36  ;;  %v843_v63 = vmul.f32 %v5010_v18, %v806_v41  ;;  %v608_v59 = vmul.f32 %v588_v6, %v4807_v33 }
 0x1d9   : > { %v731_v41 = vsub.f32 1.5, %v730_v13 }
 0x1da   : > { %v5267_v25 = vadd.f32 %v5018_v47, %v842_v62  ;;  %v5270_v53 = vadd.f32 %v5020_v22, %v843_v63  ;;  %v582_v2 = vpop.xlane.xlu0 %581  ;;  %v5282_v57 = vadd.f32 1e-05, %v608_v59  ;;  %v3940_v62 = vld [vmem:[#allocation8 + $0x15c] sm:$0xf]  ;;  %v3559_v63 = vld [vmem:[#allocation8 + $0x170] sm:$0xf0] }
 0x1db   : > { %v606_v19 = vmul.f32 %v582_v2, %v4807_v33  ;;  %v3562_v59 = vor.u32 %v3940_v62, %v3559_v63  ;;  %v3988_v63 = vld [vmem:[#allocation8 + $0x2dc] sm:$0xf] }
 0x1dc   : > { %6406 = vst [vmem:[#allocation37_spill] sm:$0xff] %v5267_v25  ;;  %v5274_v7 = vpack.c.bf16 %v5267_v25, %v5261_v8  ;;  %v5278_v29 = vpack.c.bf16 %v5270_v53, %v5264_v42  ;;  %4158 = vrsqrt.f32 %v5282_v57  ;;  %v1006_v42 = vld [vmem:[#allocation10 + $0x8] sm:$0xff]  ;;  %v3991_v8 = vld [vmem:[#allocation8 + $0x2ec] sm:$0xf0]  ;;  %vm763_vm4 = vweird.f32 %v5282_v57 }
 0x1dd   : > { %6407 = vst [vmem:[#allocation38_spill] sm:$0xff] %v5270_v53  ;;  %v5286_v34 = vadd.f32 1e-05, %v606_v19  ;;  %1875 = vmatpush.bf16.msrb.mxu2 %v3562_v59  ;;  %v732_v53 = vmul.f32 %v5249_v11, %v731_v41 }
 0x1de   : > { %1609 = vmatmul.bf16.gmra.mxu0 %v5274_v7  ;;  %1658 = vmatmul.bf16.gmra.mxu1 %v5278_v29  ;;  %v585_v26 = vpop.xlane.xlu1 %584 }
 0x1df   : > { %1707 = vmatmul.bf16.gmra.mxu2 %v5274_v7  ;;  %1756 = vmatmul.bf16.gmra.mxu3 %v5278_v29  ;;  %v1590_v0 = vpop.f32.mrf.mxu0  ;;  %v1639_v3 = vpop.f32.mrf.mxu1  ;;  %4160 = vrsqrt.f32 %v5286_v34  ;;  %v607_v2 = vmul.f32 %v585_v26, %v4807_v33  ;;  %v3751_v26 = vld [vmem:[#allocation8 + $0x2f0] sm:$0xf0]  ;;  %v736_v46 = vsel %vm735_vm1, %v5249_v11, %v732_v53  ;;  %v3937_v11 = vld [vmem:[#allocation8 + $0x13c] sm:$0xf0]  ;;  %vm743_vm3 = vweird.f32 %v5286_v34 }
 0x1e0   : > { %v1591_v36 = vadd.f32 %v1590_v0, %v1005_v1  ;;  %v3754_v31 = vor.u32 %v3988_v63, %v3751_v26  ;;  %v3535_v63 = vld [vmem:[#allocation8 + $0x140] sm:$0xf0]  ;;  %v3982_v26 = vld [vmem:[#allocation8 + $0x2ac] sm:$0xf] }
 0x1e1   : > { %v5298_v1 = vadd.f32 1e-05, %v607_v2  ;;  %v3557_v2 = vld [vmem:[#allocation8 + $0x158] sm:$0xf]  ;;  %v3538_v53 = vor.u32 %v3934_v50, %v3535_v63 }
 0x1e2   : > { %v5292_v6 = vadd.f32 %v1639_v3, %v1591_v36  ;;  %v591_v19 = vpop.xlane.xlu0 %590  ;;  %v5301_v0 = vpop.eup %4158  ;;  %v3558_v24 = vor.u32 %v3943_v40, %v3557_v2  ;;  %1924 = vmatpush.bf16.msrb.mxu3 %v3754_v31  ;;  %v3533_v40 = vld [vmem:[#allocation8 + $0x128] sm:$0xf] }
 0x1e3   : > { %v609_v13 = vmul.f32 %v591_v19, %v4807_v33  ;;  %v758_v62 = vmul.f32 %v5301_v0, %v5282_v57  ;;  %4162 = vrsqrt.f32 %v5298_v1  ;;  %v3725_v2 = vld [vmem:[#allocation8 + $0x2a8] sm:$0xf]  ;;  %1876 = vmatpush.bf16.msrb.mxu2 %v3538_v53  ;;  %v3976_v53 = vld [vmem:[#allocation8 + $0x27c] sm:$0xf]  ;;  %vm764_vm6 = vweird.f32 %v5301_v0 }
 0x1e4   : > { %6408 = vst [vmem:[#allocation39_spill] sm:$0xff] %v5292_v6  ;;  %1777 = vmatpush.bf16.msrb.mxu0 %v3558_v24  ;;  %vm753_vm7 = vweird.f32 %v5298_v1  ;;  %vm5377_vm9 = vmor %vm763_vm4, %vm764_vm6 }
 0x1e5   : > { %v5303_v36 = vpop.eup %4160  ;;  %v5314_v44 = vadd.f32 1e-05, %v609_v13  ;;  %v759_v28 = vmul.f32 %v5301_v0, %v758_v62  ;;  %v3750_v13 = vor.u32 %v3991_v8, %v3749_v61  ;;  %v3534_v62 = vor.u32 %v3937_v11, %v3533_v40  ;;  %v1017_v8 = vld [vmem:[#allocation10 + $0x60] sm:$0xff] }
 0x1e6   : > { %v1688_v3 = vpop.f32.mrf.mxu2  ;;  %v1737_v41 = vpop.f32.mrf.mxu3  ;;  %v738_v19 = vmul.f32 %v5303_v36, %v5286_v34  ;;  %v807_v61 = vmul.f32 %v736_v46, %v4990_v16  ;;  %vm744_vm2 = vweird.f32 %v5303_v36 }
 0x1e7   : > { %v5308_v59 = vpop.f32.mrf.mxu0  ;;  %v5316_v56 = vpop.f32.mrf.mxu1  ;;  %v1689_v25 = vadd.f32 %v1688_v3, %v1006_v42  ;;  %4164 = vrsqrt.f32 %v5314_v44  ;;  %1826 = vmatpush.bf16.msrb.mxu1 %v3750_v13  ;;  %v3730_v3 = vor.u32 %v3982_v26, %v3727_v12  ;;  %vm745_vm5 = vmor %vm743_vm3, %vm744_vm2  ;;  %vm773_vm13 = vweird.f32 %v5314_v44 }
 0x1e8   : > { %v739_v4 = vmul.f32 %v5303_v36, %v738_v19  ;;  %v594_v45 = vpop.xlane.xlu1 %593  ;;  %v3985_v19 = vld [vmem:[#allocation8 + $0x2bc] sm:$0xf0]  ;;  %1778 = vmatpush.bf16.msrb.mxu0 %v3534_v62 }
 0x1e9   : > { %v610_v39 = vmul.f32 %v594_v45, %v4807_v33  ;;  %v5323_v60 = vadd.f32 %v1737_v41, %v1689_v25  ;;  %v5325_v55 = vpop.eup %4162  ;;  %v3726_v33 = vor.u32 %v3985_v19, %v3725_v2  ;;  %v3928_v45 = vld [vmem:[#allocation8 + $0xfc] sm:$0xf]  ;;  %v760_v25 = vmul.f32 0.5, %v759_v28  ;;  %1925 = vmatpush.bf16.msrb.mxu3 %v3730_v3  ;;  %v3511_v41 = vld [vmem:[#allocation8 + $0x110] sm:$0xf0] }
 0x1ea   : > { %v740_v42 = vmul.f32 0.5, %v739_v4  ;;  %v748_v50 = vmul.f32 %v5325_v55, %v5298_v1  ;;  %v808_v4 = vmul.f32 %v736_v46, %v4993_v17  ;;  %v3514_v11 = vor.u32 %v3928_v45, %v3511_v41  ;;  %v3703_v3 = vld [vmem:[#allocation8 + $0x290] sm:$0xf0]  ;;  %v3979_v1 = vld [vmem:[#allocation8 + $0x28c] sm:$0xf0] }
 0x1eb   : > { %6409 = vst [vmem:[#allocation40_spill] sm:$0xff] %v5323_v60  ;;  %v5328_v31 = vadd.f32 1e-05, %v610_v39  ;;  %1827 = vmatpush.bf16.msrb.mxu1 %v3726_v33  ;;  %v844_v17 = vmul.f32 %v5007_v49, %v807_v61  ;;  %v761_v46 = vsub.f32 1.5, %v760_v25  ;;  %vm754_vm8 = vweird.f32 %v5325_v55 }
 0x1ec   : > { %v741_v24 = vsub.f32 1.5, %v740_v42  ;;  %v749_v63 = vmul.f32 %v5325_v55, %v748_v50  ;;  %1877 = vmatpush.bf16.msrb.mxu2 %v3514_v11  ;;  %v845_v62 = vmul.f32 %v5010_v18, %v808_v4  ;;  %vm755_vm10 = vmor %vm753_vm7, %vm754_vm8 }
 0x1ed   : > { %4166 = vrsqrt.f32 %v5328_v31  ;;  %v5340_v28 = vpop.eup %4164  ;;  %v762_v50 = vmul.f32 %v5301_v0, %v761_v46  ;;  %vm783_vm11 = vweird.f32 %v5328_v31 }
 0x1ee   : > { %v5333_v12 = vpop.f32.mrf.mxu2  ;;  %v5338_v16 = vpop.f32.mrf.mxu3  ;;  %v742_v13 = vmul.f32 %v5303_v36, %v741_v24  ;;  %v750_v42 = vmul.f32 0.5, %v749_v63  ;;  %v5364_v24 = vadd.f32 %v5018_v47, %v844_v17  ;;  %vm774_vm15 = vweird.f32 %v5340_v28 }
 0x1ef   : > { %6410 = vst [vmem:[#allocation41_spill] sm:$0xff] %v5333_v12  ;;  %v1595_v39 = vpop.f32.mrf.mxu0  ;;  %v1644_v40 = vpop.f32.mrf.mxu1  ;;  %vm5479_vm0 = vmor %vm773_vm13, %vm774_vm15  ;;  %v1086_v12 = vld [vmem:[#allocation10 + $0x288] sm:$0xff] }
 0x1f0   : > { %6411 = vst [vmem:[#allocation42_spill] sm:$0xff] %v5338_v16  ;;  %v1596_v26 = vadd.f32 %v1595_v39, %v1017_v8  ;;  %v746_v34 = vsel %vm745_vm5, %v5303_v36, %v742_v13  ;;  %v768_v8 = vmul.f32 %v5340_v28, %v5314_v44  ;;  %v751_v33 = vsub.f32 1.5, %v750_v42  ;;  %v3949_v44 = vld [vmem:[#allocation8 + $0x19c] sm:$0xf0] }
 0x1f1   : > { %v809_v2 = vmul.f32 %v746_v34, %v5072_v9  ;;  %v810_v19 = vmul.f32 %v746_v34, %v5075_v48  ;;  %v1018_v9 = vld [vmem:[#allocation10 + $0x68] sm:$0xff]  ;;  %v3706_v48 = vor.u32 %v3976_v53, %v3703_v3  ;;  %6413 = vst [vmem:[#allocation44_spill] sm:$0xff] %v5364_v24  ;;  %v5371_v13 = vadd.f32 %v5020_v22, %v845_v62  ;;  %v3509_v53 = vld [vmem:[#allocation8 + $0xf8] sm:$0xf]  ;;  %v3931_v3 = vld [vmem:[#allocation8 + $0x10c] sm:$0xf0] }
 0x1f2   : > { %v5356_v61 = vadd.f32 %v1644_v40, %v1596_v26  ;;  %v752_v41 = vmul.f32 %v5325_v55, %v751_v33  ;;  %v769_v11 = vmul.f32 %v5340_v28, %v768_v8  ;;  %v3701_v8 = vld [vmem:[#allocation8 + $0x278] sm:$0xf]  ;;  %v3485_v33 = vld [vmem:[#allocation8 + $0xc8] sm:$0xf]  ;;  %v1009_v16 = vld [vmem:[#allocation10 + $0x20] sm:$0xff] }
 0x1f3   : > { %v5358_v36 = vpop.eup %4166  ;;  %v846_v45 = vmul.f32 %v5007_v49, %v809_v2  ;;  %v847_v25 = vmul.f32 %v5010_v18, %v810_v19  ;;  %6414 = vst [vmem:[#allocation45_spill] sm:$0xff] %v5371_v13  ;;  %1926 = vmatpush.bf16.msrb.mxu3 %v3706_v48  ;;  %v3677_v48 = vld [vmem:[#allocation8 + $0x248] sm:$0xf] }
 0x1f4   : > { %6412 = vst [vmem:[#allocation43_spill] sm:$0xff] %v5356_v61  ;;  %v778_v4 = vmul.f32 %v5358_v36, %v5328_v31  ;;  %v756_v19 = vsel %vm755_vm10, %v5325_v55, %v752_v41  ;;  %v3510_v55 = vor.u32 %v3931_v3, %v3509_v53  ;;  %v3922_v41 = vld [vmem:[#allocation8 + $0xcc] sm:$0xf]  ;;  %vm784_vm12 = vweird.f32 %v5358_v36 }
 0x1f5   : > { %v5382_v26 = vadd.f32 %v5018_v47, %v846_v45  ;;  %v5385_v40 = vadd.f32 %v5020_v22, %v847_v25  ;;  %v766_v45 = vsel %vm5377_vm9, %v5301_v0, %v762_v50  ;;  %v812_v63 = vmul.f32 %v756_v19, %v5111_v14  ;;  %v3461_v14 = vld [vmem:[#allocation8 + $0x98] sm:$0xf]  ;;  %vm5449_vm14 = vmor %vm783_vm11, %vm784_vm12 }
 0x1f6   : > { %v1693_v39 = vpop.f32.mrf.mxu2  ;;  %v1742_v17 = vpop.f32.mrf.mxu3  ;;  %v779_v57 = vmul.f32 %v5358_v36, %v778_v4  ;;  %v3973_v4 = vld [vmem:[#allocation8 + $0x25c] sm:$0xf0]  ;;  %v3702_v0 = vor.u32 %v3979_v1, %v3701_v8  ;;  %v813_v50 = vmul.f32 %v766_v45, %v5042_v54  ;;  %1779 = vmatpush.bf16.msrb.mxu0 %v3510_v55  ;;  %v3653_v1 = vld [vmem:[#allocation8 + $0x218] sm:$0xf]  ;;  %v3967_v55 = vld [vmem:[#allocation8 + $0x22c] sm:$0xf0] }
 0x1f7   : > { %6417 = vst [vmem:[#allocation46_spill] sm:$0xff] %v5382_v26  ;;  %v5388_v46 = vpop.f32.mrf.mxu0  ;;  %v1694_v34 = vadd.f32 %v1693_v39, %v1018_v9  ;;  %v5395_v42 = vpop.f32.mrf.mxu1  ;;  %v5399_v62 = vpack.c.bf16 %v5382_v26, %v5364_v24  ;;  %v5403_v2 = vpack.c.bf16 %v5385_v40, %v5371_v13  ;;  %v3925_v9 = vld [vmem:[#allocation8 + $0xdc] sm:$0xf0]  ;;  %v5411_v39 = vmul.f32 0.5, %v769_v11 }
 0x1f8   : > { %6418 = vst [vmem:[#allocation47_spill] sm:$0xff] %v5385_v40  ;;  %v780_v26 = vmul.f32 0.5, %v779_v57  ;;  %v3487_v40 = vld [vmem:[#allocation8 + $0xe0] sm:$0xf0]  ;;  %v811_v13 = vmul.f32 %v756_v19, %v5108_v37  ;;  %1828 = vmatpush.bf16.msrb.mxu1 %v3702_v0  ;;  %v3486_v3 = vor.u32 %v3925_v9, %v3485_v33  ;;  %v3678_v37 = vor.u32 %v3973_v4, %v3677_v48  ;;  %v3919_v19 = vld [vmem:[#allocation8 + $0xac] sm:$0xf0] }
 0x1f9   : > { %6419 = vst [vmem:[#allocation48_spill] sm:$0xff] %v5388_v46  ;;  %v5409_v25 = vadd.f32 %v1742_v17, %v1694_v34  ;;  %1614 = vmatmul.bf16.gmra.mxu0 %v5399_v62  ;;  %1663 = vmatmul.bf16.gmra.mxu1 %v5403_v2  ;;  %v1029_v11 = vld [vmem:[#allocation10 + $0xc0] sm:$0xff]  ;;  %v3970_v17 = vld [vmem:[#allocation8 + $0x24c] sm:$0xf]  ;;  %v814_v34 = vmul.f32 %v766_v45, %v5067_v38  ;;  %v3916_v9 = vld [vmem:[#allocation8 + $0x9c] sm:$0xf] }
 0x1fa   : > { %6420 = vst [vmem:[#allocation49_spill] sm:$0xff] %v5395_v42  ;;  %1712 = vmatmul.bf16.gmra.mxu2 %v5399_v62  ;;  %1761 = vmatmul.bf16.gmra.mxu3 %v5403_v2  ;;  %v3679_v57 = vld [vmem:[#allocation8 + $0x260] sm:$0xf0]  ;;  %v3490_v24 = vor.u32 %v3922_v41, %v3487_v40  ;;  %v781_v43 = vsub.f32 1.5, %v780_v26  ;;  %v849_v38 = vmul.f32 %v5010_v18, %v812_v63  ;;  %v3463_v40 = vld [vmem:[#allocation8 + $0xb0] sm:$0xf0] }
 0x1fb   : > { %6421 = vst [vmem:[#allocation50_spill] sm:$0xff] %v5409_v25  ;;  %v848_v25 = vmul.f32 %v5007_v49, %v811_v13  ;;  %v3682_v33 = vor.u32 %v3970_v17, %v3679_v57  ;;  %v3964_v48 = vld [vmem:[#allocation8 + $0x21c] sm:$0xf]  ;;  %v850_v4 = vmul.f32 %v5007_v49, %v813_v50  ;;  %1780 = vmatpush.bf16.msrb.mxu0 %v3486_v3  ;;  %v3655_v26 = vld [vmem:[#allocation8 + $0x230] sm:$0xf0]  ;;  %v1098_v46 = vld [vmem:[#allocation10 + $0x2e8] sm:$0xff] }
 0x1fc   : > { %1878 = vmatpush.bf16.msrb.mxu2 %v3490_v24  ;;  %v3437_v41 = vld [vmem:[#allocation8 + $0x68] sm:$0xf]  ;;  %v3913_v0 = vld [vmem:[#allocation8 + $0x7c] sm:$0xf0]  ;;  %v851_v58 = vmul.f32 %v5010_v18, %v814_v34  ;;  %1829 = vmatpush.bf16.msrb.mxu1 %v3678_v37  ;;  %v3462_v24 = vor.u32 %v3919_v19, %v3461_v14  ;;  %v3439_v17 = vld [vmem:[#allocation8 + $0x80] sm:$0xf0]  ;;  %v3654_v57 = vor.u32 %v3967_v55, %v3653_v1 }
 0x1fd   : > { %1927 = vmatpush.bf16.msrb.mxu3 %v3682_v33  ;;  %v3629_v63 = vld [vmem:[#allocation8 + $0x1e8] sm:$0xf]  ;;  %v3466_v50 = vor.u32 %v3916_v9, %v3463_v40  ;;  %v3631_v3 = vld [vmem:[#allocation8 + $0x200] sm:$0xf0]  ;;  %v5438_v34 = vadd.f32 %v5020_v22, %v849_v38  ;;  %v3658_v37 = vor.u32 %v3964_v48, %v3655_v26  ;;  %v5442_v14 = vadd.f32 %v5018_v47, %v850_v4  ;;  %v3907_v55 = vld [vmem:[#allocation8 + $0x4c] sm:$0xf0] }
 0x1fe   : > { %v5421_v53 = vpop.f32.mrf.mxu2  ;;  %v5424_v8 = vpop.f32.mrf.mxu3  ;;  %v5454_v38 = vadd.f32 %v5020_v22, %v851_v58  ;;  %v3605_v40 = vld [vmem:[#allocation8 + $0x1b8] sm:$0xf]  ;;  %v3904_v48 = vld [vmem:[#allocation8 + $0x3c] sm:$0xf]  ;;  %v3415_v4 = vld [vmem:[#allocation8 + $0x50] sm:$0xf0] }
 0x1ff   : > { %6422 = vst [vmem:[#allocation51_spill] sm:$0xff] %v5421_v53  ;;  %v1600_v54 = vpop.f32.mrf.mxu0  ;;  %v1649_v61 = vpop.f32.mrf.mxu1  ;;  %v5435_v53 = vadd.f32 %v5018_v47, %v848_v25  ;;  %1781 = vmatpush.bf16.msrb.mxu0 %v3462_v24  ;;  %v3438_v25 = vor.u32 %v3913_v0, %v3437_v41  ;;  %v3955_v41 = vld [vmem:[#allocation8 + $0x1cc] sm:$0xf0]  ;;  %v3952_v0 = vld [vmem:[#allocation8 + $0x1bc] sm:$0xf] }
 0x200   : > { %6423 = vst [vmem:[#allocation52_spill] sm:$0xff] %v5424_v8  ;;  %v1601_v45 = vadd.f32 %v1600_v54, %v1029_v11  ;;  %v3910_v11 = vld [vmem:[#allocation8 + $0x6c] sm:$0xf]  ;;  %v3961_v54 = vld [vmem:[#allocation8 + $0x1fc] sm:$0xf0]  ;;  %1879 = vmatpush.bf16.msrb.mxu2 %v3466_v50  ;;  %1830 = vmatpush.bf16.msrb.mxu1 %v3654_v57 }
 0x201   : > { %v3958_v8 = vld [vmem:[#allocation8 + $0x1ec] sm:$0xf]  ;;  %6425 = vst [vmem:[#allocation54_spill] sm:$0xff] %v5435_v53  ;;  %v3442_v1 = vor.u32 %v3910_v11, %v3439_v17  ;;  %1928 = vmatpush.bf16.msrb.mxu3 %v3658_v37  ;;  %v3630_v9 = vor.u32 %v3961_v54, %v3629_v63  ;;  %v3607_v11 = vld [vmem:[#allocation8 + $0x1d0] sm:$0xf0]  ;;  %v5461_v58 = vpack.c.bf16 %v5442_v14, %v5435_v53 }
 0x202   : > { %v5432_v13 = vadd.f32 %v1649_v61, %v1601_v45  ;;  %6426 = vst [vmem:[#allocation55_spill] sm:$0xff] %v5438_v34  ;;  %v782_v61 = vmul.f32 %v5358_v36, %v781_v43  ;;  %v1030_v45 = vld [vmem:[#allocation10 + $0xc8] sm:$0xff]  ;;  %v3413_v43 = vld [vmem:[#allocation8 + $0x38] sm:$0xf]  ;;  %v3634_v31 = vor.u32 %v3958_v8, %v3631_v3  ;;  %v5465_v17 = vpack.c.bf16 %v5454_v38, %v5438_v34  ;;  %v3391_v34 = vld [vmem:[#allocation8 + $0x20] sm:$0xf0] }
 0x203   : > { %6427 = vst [vmem:[#allocation56_spill] sm:$0xff] %v5442_v14  ;;  %v6432_v8 = vsub.f32 1.5, %v5411_v39  ;;  %1782 = vmatpush.bf16.msrb.mxu0 %v3438_v25  ;;  %v3414_v39 = vor.u32 %v3907_v55, %v3413_v43  ;;  %v3418_v37 = vor.u32 %v3904_v48, %v3415_v4  ;;  %v3581_v19 = vld [vmem:[#allocation8 + $0x188] sm:$0xf]  ;;  %v1041_v55 = vld [vmem:[#allocation10 + $0x120] sm:$0xff] }
 0x204   : > { %6424 = vst [vmem:[#allocation53_spill] sm:$0xff] %v5432_v13  ;;  %v786_v57 = vsel %vm5449_vm14, %v5358_v36, %v782_v61  ;;  %1880 = vmatpush.bf16.msrb.mxu2 %v3442_v1  ;;  %1831 = vmatpush.bf16.msrb.mxu1 %v3630_v9  ;;  %v3606_v36 = vor.u32 %v3955_v41, %v3605_v40  ;;  %v3914_v14 = vld [vmem:[#allocation8 + $0x84] sm:$0xf0]  ;;  %v3637_v53 = vld [vmem:[#allocation8 + $0x1f0] sm:$0xf]  ;;  %v1092_v13 = vld [vmem:[#allocation10 + $0x2b8] sm:$0xff] }
 0x205   : > { %6430 = vst [vmem:[#allocation57_spill] sm:$0xff] %v5454_v38  ;;  %v772_v63 = vmul.f32 %v5340_v28, %v6432_v8  ;;  %v3901_v8 = vld [vmem:[#allocation8 + $0x1c] sm:$0xf0]  ;;  %1929 = vmatpush.bf16.msrb.mxu3 %v3634_v31  ;;  %v3610_v61 = vor.u32 %v3952_v0, %v3607_v11  ;;  %v3898_v38 = vld [vmem:[#allocation8 + $0xc] sm:$0xf]  ;;  %v817_v1 = vmul.f32 %v786_v57, %v5126_v20 }
 0x206   : > { %v1698_v33 = vpop.f32.mrf.mxu2  ;;  %v1747_v24 = vpop.f32.mrf.mxu3  ;;  %v818_v43 = vmul.f32 %v786_v57, %v5129_v21  ;;  %v3394_v31 = vor.u32 %v3898_v38, %v3391_v34  ;;  %v3582_v48 = vor.u32 %v3949_v44, %v3581_v19  ;;  %v1053_v44 = vld [vmem:[#allocation10 + $0x180] sm:$0xff] }
 0x207   : > { %v1699_v26 = vadd.f32 %v1698_v33, %v1030_v45  ;;  %v5457_v50 = vpop.f32.mrf.mxu0  ;;  %v5473_v54 = vpop.f32.mrf.mxu1  ;;  %v3389_v33 = vld [vmem:[#allocation8 + $0x8] sm:$0xf]  ;;  %v776_v25 = vsel %vm5479_vm0, %v5340_v28, %v772_v63  ;;  %1783 = vmatpush.bf16.msrb.mxu0 %v3414_v39  ;;  %v854_v21 = vmul.f32 %v5007_v49, %v817_v1 }
 0x208   : > { %6431 = vst [vmem:[#allocation58_spill] sm:$0xff] %v5457_v50  ;;  %1881 = vmatpush.bf16.msrb.mxu2 %v3418_v37  ;;  %v3390_v9 = vor.u32 %v3901_v8, %v3389_v33  ;;  %1832 = vmatpush.bf16.msrb.mxu1 %v3606_v36  ;;  %v815_v28 = vmul.f32 %v776_v25, %v5097_v51 }
 0x209   : > { %6433 = vst [vmem:[#allocation59_spill] sm:$0xff] %v5473_v54  ;;  %v5483_v45 = vadd.f32 %v1747_v24, %v1699_v26  ;;  %1619 = vmatmul.bf16.gmra.mxu0 %v5461_v58  ;;  %1668 = vmatmul.bf16.gmra.mxu1 %v5465_v17  ;;  %v3946_v26 = vld [vmem:[#allocation8 + $0x18c] sm:$0xf]  ;;  %v3583_v24 = vld [vmem:[#allocation8 + $0x1a0] sm:$0xf0]  ;;  %v816_v20 = vmul.f32 %v776_v25, %v5100_v52  ;;  %v1079_v54 = vld [vmem:[#allocation10 + $0x250] sm:$0xff] }
 0x20a   : > { %1717 = vmatmul.bf16.gmra.mxu2 %v5461_v58  ;;  %1766 = vmatmul.bf16.gmra.mxu3 %v5465_v17  ;;  %v3586_v4 = vor.u32 %v3946_v26, %v3583_v24  ;;  %v855_v63 = vmul.f32 %v5010_v18, %v818_v43  ;;  %v852_v38 = vmul.f32 %v5007_v49, %v815_v28  ;;  %v1042_v52 = vld [vmem:[#allocation10 + $0x128] sm:$0xff] }
 0x20b   : > { %6436 = vst [vmem:[#allocation60_spill] sm:$0xff] %v5483_v45  ;;  %1930 = vmatpush.bf16.msrb.mxu3 %v3610_v61  ;;  %1784 = vmatpush.bf16.msrb.mxu0 %v3390_v9  ;;  %v853_v51 = vmul.f32 %v5010_v18, %v816_v20  ;;  %v5507_v3 = vadd.f32 %v5018_v47, %v854_v21  ;;  %v1054_v9 = vld [vmem:[#allocation10 + $0x188] sm:$0xff]  ;;  %v1060_v20 = vld [vmem:[#allocation10 + $0x1b8] sm:$0xff]  ;;  %v3565_v21 = vld [vmem:[#allocation8 + $0x160] sm:$0xf] }
 0x20c   : > { %1882 = vmatpush.bf16.msrb.mxu2 %v3394_v31  ;;  %1833 = vmatpush.bf16.msrb.mxu1 %v3582_v48  ;;  %v5510_v39 = vadd.f32 %v5020_v22, %v855_v63  ;;  %v5513_v33 = vadd.f32 %v5018_v47, %v852_v38  ;;  %v3944_v63 = vld [vmem:[#allocation8 + $0x174] sm:$0xf0]  ;;  %v1085_v45 = vld [vmem:[#allocation10 + $0x280] sm:$0xff] }
 0x20d   : > { %6440 = vst [vmem:[#allocation64_spill] sm:$0xff] %v5507_v3  ;;  %v5516_v8 = vadd.f32 %v5020_v22, %v853_v51  ;;  %v3566_v51 = vor.u32 %v3944_v63, %v3565_v21  ;;  %v3733_v21 = vld [vmem:[#allocation8 + $0x2b0] sm:$0xf]  ;;  %v3986_v63 = vld [vmem:[#allocation8 + $0x2c4] sm:$0xf0] }
 0x20e   : > { %v5494_v40 = vpop.f32.mrf.mxu2  ;;  %v5498_v41 = vpop.f32.mrf.mxu3  ;;  %6441 = vst [vmem:[#allocation65_spill] sm:$0xff] %v5510_v39  ;;  %v5520_v49 = vpack.c.bf16 %v5507_v3, %v5513_v33  ;;  %v3929_v3 = vld [vmem:[#allocation8 + $0x104] sm:$0xf] }
 0x20f   : > { %6437 = vst [vmem:[#allocation61_spill] sm:$0xff] %v5494_v40  ;;  %v1605_v0 = vpop.f32.mrf.mxu0  ;;  %v1654_v57 = vpop.f32.mrf.mxu1  ;;  %1931 = vmatpush.bf16.msrb.mxu3 %v3586_v4  ;;  %v5524_v18 = vpack.c.bf16 %v5510_v39, %v5516_v8  ;;  %1973 = vmatpush.bf16.msra.mxu0 %v3566_v51  ;;  %v3735_v39 = vld [vmem:[#allocation8 + $0x2c8] sm:$0xf0] }
 0x210   : > { %6438 = vst [vmem:[#allocation62_spill] sm:$0xff] %v5498_v41  ;;  %v1606_v11 = vadd.f32 %v1605_v0, %v1041_v55 }
 0x211   : > { %6442 = vst [vmem:[#allocation66_spill] sm:$0xff] %v5513_v33  ;;  %v3711_v33 = vld [vmem:[#allocation8 + $0x298] sm:$0xf0] }
 0x212   : > { %v5502_v34 = vadd.f32 %v1654_v57, %v1606_v11  ;;  %6443 = vst [vmem:[#allocation67_spill] sm:$0xff] %v5516_v8  ;;  %v3757_v57 = vld [vmem:[#allocation8 + $0x2e0] sm:$0xf]  ;;  %v3977_v8 = vld [vmem:[#allocation8 + $0x284] sm:$0xf] }
 0x214   : > { %6439 = vst [vmem:[#allocation63_spill] sm:$0xff] %v5502_v34 }
 0x216   : > { %v1703_v37 = vpop.f32.mrf.mxu2  ;;  %v1752_v61 = vpop.f32.mrf.mxu3 }
 0x217   : > { %v1704_v36 = vadd.f32 %v1703_v37, %v1042_v52  ;;  %v5544_v47 = vpop.f32.mrf.mxu0  ;;  %v5546_v22 = vpop.f32.mrf.mxu1  ;;  %v3992_v52 = vld [vmem:[#allocation8 + $0x2f4] sm:$0xf0]  ;;  %v3941_v37 = vld [vmem:[#allocation8 + $0x164] sm:$0xf] }
 0x218   : > { %6445 = vst [vmem:[#allocation69_spill] sm:$0xff] %v5544_v47 }
 0x219   : > { %v5526_v19 = vadd.f32 %v1752_v61, %v1704_v36  ;;  %1624 = vmatmul.bf16.gmra.mxu0 %v5520_v49  ;;  %1673 = vmatmul.bf16.gmra.mxu1 %v5524_v18  ;;  %6446 = vst [vmem:[#allocation70_spill] sm:$0xff] %v5546_v22  ;;  %v3567_v36 = vld [vmem:[#allocation8 + $0x178] sm:$0xf0] }
 0x21a   : > { %1722 = vmatmul.bf16.gmra.mxu2 %v5520_v49  ;;  %1771 = vmatmul.bf16.gmra.mxu3 %v5524_v18 }
 0x21b   : > { %6444 = vst [vmem:[#allocation68_spill] sm:$0xff] %v5526_v19  ;;  %v1091_v19 = vld [vmem:[#allocation10 + $0x2b0] sm:$0xff] }
 0x21e   : > { %v5548_v26 = vpop.f32.mrf.mxu2  ;;  %v5550_v24 = vpop.f32.mrf.mxu3 }
 0x21f   : > { %6447 = vst [vmem:[#allocation71_spill] sm:$0xff] %v5548_v26 }
 0x220   : > { %6448 = vst [vmem:[#allocation72_spill] sm:$0xff] %v5550_v24 }
 0x229   : > { %1785 = vmatmul.bf16.vlgmr.msrb.gmra.mxu0 %v5060_v35  ;;  %1834 = vmatmul.bf16.vlgmr.msrb.gmra.mxu1 %v5064_v15 }
 0x22a   : > { %1883 = vmatmul.bf16.vlgmr.msrb.gmra.mxu2 %v5060_v35  ;;  %1932 = vmatmul.bf16.vlgmr.msrb.gmra.mxu3 %v5064_v15 }
 0x239   : > { %1790 = vmatmul.bf16.gmra.mxu0 %v5164_v23  ;;  %1839 = vmatmul.bf16.gmra.mxu1 %v5168_v5 }
 0x23a   : > { %1888 = vmatmul.bf16.gmra.mxu2 %v5164_v23  ;;  %1937 = vmatmul.bf16.gmra.mxu3 %v5168_v5 }
 0x249   : > { %1795 = vmatmul.bf16.gmra.mxu0 %v5199_v27  ;;  %1844 = vmatmul.bf16.gmra.mxu1 %v5203_v30 }
 0x24a   : > { %1893 = vmatmul.bf16.gmra.mxu2 %v5199_v27  ;;  %1942 = vmatmul.bf16.gmra.mxu3 %v5203_v30 }
 0x259   : > { %1800 = vmatmul.bf16.gmra.mxu0 %v5231_v32  ;;  %1849 = vmatmul.bf16.gmra.mxu1 %v5235_v10 }
 0x25a   : > { %1898 = vmatmul.bf16.gmra.mxu2 %v5231_v32  ;;  %1947 = vmatmul.bf16.gmra.mxu3 %v5235_v10 }
 0x25b   : > { %v1610_v25 = vpop.f32.mrf.mxu0  ;;  %v1659_v43 = vpop.f32.mrf.mxu1 }
 0x25c   : > { %v1611_v1 = vadd.f32 %v1610_v25, %v1053_v44  ;;  %v3758_v44 = vor.u32 %v3992_v52, %v3757_v57  ;;  %v3570_v25 = vor.u32 %v3941_v37, %v3567_v36  ;;  %v3935_v57 = vld [vmem:[#allocation8 + $0x134] sm:$0xf]  ;;  %v3734_v52 = vor.u32 %v3986_v63, %v3733_v21  ;;  %v1065_v21 = vld [vmem:[#allocation10 + $0x1e0] sm:$0xff] }
 0x25d   : > { %v3983_v36 = vld [vmem:[#allocation8 + $0x2b4] sm:$0xf]  ;;  %v3714_v63 = vor.u32 %v3977_v8, %v3711_v33  ;;  %v3469_v8 = vld [vmem:[#allocation8 + $0xa0] sm:$0xf] }
 0x25e   : > { %v5556_v55 = vadd.f32 %v1659_v43, %v1611_v1  ;;  %v3989_v1 = vld [vmem:[#allocation8 + $0x2e4] sm:$0xf]  ;;  %v3759_v43 = vld [vmem:[#allocation8 + $0x2f8] sm:$0xf0]  ;;  %2022 = vmatpush.bf16.msra.mxu1 %v3758_v44  ;;  %2071 = vmatpush.bf16.msra.mxu2 %v3570_v25  ;;  %v3738_v51 = vor.u32 %v3983_v36, %v3735_v39  ;;  %v3709_v44 = vld [vmem:[#allocation8 + $0x280] sm:$0xf] }
 0x25f   : > { %v3493_v39 = vld [vmem:[#allocation8 + $0xd0] sm:$0xf]  ;;  %v3974_v36 = vld [vmem:[#allocation8 + $0x264] sm:$0xf0] }
 0x260   : > { %6449 = vst [vmem:[#allocation73_spill] sm:$0xff] %v5556_v55  ;;  %v3962_v55 = vld [vmem:[#allocation8 + $0x204] sm:$0xf0] }
 0x262   : > { %v1708_v31 = vpop.f32.mrf.mxu2  ;;  %v1757_v48 = vpop.f32.mrf.mxu3  ;;  %2023 = vmatpush.bf16.msra.mxu1 %v3734_v52 }
 0x263   : > { %v1709_v4 = vadd.f32 %v1708_v31, %v1054_v9  ;;  %v5566_v9 = vpop.f32.mrf.mxu0  ;;  %v5568_v31 = vpop.f32.mrf.mxu1 }
 0x264   : > { %6452 = vst [vmem:[#allocation76_spill] sm:$0xff] %v5566_v9  ;;  %v3905_v9 = vld [vmem:[#allocation8 + $0x44] sm:$0xf] }
 0x265   : > { %v5558_v28 = vadd.f32 %v1757_v48, %v1709_v4  ;;  %6453 = vst [vmem:[#allocation77_spill] sm:$0xff] %v5568_v31  ;;  %v3762_v48 = vor.u32 %v3989_v1, %v3759_v43  ;;  %v3517_v1 = vld [vmem:[#allocation8 + $0x100] sm:$0xf]  ;;  %v3932_v43 = vld [vmem:[#allocation8 + $0x114] sm:$0xf0] }
 0x266   : > { %v3518_v25 = vor.u32 %v3932_v43, %v3517_v1  ;;  %v3980_v4 = vld [vmem:[#allocation8 + $0x294] sm:$0xf0]  ;;  %v3495_v1 = vld [vmem:[#allocation8 + $0xe8] sm:$0xf0] }
 0x267   : > { %6450 = vst [vmem:[#allocation74_spill] sm:$0xff] %v5558_v28  ;;  %2120 = vmatpush.bf16.msra.mxu3 %v3762_v48  ;;  %v3519_v48 = vld [vmem:[#allocation8 + $0x118] sm:$0xf0]  ;;  %v3956_v31 = vld [vmem:[#allocation8 + $0x1d4] sm:$0xf0] }
 0x269   : > { %1805 = vmatmul.bf16.gmra.mxu0 %v5274_v7  ;;  %1854 = vmatmul.bf16.gmra.mxu1 %v5278_v29 }
 0x26a   : > { %v1710_v0 = vpop.f32.mrf.mxu2  ;;  %1903 = vmatmul.bf16.gmra.mxu2 %v5274_v7  ;;  %1952 = vmatmul.bf16.gmra.mxu3 %v5278_v29  ;;  %v1759_v38 = vpop.f32.mrf.mxu3 }
 0x26b   : > { %v1711_v11 = vadd.f32 %v1710_v0, %v1060_v20  ;;  %v3541_v20 = vld [vmem:[#allocation8 + $0x130] sm:$0xf]  ;;  %v3938_v0 = vld [vmem:[#allocation8 + $0x144] sm:$0xf0]  ;;  %2121 = vmatpush.bf16.msra.mxu3 %v3738_v51  ;;  %v3923_v51 = vld [vmem:[#allocation8 + $0xd4] sm:$0xf] }
 0x26d   : > { %v5564_v61 = vadd.f32 %v1759_v38, %v1711_v11  ;;  %v3542_v11 = vor.u32 %v3938_v0, %v3541_v20  ;;  %v3543_v38 = vld [vmem:[#allocation8 + $0x148] sm:$0xf0]  ;;  %v3710_v20 = vor.u32 %v3980_v4, %v3709_v44  ;;  %v3522_v0 = vor.u32 %v3929_v3, %v3519_v48  ;;  %v3971_v44 = vld [vmem:[#allocation8 + $0x254] sm:$0xf] }
 0x26e   : > { %v3546_v37 = vor.u32 %v3935_v57, %v3543_v38  ;;  %v3685_v57 = vld [vmem:[#allocation8 + $0x250] sm:$0xf]  ;;  %v3498_v3 = vor.u32 %v3923_v51, %v3495_v1  ;;  %v3687_v48 = vld [vmem:[#allocation8 + $0x268] sm:$0xf0] }
 0x26f   : > { %6451 = vst [vmem:[#allocation75_spill] sm:$0xff] %v5564_v61  ;;  %1974 = vmatpush.bf16.msra.mxu0 %v3542_v11  ;;  %2024 = vmatpush.bf16.msra.mxu1 %v3710_v20  ;;  %v3926_v11 = vld [vmem:[#allocation8 + $0xe4] sm:$0xf0]  ;;  %v3686_v4 = vor.u32 %v3974_v36, %v3685_v57  ;;  %v3920_v20 = vld [vmem:[#allocation8 + $0xb4] sm:$0xf0]  ;;  %v1071_v51 = vld [vmem:[#allocation10 + $0x210] sm:$0xff] }
 0x270   : > { %2072 = vmatpush.bf16.msra.mxu2 %v3546_v37  ;;  %2122 = vmatpush.bf16.msra.mxu3 %v3714_v63  ;;  %v3494_v37 = vor.u32 %v3926_v11, %v3493_v39  ;;  %v3968_v63 = vld [vmem:[#allocation8 + $0x234] sm:$0xf0]  ;;  %v3917_v39 = vld [vmem:[#allocation8 + $0xa4] sm:$0xf]  ;;  %v3471_v11 = vld [vmem:[#allocation8 + $0xb8] sm:$0xf0] }
 0x271   : > { %v1066_v57 = vld [vmem:[#allocation10 + $0x1e8] sm:$0xff]  ;;  %v3663_v36 = vld [vmem:[#allocation8 + $0x238] sm:$0xf0] }
 0x273   : > { %1975 = vmatpush.bf16.msra.mxu0 %v3518_v25  ;;  %v3690_v25 = vor.u32 %v3971_v44, %v3687_v48  ;;  %2025 = vmatpush.bf16.msra.mxu1 %v3686_v4  ;;  %v3445_v48 = vld [vmem:[#allocation8 + $0x70] sm:$0xf]  ;;  %v3911_v4 = vld [vmem:[#allocation8 + $0x74] sm:$0xf] }
 0x274   : > { %2073 = vmatpush.bf16.msra.mxu2 %v3522_v0  ;;  %v3661_v0 = vld [vmem:[#allocation8 + $0x220] sm:$0xf]  ;;  %v3446_v61 = vor.u32 %v3914_v14, %v3445_v48 }
 0x275   : > { %2123 = vmatpush.bf16.msra.mxu3 %v3690_v25  ;;  %v3959_v25 = vld [vmem:[#allocation8 + $0x1f4] sm:$0xf]  ;;  %v3613_v14 = vld [vmem:[#allocation8 + $0x1c0] sm:$0xf] }
 0x276   : > { %v1615_v38 = vpop.f32.mrf.mxu0  ;;  %v1664_v52 = vpop.f32.mrf.mxu1 }
 0x277   : > { %v1616_v43 = vadd.f32 %v1615_v38, %v1065_v21  ;;  %1976 = vmatpush.bf16.msra.mxu0 %v3494_v37  ;;  %v3470_v21 = vor.u32 %v3920_v20, %v3469_v8  ;;  %v3662_v38 = vor.u32 %v3968_v63, %v3661_v0  ;;  %v3965_v37 = vld [vmem:[#allocation8 + $0x224] sm:$0xf]  ;;  %v3638_v63 = vor.u32 %v3962_v55, %v3637_v53  ;;  %v1072_v55 = vld [vmem:[#allocation10 + $0x218] sm:$0xff]  ;;  %v3950_v53 = vld [vmem:[#allocation8 + $0x1a4] sm:$0xf0] }
 0x278   : > { %2074 = vmatpush.bf16.msra.mxu2 %v3498_v3  ;;  %v3666_v1 = vor.u32 %v3965_v37, %v3663_v36  ;;  %v3447_v3 = vld [vmem:[#allocation8 + $0x88] sm:$0xf0] }
 0x279   : > { %v5572_v33 = vadd.f32 %v1664_v52, %v1616_v43  ;;  %1810 = vmatmul.bf16.gmra.mxu0 %v5399_v62  ;;  %1859 = vmatmul.bf16.gmra.mxu1 %v5403_v2  ;;  %v3474_v52 = vor.u32 %v3917_v39, %v3471_v11  ;;  %v3450_v39 = vor.u32 %v3911_v4, %v3447_v3  ;;  %v3397_v4 = vld [vmem:[#allocation8 + $0x10] sm:$0xf]  ;;  %v3902_v3 = vld [vmem:[#allocation8 + $0x24] sm:$0xf0] }
 0x27a   : > { %1908 = vmatmul.bf16.gmra.mxu2 %v5399_v62  ;;  %1957 = vmatmul.bf16.gmra.mxu3 %v5403_v2 }
 0x27b   : > { %6454 = vst [vmem:[#allocation78_spill] sm:$0xff] %v5572_v33  ;;  %1977 = vmatpush.bf16.msra.mxu0 %v3470_v21  ;;  %2026 = vmatpush.bf16.msra.mxu1 %v3662_v38  ;;  %v3639_v21 = vld [vmem:[#allocation8 + $0x208] sm:$0xf0]  ;;  %v3614_v38 = vor.u32 %v3956_v31, %v3613_v14 }
 0x27c   : > { %2075 = vmatpush.bf16.msra.mxu2 %v3474_v52  ;;  %2124 = vmatpush.bf16.msra.mxu3 %v3666_v1  ;;  %v3642_v37 = vor.u32 %v3959_v25, %v3639_v21  ;;  %v3953_v1 = vld [vmem:[#allocation8 + $0x1c4] sm:$0xf] }
 0x27d   : > { %v1713_v43 = vpop.f32.mrf.mxu2  ;;  %v1762_v44 = vpop.f32.mrf.mxu3 }
 0x27e   : > { %v1714_v8 = vadd.f32 %v1713_v43, %v1066_v57  ;;  %v1617_v20 = vpop.f32.mrf.mxu0  ;;  %v1666_v28 = vpop.f32.mrf.mxu1  ;;  %v3421_v57 = vld [vmem:[#allocation8 + $0x40] sm:$0xf]  ;;  %v3908_v43 = vld [vmem:[#allocation8 + $0x54] sm:$0xf0] }
 0x27f   : > { %v1618_v0 = vadd.f32 %v1617_v20, %v1071_v51  ;;  %1978 = vmatpush.bf16.msra.mxu0 %v3446_v61  ;;  %v3422_v48 = vor.u32 %v3908_v43, %v3421_v57  ;;  %v3423_v51 = vld [vmem:[#allocation8 + $0x58] sm:$0xf0]  ;;  %2027 = vmatpush.bf16.msra.mxu1 %v3638_v63  ;;  %v3398_v43 = vor.u32 %v3902_v3, %v3397_v4  ;;  %v3899_v63 = vld [vmem:[#allocation8 + $0x14] sm:$0xf] }
 0x280   : > { %v5578_v11 = vadd.f32 %v1762_v44, %v1714_v8  ;;  %2076 = vmatpush.bf16.msra.mxu2 %v3450_v39  ;;  %v3426_v52 = vor.u32 %v3905_v9, %v3423_v51  ;;  %v3615_v61 = vld [vmem:[#allocation8 + $0x1d8] sm:$0xf0]  ;;  %v1077_v44 = vld [vmem:[#allocation10 + $0x240] sm:$0xff]  ;;  %2125 = vmatpush.bf16.msra.mxu3 %v3642_v37  ;;  %v3399_v39 = vld [vmem:[#allocation8 + $0x28] sm:$0xf0] }
 0x281   : > { %v5580_v36 = vadd.f32 %v1666_v28, %v1618_v0  ;;  %v3618_v28 = vor.u32 %v3953_v1, %v3615_v61  ;;  %v3589_v0 = vld [vmem:[#allocation8 + $0x190] sm:$0xf]  ;;  %v3402_v14 = vor.u32 %v3899_v63, %v3399_v39  ;;  %v3947_v37 = vld [vmem:[#allocation8 + $0x194] sm:$0xf] }
 0x282   : > { %6455 = vst [vmem:[#allocation79_spill] sm:$0xff] %v5578_v11  ;;  %v3590_v9 = vor.u32 %v3950_v53, %v3589_v0  ;;  %v1078_v53 = vld [vmem:[#allocation10 + $0x248] sm:$0xff] }
 0x283   : > { %6456 = vst [vmem:[#allocation80_spill] sm:$0xff] %v5580_v36  ;;  %1979 = vmatpush.bf16.msra.mxu0 %v3422_v48  ;;  %2028 = vmatpush.bf16.msra.mxu1 %v3614_v38  ;;  %v3591_v48 = vld [vmem:[#allocation8 + $0x1a8] sm:$0xf0]  ;;  %v1083_v38 = vld [vmem:[#allocation10 + $0x270] sm:$0xff] }
 0x284   : > { %2077 = vmatpush.bf16.msra.mxu2 %v3426_v52  ;;  %2126 = vmatpush.bf16.msra.mxu3 %v3618_v28  ;;  %v3594_v1 = vor.u32 %v3947_v37, %v3591_v48 }
 0x285   : > { %v1715_v8 = vpop.f32.mrf.mxu2  ;;  %v1764_v20 = vpop.f32.mrf.mxu3 }
 0x286   : > { %v1716_v25 = vadd.f32 %v1715_v8, %v1072_v55  ;;  %v1620_v21 = vpop.f32.mrf.mxu0  ;;  %v1669_v57 = vpop.f32.mrf.mxu1 }
 0x287   : > { %v1621_v31 = vadd.f32 %v1620_v21, %v1077_v44  ;;  %1980 = vmatpush.bf16.msra.mxu0 %v3398_v43  ;;  %2029 = vmatpush.bf16.msra.mxu1 %v3590_v9  ;;  %v1084_v21 = vld [vmem:[#allocation10 + $0x278] sm:$0xff] }
 0x288   : > { %v5584_v51 = vadd.f32 %v1764_v20, %v1716_v25  ;;  %2078 = vmatpush.bf16.msra.mxu2 %v3402_v14  ;;  %2127 = vmatpush.bf16.msra.mxu3 %v3594_v1 }
 0x289   : > { %v5586_v61 = vadd.f32 %v1669_v57, %v1621_v31  ;;  %1815 = vmatmul.bf16.gmra.mxu0 %v5461_v58  ;;  %1864 = vmatmul.bf16.gmra.mxu1 %v5465_v17  ;;  %v1089_v57 = vld [vmem:[#allocation10 + $0x2a0] sm:$0xff] }
 0x28a   : > { %6457 = vst [vmem:[#allocation81_spill] sm:$0xff] %v5584_v51  ;;  %1913 = vmatmul.bf16.gmra.mxu2 %v5461_v58  ;;  %1962 = vmatmul.bf16.gmra.mxu3 %v5465_v17 }
 0x28b   : > { %6458 = vst [vmem:[#allocation82_spill] sm:$0xff] %v5586_v61 }
 0x28d   : > { %v1718_v52 = vpop.f32.mrf.mxu2  ;;  %v1767_v44 = vpop.f32.mrf.mxu3 }
 0x28e   : > { %v1719_v28 = vadd.f32 %v1718_v52, %v1078_v53  ;;  %v1622_v8 = vpop.f32.mrf.mxu0  ;;  %v1671_v20 = vpop.f32.mrf.mxu1  ;;  %v1090_v53 = vld [vmem:[#allocation10 + $0x2a8] sm:$0xff] }
 0x28f   : > { %v1623_v4 = vadd.f32 %v1622_v8, %v1083_v38  ;;  %v1095_v38 = vld [vmem:[#allocation10 + $0x2d0] sm:$0xff] }
 0x290   : > { %v5594_v3 = vadd.f32 %v1767_v44, %v1719_v28 }
 0x291   : > { %v5596_v0 = vadd.f32 %v1671_v20, %v1623_v4 }
 0x292   : > { %6459 = vst [vmem:[#allocation83_spill] sm:$0xff] %v5594_v3 }
 0x293   : > { %6460 = vst [vmem:[#allocation84_spill] sm:$0xff] %v5596_v0 }
 0x295   : > { %v1720_v43 = vpop.f32.mrf.mxu2  ;;  %v1769_v63 = vpop.f32.mrf.mxu3 }
 0x296   : > { %v1721_v39 = vadd.f32 %v1720_v43, %v1084_v21  ;;  %v1625_v31 = vpop.f32.mrf.mxu0  ;;  %v1674_v9 = vpop.f32.mrf.mxu1 }
 0x297   : > { %v1626_v14 = vadd.f32 %v1625_v31, %v1089_v57 }
 0x298   : > { %v5600_v37 = vadd.f32 %v1769_v63, %v1721_v39  ;;  %v1096_v63 = vld [vmem:[#allocation10 + $0x2d8] sm:$0xff]  ;;  %v1007_v39 = vld [vmem:[#allocation10 + $0x10] sm:$0xff] }
 0x299   : > { %v5602_v48 = vadd.f32 %v1674_v9, %v1626_v14  ;;  %1820 = vmatmul.bf16.gmra.mxu0 %v5520_v49  ;;  %1869 = vmatmul.bf16.gmra.mxu1 %v5524_v18 }
 0x29a   : > { %6461 = vst [vmem:[#allocation85_spill] sm:$0xff] %v5600_v37  ;;  %1918 = vmatmul.bf16.gmra.mxu2 %v5520_v49  ;;  %1967 = vmatmul.bf16.gmra.mxu3 %v5524_v18 }
 0x29b   : > { %6462 = vst [vmem:[#allocation86_spill] sm:$0xff] %v5602_v48 }
 0x29d   : > { %v1723_v52 = vpop.f32.mrf.mxu2  ;;  %v1772_v44 = vpop.f32.mrf.mxu3 }
 0x29e   : > { %v1724_v28 = vadd.f32 %v1723_v52, %v1090_v53  ;;  %v1627_v8 = vpop.f32.mrf.mxu0  ;;  %v1676_v20 = vpop.f32.mrf.mxu1  ;;  %v1008_v52 = vld [vmem:[#allocation10 + $0x18] sm:$0xff] }
 0x29f   : > { %v1628_v4 = vadd.f32 %v1627_v8, %v1095_v38 }
 0x2a0   : > { %v5610_v21 = vadd.f32 %v1772_v44, %v1724_v28  ;;  %v1013_v44 = vld [vmem:[#allocation10 + $0x40] sm:$0xff] }
 0x2a1   : > { %v5612_v57 = vadd.f32 %v1676_v20, %v1628_v4 }
 0x2a2   : > { %6463 = vst [vmem:[#allocation87_spill] sm:$0xff] %v5610_v21 }
 0x2a3   : > { %6464 = vst [vmem:[#allocation88_spill] sm:$0xff] %v5612_v57 }
 0x2a5   : > { %v1725_v31 = vpop.f32.mrf.mxu2  ;;  %v1774_v9 = vpop.f32.mrf.mxu3 }
 0x2a6   : > { %v1726_v14 = vadd.f32 %v1725_v31, %v1096_v63  ;;  %v1786_v1 = vpop.f32.mrf.mxu0  ;;  %v1835_v25 = vpop.f32.mrf.mxu1  ;;  %v1014_v31 = vld [vmem:[#allocation10 + $0x48] sm:$0xff] }
 0x2a7   : > { %v1787_v55 = vadd.f32 %v1786_v1, %v1007_v39 }
 0x2a8   : > { %v5616_v3 = vadd.f32 %v1774_v9, %v1726_v14  ;;  %v1019_v9 = vld [vmem:[#allocation10 + $0x70] sm:$0xff] }
 0x2a9   : > { %v5618_v53 = vadd.f32 %v1835_v25, %v1787_v55  ;;  %1981 = vmatmul.bf16.vlgmr.msra.gmra.mxu0 %v5060_v35  ;;  %2030 = vmatmul.bf16.vlgmr.msra.gmra.mxu1 %v5064_v15 }
 0x2aa   : > { %6465 = vst [vmem:[#allocation89_spill] sm:$0xff] %v5616_v3  ;;  %2079 = vmatmul.bf16.vlgmr.msra.gmra.mxu2 %v5060_v35  ;;  %2128 = vmatmul.bf16.vlgmr.msra.gmra.mxu3 %v5064_v15 }
 0x2ad   : > { %v1884_v28 = vpop.f32.mrf.mxu2  ;;  %v1933_v8 = vpop.f32.mrf.mxu3 }
 0x2ae   : > { %v1885_v1 = vadd.f32 %v1884_v28, %v1008_v52  ;;  %v1788_v20 = vpop.f32.mrf.mxu0  ;;  %v1837_v4 = vpop.f32.mrf.mxu1  ;;  %v1020_v28 = vld [vmem:[#allocation10 + $0x78] sm:$0xff] }
 0x2af   : > { %v1789_v55 = vadd.f32 %v1788_v20, %v1013_v44 }
 0x2b0   : > { %v5626_v25 = vadd.f32 %v1933_v8, %v1885_v1  ;;  %v1025_v8 = vld [vmem:[#allocation10 + $0xa0] sm:$0xff] }
 0x2b1   : > { %v5628_v63 = vadd.f32 %v1837_v4, %v1789_v55 }
 0x2b2   : > { %6466 = vst [vmem:[#allocation90_spill] sm:$0xff] %v5626_v25 }
 0x2b5   : > { %v1886_v35 = vpop.f32.mrf.mxu2  ;;  %v1935_v14 = vpop.f32.mrf.mxu3 }
 0x2b6   : > { %v1887_v15 = vadd.f32 %v1886_v35, %v1014_v31  ;;  %v1791_v38 = vpop.f32.mrf.mxu0  ;;  %v1840_v43 = vpop.f32.mrf.mxu1  ;;  %v1026_v35 = vld [vmem:[#allocation10 + $0xa8] sm:$0xff] }
 0x2b7   : > { %v1792_v21 = vadd.f32 %v1791_v38, %v1019_v9 }
 0x2b8   : > { %v5632_v3 = vadd.f32 %v1935_v14, %v1887_v15  ;;  %v1031_v14 = vld [vmem:[#allocation10 + $0xd0] sm:$0xff] }
 0x2b9   : > { %v5634_v52 = vadd.f32 %v1840_v43, %v1792_v21  ;;  %1986 = vmatmul.bf16.gmra.mxu0 %v5164_v23  ;;  %2035 = vmatmul.bf16.gmra.mxu1 %v5168_v5 }
 0x2ba   : > { %6467 = vst [vmem:[#allocation91_spill] sm:$0xff] %v5632_v3  ;;  %2084 = vmatmul.bf16.gmra.mxu2 %v5164_v23  ;;  %2133 = vmatmul.bf16.gmra.mxu3 %v5168_v5 }
 0x2bd   : > { %v1889_v1 = vpop.f32.mrf.mxu2  ;;  %v1938_v20 = vpop.f32.mrf.mxu3 }
 0x2be   : > { %v1890_v38 = vadd.f32 %v1889_v1, %v1020_v28  ;;  %v1793_v4 = vpop.f32.mrf.mxu0  ;;  %v1842_v55 = vpop.f32.mrf.mxu1  ;;  %v1032_v1 = vld [vmem:[#allocation10 + $0xd8] sm:$0xff] }
 0x2bf   : > { %v1794_v21 = vadd.f32 %v1793_v4, %v1025_v8 }
 0x2c0   : > { %v5642_v43 = vadd.f32 %v1938_v20, %v1890_v38  ;;  %v1037_v20 = vld [vmem:[#allocation10 + $0x100] sm:$0xff] }
 0x2c1   : > { %v5644_v31 = vadd.f32 %v1842_v55, %v1794_v21 }
 0x2c5   : > { %v1891_v23 = vpop.f32.mrf.mxu2  ;;  %v1940_v15 = vpop.f32.mrf.mxu3 }
 0x2c6   : > { %v1892_v5 = vadd.f32 %v1891_v23, %v1026_v35  ;;  %v1796_v44 = vpop.f32.mrf.mxu0  ;;  %v1845_v39 = vpop.f32.mrf.mxu1  ;;  %v1038_v23 = vld [vmem:[#allocation10 + $0x108] sm:$0xff] }
 0x2c7   : > { %v1797_v48 = vadd.f32 %v1796_v44, %v1031_v14 }
 0x2c8   : > { %v5648_v57 = vadd.f32 %v1940_v15, %v1892_v5  ;;  %v1043_v15 = vld [vmem:[#allocation10 + $0x130] sm:$0xff] }
 0x2c9   : > { %v5650_v28 = vadd.f32 %v1845_v39, %v1797_v48  ;;  %1991 = vmatmul.bf16.gmra.mxu0 %v5199_v27  ;;  %2040 = vmatmul.bf16.gmra.mxu1 %v5203_v30 }
 0x2ca   : > { %2089 = vmatmul.bf16.gmra.mxu2 %v5199_v27  ;;  %2138 = vmatmul.bf16.gmra.mxu3 %v5203_v30 }
 0x2cd   : > { %v1894_v38 = vpop.f32.mrf.mxu2  ;;  %v1943_v4 = vpop.f32.mrf.mxu3 }
 0x2ce   : > { %v1895_v44 = vadd.f32 %v1894_v38, %v1032_v1  ;;  %v1798_v55 = vpop.f32.mrf.mxu0  ;;  %v1847_v21 = vpop.f32.mrf.mxu1  ;;  %v1044_v38 = vld [vmem:[#allocation10 + $0x138] sm:$0xff] }
 0x2cf   : > { %v1799_v48 = vadd.f32 %v1798_v55, %v1037_v20 }
 0x2d0   : > { %v5658_v39 = vadd.f32 %v1943_v4, %v1895_v44  ;;  %v1049_v4 = vld [vmem:[#allocation10 + $0x160] sm:$0xff] }
 0x2d1   : > { %v5660_v35 = vadd.f32 %v1847_v21, %v1799_v48 }
 0x2d5   : > { %v1896_v27 = vpop.f32.mrf.mxu2  ;;  %v1945_v5 = vpop.f32.mrf.mxu3 }
 0x2d6   : > { %v1897_v30 = vadd.f32 %v1896_v27, %v1038_v23  ;;  %v1801_v8 = vpop.f32.mrf.mxu0  ;;  %v1850_v9 = vpop.f32.mrf.mxu1  ;;  %v1050_v27 = vld [vmem:[#allocation10 + $0x168] sm:$0xff] }
 0x2d7   : > { %v1802_v37 = vadd.f32 %v1801_v8, %v1043_v15 }
 0x2d8   : > { %v5664_v61 = vadd.f32 %v1945_v5, %v1897_v30  ;;  %v1055_v5 = vld [vmem:[#allocation10 + $0x190] sm:$0xff] }
 0x2d9   : > { %v5666_v1 = vadd.f32 %v1850_v9, %v1802_v37  ;;  %1996 = vmatmul.bf16.gmra.mxu0 %v5231_v32  ;;  %2045 = vmatmul.bf16.gmra.mxu1 %v5235_v10 }
 0x2da   : > { %2094 = vmatmul.bf16.gmra.mxu2 %v5231_v32  ;;  %2143 = vmatmul.bf16.gmra.mxu3 %v5235_v10 }
 0x2dd   : > { %v1899_v44 = vpop.f32.mrf.mxu2  ;;  %v1948_v55 = vpop.f32.mrf.mxu3 }
 0x2de   : > { %v1900_v8 = vadd.f32 %v1899_v44, %v1044_v38  ;;  %v1803_v21 = vpop.f32.mrf.mxu0  ;;  %v1852_v48 = vpop.f32.mrf.mxu1  ;;  %v1056_v44 = vld [vmem:[#allocation10 + $0x198] sm:$0xff] }
 0x2df   : > { %v1804_v37 = vadd.f32 %v1803_v21, %v1049_v4 }
 0x2e0   : > { %v5674_v9 = vadd.f32 %v1948_v55, %v1900_v8 }
 0x2e1   : > { %v5676_v23 = vadd.f32 %v1852_v48, %v1804_v37 }
 0x2e5   : > { %v1901_v32 = vpop.f32.mrf.mxu2  ;;  %v1950_v30 = vpop.f32.mrf.mxu3 }
 0x2e6   : > { %v1902_v10 = vadd.f32 %v1901_v32, %v1050_v27  ;;  %v1806_v20 = vpop.f32.mrf.mxu0  ;;  %v1855_v14 = vpop.f32.mrf.mxu1 }
 0x2e7   : > { %v1807_v0 = vadd.f32 %v1806_v20, %v1055_v5 }
 0x2e8   : > { %v5680_v11 = vadd.f32 %v1950_v30, %v1902_v10 }
 0x2e9   : > { %v5682_v38 = vadd.f32 %v1855_v14, %v1807_v0  ;;  %2001 = vmatmul.bf16.gmra.mxu0 %v5274_v7  ;;  %2050 = vmatmul.bf16.gmra.mxu1 %v5278_v29 }
 0x2ea   : > { %2099 = vmatmul.bf16.gmra.mxu2 %v5274_v7  ;;  %2148 = vmatmul.bf16.gmra.mxu3 %v5278_v29 }
 0x2ed   : > { %v1904_v55 = vpop.f32.mrf.mxu2  ;;  %v1953_v8 = vpop.f32.mrf.mxu3 }
 0x2ee   : > { %v1905_v21 = vadd.f32 %v1904_v55, %v1056_v44  ;;  %v5690_v20 = vpop.f32.mrf.mxu0  ;;  %v5692_v48 = vpop.f32.mrf.mxu1 }
 0x2f0   : > { %v5694_v0 = vadd.f32 %v1953_v8, %v1905_v21 }
 0x2f5   : > { %v5696_v14 = vpop.f32.mrf.mxu2  ;;  %v5698_v37 = vpop.f32.mrf.mxu3 }
 0x2f6   : > { %v5700_v27 = vpop.f32.mrf.mxu0  ;;  %v5702_v5 = vpop.f32.mrf.mxu1 }
 0x2f9   : > { %2006 = vmatmul.bf16.gmra.mxu0 %v5399_v62  ;;  %2055 = vmatmul.bf16.gmra.mxu1 %v5403_v2 }
 0x2fa   : > { %2104 = vmatmul.bf16.gmra.mxu2 %v5399_v62  ;;  %2153 = vmatmul.bf16.gmra.mxu3 %v5403_v2 }
 0x2fd   : > { %v5708_v7 = vpop.f32.mrf.mxu2  ;;  %v5710_v29 = vpop.f32.mrf.mxu3 }
 0x2fe   : > { %v1813_v32 = vpop.f32.mrf.mxu0  ;;  %v5712_v30 = vpop.f32.mrf.mxu1 }
 0x305   : > { %v5714_v10 = vpop.f32.mrf.mxu2  ;;  %v5716_v44 = vpop.f32.mrf.mxu3 }
 0x306   : > { %v1816_v55 = vpop.f32.mrf.mxu0  ;;  %v1865_v8 = vpop.f32.mrf.mxu1 }
 0x309   : > { %2011 = vmatmul.bf16.gmra.mxu0 %v5461_v58  ;;  %2060 = vmatmul.bf16.gmra.mxu1 %v5465_v17 }
 0x30a   : > { %2109 = vmatmul.bf16.gmra.mxu2 %v5461_v58  ;;  %2158 = vmatmul.bf16.gmra.mxu3 %v5465_v17  ;;  %v1097_v58 = vld [vmem:[#allocation10 + $0x2e0] sm:$0xff] }
 0x30d   : > { %v1914_v62 = vpop.f32.mrf.mxu2  ;;  %v5722_v2 = vpop.f32.mrf.mxu3 }
 0x30e   : > { %v1818_v21 = vpop.f32.mrf.mxu0  ;;  %v1867_v4 = vpop.f32.mrf.mxu1 }
 0x30f   : > { %v1819_v50 = vadd.f32 %v1818_v21, %v1085_v45 }
 0x311   : > { %v1868_v6 = vadd.f32 %v1867_v4, %v1819_v50 }
 0x315   : > { %v1916_v15 = vpop.f32.mrf.mxu2  ;;  %v1965_v51 = vpop.f32.mrf.mxu3 }
 0x316   : > { %v1821_v33 = vpop.f32.mrf.mxu0  ;;  %v1870_v36 = vpop.f32.mrf.mxu1 }
 0x317   : > { %v1822_v17 = vadd.f32 %v1821_v33, %v1091_v19 }
 0x319   : > { %2016 = vmatmul.bf16.gmra.mxu0 %v5520_v49  ;;  %2065 = vmatmul.bf16.gmra.mxu1 %v5524_v18  ;;  %v1871_v41 = vadd.f32 %v1870_v36, %v1822_v17 }
 0x31a   : > { %2114 = vmatmul.bf16.gmra.mxu2 %v5520_v49  ;;  %2163 = vmatmul.bf16.gmra.mxu3 %v5524_v18  ;;  %v1817_v49 = vadd.f32 %v1816_v55, %v1079_v54  ;;  %v1010_v55 = vld [vmem:[#allocation10 + $0x28] sm:$0xff] }
 0x31d   : > { %v1919_v24 = vpop.f32.mrf.mxu2  ;;  %v1968_v34 = vpop.f32.mrf.mxu3 }
 0x31e   : > { %v1823_v26 = vpop.f32.mrf.mxu0  ;;  %v1872_v22 = vpop.f32.mrf.mxu1  ;;  %v1920_v60 = vadd.f32 %v1919_v24, %v1092_v13  ;;  %v1917_v13 = vadd.f32 %v1916_v15, %v1086_v12  ;;  %v1074_v12 = vld [vmem:[#allocation10 + $0x228] sm:$0xff]  ;;  %v1061_v15 = vld [vmem:[#allocation10 + $0x1c0] sm:$0xff] }
 0x31f   : > { %v1824_v47 = vadd.f32 %v1823_v26, %v1097_v58  ;;  %v1073_v58 = vld [vmem:[#allocation10 + $0x220] sm:$0xff] }
 0x320   : > { %v1969_v36 = vadd.f32 %v1968_v34, %v1920_v60  ;;  %v1814_v54 = vadd.f32 %v1813_v32, %v1073_v58 }
 0x321   : > { %v1873_v40 = vadd.f32 %v1872_v22, %v1824_v47  ;;  %v1866_v47 = vadd.f32 %v1865_v8, %v1817_v49  ;;  %v1080_v22 = vld [vmem:[#allocation10 + $0x258] sm:$0xff] }
 0x323   : > { %v2216_v42 = vpack.c.bf16 %v1873_v40, %v1871_v41  ;;  %v1067_v40 = vld [vmem:[#allocation10 + $0x1f0] sm:$0xff]  ;;  %v2215_v24 = vpack.c.bf16 %v1868_v6, %v1866_v47 }
 0x325   : > { %v1921_v25 = vpop.f32.mrf.mxu2  ;;  %v1970_v18 = vpop.f32.mrf.mxu3  ;;  %2225 = vmatpush.bf16.xpose.msrb.mxu0 %v2216_v42  ;;  %v1915_v42 = vadd.f32 %v1914_v62, %v1080_v22  ;;  %v1912_v62 = vadd.f32 %v5714_v10, %v1074_v12  ;;  %v1062_v10 = vld [vmem:[#allocation10 + $0x1c8] sm:$0xff] }
 0x326   : > { %v1922_v19 = vadd.f32 %v1921_v25, %v1098_v46  ;;  %v1982_v33 = vpop.f32.mrf.mxu0  ;;  %v2031_v3 = vpop.f32.mrf.mxu1  ;;  %v1812_v46 = vadd.f32 %v5700_v27, %v1067_v40  ;;  %v1068_v27 = vld [vmem:[#allocation10 + $0x1f8] sm:$0xff]  ;;  %v1022_v40 = vld [vmem:[#allocation10 + $0x88] sm:$0xff] }
 0x327   : > { %v1983_v26 = vadd.f32 %v1982_v33, %v1009_v16  ;;  %v1966_v16 = vadd.f32 %v1965_v51, %v1917_v13  ;;  %v1964_v6 = vadd.f32 %v5722_v2, %v1915_v42  ;;  %v1809_v51 = vadd.f32 %v5690_v20, %v1061_v15 }
 0x328   : > { %v1971_v17 = vadd.f32 %v1970_v18, %v1922_v19  ;;  %v1861_v8 = vadd.f32 %v5702_v5, %v1812_v46  ;;  %v1910_v18 = vadd.f32 %v5708_v7, %v1068_v27  ;;  %v1021_v19 = vld [vmem:[#allocation10 + $0x80] sm:$0xff]  ;;  %v1961_v2 = vadd.f32 %v5716_v44, %v1912_v62 }
 0x329   : > { %v5728_v45 = vadd.f32 %v2031_v3, %v1983_v26  ;;  %v1863_v3 = vadd.f32 %v5712_v30, %v1814_v54  ;;  %v2497_v21 = vpack.c.bf16 %v1966_v16, %v1964_v6  ;;  %v1858_v58 = vadd.f32 %v5692_v48, %v1809_v51  ;;  %v1045_v62 = vld [vmem:[#allocation10 + $0x140] sm:$0xff]  ;;  %v1011_v51 = vld [vmem:[#allocation10 + $0x30] sm:$0xff] }
 0x32a   : > { %v2498_v41 = vpack.c.bf16 %v1971_v17, %v1969_v36  ;;  %v1959_v20 = vadd.f32 %v5710_v29, %v1910_v18  ;;  %v1907_v7 = vadd.f32 %v5696_v14, %v1062_v10  ;;  %v1033_v14 = vld [vmem:[#allocation10 + $0xe0] sm:$0xff]  ;;  %v6476_v46 = vpack.c.bf16 %v5676_v23, %v5666_v1 }
 0x32b   : > { %6468 = vst [vmem:[#allocation92_spill] sm:$0xff] %v5728_v45  ;;  %v2214_v49 = vpack.c.bf16 %v1863_v3, %v1861_v8  ;;  %v2213_v22 = vpack.c.bf16 %v1858_v58, %v5682_v38  ;;  %v6477_v3 = vpack.c.bf16 %v5680_v11, %v5674_v9  ;;  %v6478_v15 = vpack.c.bf16 %v5660_v35, %v5650_v28 }
 0x32c   : > { %2507 = vmatpush.bf16.xpose.msrb.mxu2 %v2498_v41  ;;  %v2496_v47 = vpack.c.bf16 %v1961_v2, %v1959_v20  ;;  %v1956_v44 = vadd.f32 %v5698_v37, %v1907_v7  ;;  %v6480_v27 = vpack.c.bf16 %v5664_v61, %v5658_v39  ;;  %v6481_v28 = vpack.c.bf16 %v5644_v31, %v5634_v52  ;;  %v1046_v2 = vld [vmem:[#allocation10 + $0x148] sm:$0xff]  ;;  %v1012_v31 = vld [vmem:[#allocation10 + $0x38] sm:$0xff]  ;;  %v6485_v20 = vld [vmem:[#allocation41_spill] sm:$0xff] }
 0x32d   : > { %v2080_v50 = vpop.f32.mrf.mxu2  ;;  %v2129_v25 = vpop.f32.mrf.mxu3  ;;  %2226 = vmatpush.bf16.xpose.msrb.mxu0 %v2215_v24  ;;  %v6482_v61 = vpack.c.bf16 %v5648_v57, %v5642_v43  ;;  %v1691_v7 = vadd.f32 %v6485_v20, %v1012_v31  ;;  %v6486_v57 = vld [vmem:[#allocation39_spill] sm:$0xff]  ;;  %v6497_v20 = vld [vmem:[#allocation50_spill] sm:$0xff] }
 0x32e   : > { %v2081_v60 = vadd.f32 %v2080_v50, %v1010_v55  ;;  %v5731_v34 = vpop.f32.mrf.mxu0  ;;  %v5733_v4 = vpop.f32.mrf.mxu1  ;;  %v2495_v55 = vpack.c.bf16 %v1956_v44, %v5694_v0 }
 0x32f   : > { %6469 = vst [vmem:[#allocation93_spill] sm:$0xff] %v5733_v4  ;;  %v1100_v4 = vld [vmem:[#allocation10 + $0x2f8] sm:$0xff] }
 0x330   : > { %v5737_v32 = vadd.f32 %v2129_v25, %v2081_v60  ;;  %v1034_v60 = vld [vmem:[#allocation10 + $0xe8] sm:$0xff] }
 0x332   : > { %6470 = vst [vmem:[#allocation94_spill] sm:$0xff] %v5737_v32 }
 0x334   : > { %2508 = vmatpush.bf16.xpose.msrb.mxu2 %v2497_v21 }
 0x335   : > { %v5743_v30 = vpop.f32.mrf.mxu2  ;;  %v5745_v33 = vpop.f32.mrf.mxu3  ;;  %2227 = vmatpush.bf16.xpose.msrb.mxu0 %v2214_v49 }
 0x336   : > { %6471 = vst [vmem:[#allocation95_spill] sm:$0xff] %v5743_v30  ;;  %v1987_v26 = vpop.f32.mrf.mxu0  ;;  %v2036_v5 = vpop.f32.mrf.mxu1 }
 0x337   : > { %6472 = vst [vmem:[#allocation96_spill] sm:$0xff] %v5745_v33  ;;  %v1988_v36 = vadd.f32 %v1987_v26, %v1021_v19  ;;  %v1593_v19 = vadd.f32 %v5308_v59, %v1011_v51  ;;  %v6494_v51 = vld [vmem:[#allocation51_spill] sm:$0xff]  ;;  %v1075_v33 = vld [vmem:[#allocation10 + $0x230] sm:$0xff] }
 0x339   : > { %v5750_v17 = vadd.f32 %v2036_v5, %v1988_v36  ;;  %v6483_v5 = vpack.c.bf16 %v5628_v63, %v5618_v53  ;;  %v1642_v52 = vadd.f32 %v5316_v56, %v1593_v19  ;;  %v1057_v53 = vld [vmem:[#allocation10 + $0x1a0] sm:$0xff]  ;;  %v6490_v63 = vld [vmem:[#allocation42_spill] sm:$0xff] }
 0x33a   : > { %v1740_v56 = vadd.f32 %v6490_v63, %v1691_v7  ;;  %v6495_v19 = vld [vmem:[#allocation43_spill] sm:$0xff]  ;;  %v1036_v63 = vld [vmem:[#allocation10 + $0xf8] sm:$0xff] }
 0x33b   : > { %6473 = vst [vmem:[#allocation97_spill] sm:$0xff] %v5750_v17  ;;  %v2201_v43 = vpack.c.bf16 %v1642_v52, %v6486_v57  ;;  %v6498_v57 = vld [vmem:[#allocation58_spill] sm:$0xff] }
 0x33c   : > { %2509 = vmatpush.bf16.xpose.msrb.mxu2 %v2496_v47  ;;  %v6487_v47 = vld [vmem:[#allocation91_spill] sm:$0xff] }
 0x33d   : > { %v2085_v13 = vpop.f32.mrf.mxu2  ;;  %v2134_v41 = vpop.f32.mrf.mxu3  ;;  %2228 = vmatpush.bf16.xpose.msrb.mxu0 %v2213_v22  ;;  %v6488_v22 = vld [vmem:[#allocation90_spill] sm:$0xff] }
 0x33e   : > { %v2086_v54 = vadd.f32 %v2085_v13, %v1022_v40  ;;  %v5755_v48 = vpop.f32.mrf.mxu0  ;;  %v5757_v24 = vpop.f32.mrf.mxu1  ;;  %v6489_v40 = vpack.c.bf16 %v6487_v47, %v6488_v22 }
 0x340   : > { %v5759_v29 = vadd.f32 %v2134_v41, %v2086_v54 }
 0x342   : > { %6474 = vst [vmem:[#allocation98_spill] sm:$0xff] %v5759_v29 }
 0x344   : > { %2510 = vmatpush.bf16.xpose.msrb.mxu2 %v2495_v55  ;;  %v1023_v55 = vld [vmem:[#allocation10 + $0x90] sm:$0xff] }
 0x345   : > { %v5762_v42 = vpop.f32.mrf.mxu2  ;;  %v5764_v38 = vpop.f32.mrf.mxu3  ;;  %2229 = vmatpush.bf16.xpose.msrb.mxu0 %v6476_v46  ;;  %v6491_v46 = vld [vmem:[#allocation40_spill] sm:$0xff] }
 0x346   : > { %6475 = vst [vmem:[#allocation99_spill] sm:$0xff] %v5764_v38  ;;  %v1992_v37 = vpop.f32.mrf.mxu0  ;;  %v2041_v50 = vpop.f32.mrf.mxu1 }
 0x347   : > { %v1993_v25 = vadd.f32 %v1992_v37, %v1033_v14  ;;  %v2483_v37 = vpack.c.bf16 %v1740_v56, %v6491_v46 }
 0x349   : > { %v5769_v16 = vadd.f32 %v2041_v50, %v1993_v25  ;;  %v6492_v25 = vld [vmem:[#allocation48_spill] sm:$0xff] }
 0x34c   : > { %2511 = vmatpush.bf16.xpose.msrb.mxu2 %v6477_v3  ;;  %v1058_v3 = vld [vmem:[#allocation10 + $0x1a8] sm:$0xff] }
 0x34d   : > { %v2090_v0 = vpop.f32.mrf.mxu2  ;;  %v2139_v12 = vpop.f32.mrf.mxu3  ;;  %2230 = vmatpush.bf16.xpose.msrb.mxu0 %v6478_v15  ;;  %v6493_v15 = vld [vmem:[#allocation49_spill] sm:$0xff] }
 0x34e   : > { %v2091_v6 = vadd.f32 %v2090_v0, %v1034_v60  ;;  %v5777_v8 = vpop.f32.mrf.mxu0  ;;  %v5779_v1 = vpop.f32.mrf.mxu1  ;;  %v1598_v60 = vadd.f32 %v6492_v25, %v1023_v55 }
 0x350   : > { %v5781_v23 = vadd.f32 %v2139_v12, %v2091_v6  ;;  %v1647_v6 = vadd.f32 %v6493_v15, %v1598_v60  ;;  %v1047_v15 = vld [vmem:[#allocation10 + $0x150] sm:$0xff] }
 0x352   : > { %6479 = vst [vmem:[#allocation100_spill] sm:$0xff] %v5781_v23 }
 0x354   : > { %2512 = vmatpush.bf16.xpose.msrb.mxu2 %v6480_v27  ;;  %v1024_v27 = vld [vmem:[#allocation10 + $0x98] sm:$0xff] }
 0x355   : > { %v5786_v11 = vpop.f32.mrf.mxu2  ;;  %v5788_v9 = vpop.f32.mrf.mxu3  ;;  %2231 = vmatpush.bf16.xpose.msrb.mxu0 %v6481_v28 }
 0x356   : > { %v1997_v35 = vpop.f32.mrf.mxu0  ;;  %v2046_v21 = vpop.f32.mrf.mxu1 }
 0x357   : > { %v1998_v49 = vadd.f32 %v1997_v35, %v1045_v62 }
 0x359   : > { %v5793_v18 = vadd.f32 %v2046_v21, %v1998_v49  ;;  %v1696_v49 = vadd.f32 %v6494_v51, %v1024_v27 }
 0x35c   : > { %2513 = vmatpush.bf16.xpose.msrb.mxu2 %v6482_v61  ;;  %v6496_v61 = vld [vmem:[#allocation52_spill] sm:$0xff] }
 0x35d   : > { %v2095_v39 = vpop.f32.mrf.mxu2  ;;  %v2144_v26 = vpop.f32.mrf.mxu3  ;;  %2232 = vmatpush.bf16.xpose.msrb.mxu0 %v6483_v5 }
 0x35e   : > { %v2096_v58 = vadd.f32 %v2095_v39, %v1046_v2  ;;  %v5803_v10 = vpop.f32.mrf.mxu0  ;;  %v5805_v36 = vpop.f32.mrf.mxu1  ;;  %v2202_v2 = vpack.c.bf16 %v1647_v6, %v6495_v19  ;;  %v1745_v39 = vadd.f32 %v6496_v61, %v1696_v49  ;;  %v6503_v6 = vld [vmem:[#allocation60_spill] sm:$0xff] }
 0x360   : > { %v5807_v59 = vadd.f32 %v2144_v26, %v2096_v58  ;;  %v1035_v58 = vld [vmem:[#allocation10 + $0xf0] sm:$0xff]  ;;  %v2484_v7 = vpack.c.bf16 %v1745_v39, %v6497_v20  ;;  %v1048_v39 = vld [vmem:[#allocation10 + $0x158] sm:$0xff] }
 0x362   : > { %6484 = vst [vmem:[#allocation101_spill] sm:$0xff] %v5807_v59  ;;  %v1063_v59 = vld [vmem:[#allocation10 + $0x1d0] sm:$0xff] }
 0x364   : > { %2514 = vmatpush.bf16.xpose.msrb.mxu2 %v6489_v40  ;;  %2233 = vmatmul.bf16.vlgmr.msrb.gmra.mxu0 %v2201_v43  ;;  %v1603_v43 = vadd.f32 %v6498_v57, %v1035_v58  ;;  %v6499_v40 = vld [vmem:[#allocation59_spill] sm:$0xff] }
 0x365   : > { %v5815_v13 = vpop.f32.mrf.mxu2  ;;  %v5817_v41 = vpop.f32.mrf.mxu3 }
 0x366   : > { %v2002_v44 = vpop.f32.mrf.mxu0  ;;  %v2051_v54 = vpop.f32.mrf.mxu1 }
 0x367   : > { %v2003_v14 = vadd.f32 %v2002_v44, %v1057_v53  ;;  %v1652_v53 = vadd.f32 %v6499_v40, %v1603_v43  ;;  %v6507_v43 = vld [vmem:[#allocation63_spill] sm:$0xff] }
 0x369   : > { %v5820_v50 = vadd.f32 %v2051_v54, %v2003_v14  ;;  %v6500_v54 = vld [vmem:[#allocation61_spill] sm:$0xff] }
 0x36a   : > { %v1701_v55 = vadd.f32 %v6500_v54, %v1036_v63  ;;  %v6501_v14 = vld [vmem:[#allocation53_spill] sm:$0xff] }
 0x36b   : > { %2515 = vmatmul.bf16.vlgmr.msrb.gmra.mxu2 %v2483_v37  ;;  %v2203_v46 = vpack.c.bf16 %v1652_v53, %v6501_v14  ;;  %v6502_v37 = vld [vmem:[#allocation62_spill] sm:$0xff]  ;;  %v6508_v53 = vld [vmem:[#allocation72_spill] sm:$0xff] }
 0x36c   : > { %v1750_v25 = vadd.f32 %v6502_v37, %v1701_v55  ;;  %v1059_v37 = vld [vmem:[#allocation10 + $0x1b0] sm:$0xff] }
 0x36d   : > { %v2100_v0 = vpop.f32.mrf.mxu2  ;;  %v2149_v12 = vpop.f32.mrf.mxu3 }
 0x36e   : > { %v2101_v62 = vadd.f32 %v2100_v0, %v1058_v3  ;;  %v5824_v28 = vpop.f32.mrf.mxu0  ;;  %v5826_v35 = vpop.f32.mrf.mxu1  ;;  %v2485_v27 = vpack.c.bf16 %v1750_v25, %v6503_v6  ;;  %v6509_v25 = vld [vmem:[#allocation68_spill] sm:$0xff] }
 0x36f   : > { %v6510_v6 = vld [vmem:[#allocation76_spill] sm:$0xff] }
 0x370   : > { %v5828_v21 = vadd.f32 %v2149_v12, %v2101_v62  ;;  %v6504_v62 = vld [vmem:[#allocation69_spill] sm:$0xff] }
 0x371   : > { %v1608_v51 = vadd.f32 %v6504_v62, %v1047_v15  ;;  %v1093_v62 = vld [vmem:[#allocation10 + $0x2c0] sm:$0xff] }
 0x374   : > { %2238 = vmatmul.bf16.gmra.mxu0 %v2202_v2  ;;  %v6505_v2 = vld [vmem:[#allocation70_spill] sm:$0xff] }
 0x375   : > { %v5833_v26 = vpop.f32.mrf.mxu2  ;;  %v5835_v5 = vpop.f32.mrf.mxu3  ;;  %v1657_v61 = vadd.f32 %v6505_v2, %v1608_v51  ;;  %v1087_v51 = vld [vmem:[#allocation10 + $0x290] sm:$0xff] }
 0x376   : > { %v5837_v52 = vpop.f32.mrf.mxu0  ;;  %v5839_v31 = vpop.f32.mrf.mxu1  ;;  %v1099_v2 = vld [vmem:[#allocation10 + $0x2f0] sm:$0xff] }
 0x377   : > { %v2204_v40 = vpack.c.bf16 %v1657_v61, %v6507_v43  ;;  %v6511_v61 = vld [vmem:[#allocation77_spill] sm:$0xff] }
 0x37b   : > { %2520 = vmatmul.bf16.gmra.mxu2 %v2484_v7  ;;  %v6506_v7 = vld [vmem:[#allocation71_spill] sm:$0xff] }
 0x37c   : > { %v1706_v57 = vadd.f32 %v6506_v7, %v1048_v39 }
 0x37d   : > { %v5843_v47 = vpop.f32.mrf.mxu2  ;;  %v5845_v22 = vpop.f32.mrf.mxu3 }
 0x37e   : > { %v2009_v56 = vpop.f32.mrf.mxu0  ;;  %v5848_v44 = vpop.f32.mrf.mxu1  ;;  %v1755_v63 = vadd.f32 %v6508_v53, %v1706_v57 }
 0x37f   : > { %v2010_v30 = vadd.f32 %v2009_v56, %v1075_v33  ;;  %v1076_v33 = vld [vmem:[#allocation10 + $0x238] sm:$0xff] }
 0x380   : > { %v2486_v15 = vpack.c.bf16 %v1755_v63, %v6509_v25  ;;  %v1094_v63 = vld [vmem:[#allocation10 + $0x2c8] sm:$0xff] }
 0x384   : > { %2243 = vmatmul.bf16.gmra.mxu0 %v2203_v46 }
 0x385   : > { %v5853_v60 = vpop.f32.mrf.mxu2  ;;  %v5855_v3 = vpop.f32.mrf.mxu3 }
 0x386   : > { %v2012_v0 = vpop.f32.mrf.mxu0  ;;  %v2061_v12 = vpop.f32.mrf.mxu1 }
 0x38b   : > { %2525 = vmatmul.bf16.gmra.mxu2 %v2485_v27  ;;  %v1613_v27 = vadd.f32 %v6510_v6, %v1059_v37  ;;  %v6512_v37 = vld [vmem:[#allocation73_spill] sm:$0xff] }
 0x38d   : > { %v2110_v49 = vpop.f32.mrf.mxu2  ;;  %v5859_v19 = vpop.f32.mrf.mxu3  ;;  %v1662_v43 = vadd.f32 %v6511_v61, %v1613_v27 }
 0x38e   : > { %v2014_v58 = vpop.f32.mrf.mxu0  ;;  %v2063_v20 = vpop.f32.mrf.mxu1 }
 0x38f   : > { %v2015_v53 = vadd.f32 %v2014_v58, %v1087_v51  ;;  %v2205_v6 = vpack.c.bf16 %v1662_v43, %v6512_v37  ;;  %v1027_v37 = vld [vmem:[#allocation10 + $0xb0] sm:$0xff] }
 0x391   : > { %v2064_v17 = vadd.f32 %v2063_v20, %v2015_v53 }
 0x394   : > { %2248 = vmatmul.bf16.gmra.mxu0 %v2204_v40  ;;  %v1081_v40 = vld [vmem:[#allocation10 + $0x260] sm:$0xff] }
 0x395   : > { %v2112_v54 = vpop.f32.mrf.mxu2  ;;  %v2161_v55 = vpop.f32.mrf.mxu3  ;;  %v2013_v23 = vadd.f32 %v2012_v0, %v1081_v40 }
 0x396   : > { %v2017_v14 = vpop.f32.mrf.mxu0  ;;  %v2066_v46 = vpop.f32.mrf.mxu1 }
 0x397   : > { %v2018_v32 = vadd.f32 %v2017_v14, %v1093_v62  ;;  %v1088_v14 = vld [vmem:[#allocation10 + $0x298] sm:$0xff]  ;;  %v2062_v51 = vadd.f32 %v2061_v12, %v2013_v23  ;;  %v2108_v23 = vadd.f32 %v5853_v60, %v1076_v33 }
 0x399   : > { %v2067_v38 = vadd.f32 %v2066_v46, %v2018_v32  ;;  %v2113_v32 = vadd.f32 %v2112_v54, %v1088_v14  ;;  %v2223_v56 = vpack.c.bf16 %v2064_v17, %v2062_v51  ;;  %v6513_v17 = vld [vmem:[#allocation75_spill] sm:$0xff]  ;;  %v1015_v14 = vld [vmem:[#allocation10 + $0x50] sm:$0xff] }
 0x39b   : > { %2530 = vmatmul.bf16.gmra.mxu2 %v2486_v15  ;;  %v1069_v15 = vld [vmem:[#allocation10 + $0x200] sm:$0xff]  ;;  %v2162_v12 = vadd.f32 %v2161_v55, %v2113_v32  ;;  %v2157_v55 = vadd.f32 %v5855_v3, %v2108_v23  ;;  %v1990_v3 = vadd.f32 %v5755_v48, %v1027_v37  ;;  %v1985_v48 = vadd.f32 %v5731_v34, %v1015_v14  ;;  %v6531_v23 = vld [vmem:[#allocation84_spill] sm:$0xff] }
 0x39c   : > { %v2008_v58 = vadd.f32 %v5837_v52, %v1069_v15  ;;  %v1070_v52 = vld [vmem:[#allocation10 + $0x208] sm:$0xff]  ;;  %v6523_v34 = vld [vmem:[#allocation79_spill] sm:$0xff] }
 0x39d   : > { %v2115_v39 = vpop.f32.mrf.mxu2  ;;  %v2164_v7 = vpop.f32.mrf.mxu3 }
 0x39e   : > { %v2019_v57 = vpop.f32.mrf.mxu0  ;;  %v2068_v45 = vpop.f32.mrf.mxu1  ;;  %v2116_v27 = vadd.f32 %v2115_v39, %v1094_v63  ;;  %v2057_v40 = vadd.f32 %v5839_v31, %v2008_v58  ;;  %v1052_v63 = vld [vmem:[#allocation10 + $0x178] sm:$0xff] }
 0x39f   : > { %v2020_v29 = vadd.f32 %v2019_v57, %v1099_v2  ;;  %v1082_v2 = vld [vmem:[#allocation10 + $0x268] sm:$0xff]  ;;  %v1028_v58 = vld [vmem:[#allocation10 + $0xb8] sm:$0xff] }
 0x3a0   : > { %v2111_v46 = vadd.f32 %v2110_v49, %v1082_v2  ;;  %v2165_v43 = vadd.f32 %v2164_v7, %v2116_v27  ;;  %v1039_v49 = vld [vmem:[#allocation10 + $0x110] sm:$0xff]  ;;  %v2106_v7 = vadd.f32 %v5843_v47, %v1070_v52  ;;  %v2098_v47 = vadd.f32 %v5815_v13, %v1052_v63 }
 0x3a1   : > { %v2069_v25 = vadd.f32 %v2068_v45, %v2020_v29  ;;  %v2005_v45 = vadd.f32 %v5824_v28, %v1063_v59  ;;  %v2059_v29 = vadd.f32 %v5848_v44, %v2010_v30  ;;  %v1064_v30 = vld [vmem:[#allocation10 + $0x1d8] sm:$0xff]  ;;  %v2088_v51 = vadd.f32 %v5762_v42, %v1028_v58  ;;  %v6527_v42 = vld [vmem:[#allocation100_spill] sm:$0xff] }
 0x3a2   : > { %v6514_v44 = vld [vmem:[#allocation74_spill] sm:$0xff]  ;;  %v2160_v31 = vadd.f32 %v5859_v19, %v2111_v46  ;;  %v2103_v60 = vadd.f32 %v5833_v26, %v1064_v30  ;;  %v2147_v13 = vadd.f32 %v5817_v41, %v2098_v47  ;;  %v6535_v30 = vld [vmem:[#allocation85_spill] sm:$0xff] }
 0x3a3   : > { %v2224_v62 = vpack.c.bf16 %v2069_v25, %v2067_v38  ;;  %v1051_v38 = vld [vmem:[#allocation10 + $0x170] sm:$0xff]  ;;  %v2054_v59 = vadd.f32 %v5826_v35, %v2005_v45  ;;  %v2222_v28 = vpack.c.bf16 %v2059_v29, %v2057_v40  ;;  %v6515_v57 = vpack.c.bf16 %v6513_v17, %v6514_v44  ;;  %v1016_v41 = vld [vmem:[#allocation10 + $0x58] sm:$0xff]  ;;  %v6538_v44 = vld [vmem:[#allocation88_spill] sm:$0xff] }
 0x3a4   : > { %2253 = vmatmul.bf16.gmra.mxu0 %v2205_v6  ;;  %v1995_v35 = vadd.f32 %v5777_v8, %v1039_v49  ;;  %v2155_v6 = vadd.f32 %v5845_v22, %v2106_v7  ;;  %v2152_v19 = vadd.f32 %v5835_v5, %v2103_v60  ;;  %v1040_v8 = vld [vmem:[#allocation10 + $0x118] sm:$0xff]  ;;  %v6521_v45 = vld [vmem:[#allocation97_spill] sm:$0xff] }
 0x3a5   : > { %v2117_v61 = vpop.f32.mrf.mxu2  ;;  %2426 = vmatpush.bf16.msrb.mxu1 %v2224_v62  ;;  %v2166_v20 = vpop.f32.mrf.mxu3  ;;  %v2221_v25 = vpack.c.bf16 %v2054_v59, %v5820_v50  ;;  %v6516_v50 = vld [vmem:[#allocation80_spill] sm:$0xff]  ;;  %v6517_v62 = vld [vmem:[#allocation78_spill] sm:$0xff]  ;;  %v2093_v22 = vadd.f32 %v5786_v11, %v1040_v8  ;;  %v6520_v11 = vld [vmem:[#allocation93_spill] sm:$0xff] }
 0x3a6   : > { %v2118_v0 = vadd.f32 %v2117_v61, %v1100_v4  ;;  %v2000_v4 = vadd.f32 %v5803_v10, %v1051_v38  ;;  %v2505_v10 = vpack.c.bf16 %v2162_v12, %v2160_v31  ;;  %v2504_v26 = vpack.c.bf16 %v2157_v55, %v2155_v6  ;;  %v6519_v61 = vld [vmem:[#allocation101_spill] sm:$0xff]  ;;  %v6530_v40 = vld [vmem:[#allocation98_spill] sm:$0xff]  ;;  %v6542_v31 = vld [vmem:[#allocation87_spill] sm:$0xff] }
 0x3a7   : > { %v2044_v15 = vadd.f32 %v5779_v1, %v1995_v35  ;;  %v6518_v27 = vpack.c.bf16 %v6516_v50, %v6517_v62  ;;  %v2503_v5 = vpack.c.bf16 %v2152_v19, %v5828_v21  ;;  %v2039_v1 = vadd.f32 %v5757_v24, %v1990_v3  ;;  %v6522_v29 = vld [vmem:[#allocation81_spill] sm:$0xff]  ;;  %v6525_v24 = vld [vmem:[#allocation95_spill] sm:$0xff]  ;;  %v6532_v12 = vld [vmem:[#allocation82_spill] sm:$0xff] }
 0x3a8   : > { %v2167_v39 = vadd.f32 %v2166_v20, %v2118_v0  ;;  %v2049_v53 = vadd.f32 %v5805_v36, %v2000_v4  ;;  %v2142_v2 = vadd.f32 %v5788_v9, %v2093_v22  ;;  %v2502_v32 = vpack.c.bf16 %v2147_v13, %v6519_v61  ;;  %v6528_v9 = vld [vmem:[#allocation92_spill] sm:$0xff]  ;;  %v6534_v4 = vld [vmem:[#allocation94_spill] sm:$0xff]  ;;  %v6541_v7 = vld [vmem:[#allocation89_spill] sm:$0xff] }
 0x3a9   : > { %2427 = vmatpush.bf16.msrb.mxu1 %v2223_v56  ;;  %v2034_v0 = vadd.f32 %v6520_v11, %v1985_v48  ;;  %v2218_v21 = vpack.c.bf16 %v2039_v1, %v6521_v45  ;;  %v6524_v33 = vpack.c.bf16 %v6522_v29, %v6523_v34  ;;  %v6526_v56 = vld [vmem:[#allocation99_spill] sm:$0xff]  ;;  %v6543_v60 = vpack.c.bf16 %v6541_v7, %v6542_v31 }
 0x3aa   : > { %v2506_v54 = vpack.c.bf16 %v2167_v39, %v2165_v43  ;;  %v2220_v36 = vpack.c.bf16 %v2049_v53, %v5793_v18  ;;  %v2219_v18 = vpack.c.bf16 %v2044_v15, %v5769_v16  ;;  %v2083_v16 = vadd.f32 %v6525_v24, %v1016_v41  ;;  %v6529_v43 = vld [vmem:[#allocation96_spill] sm:$0xff] }
 0x3ab   : > { %2535 = vmatmul.bf16.gmra.mxu2 %v6515_v57  ;;  %v2137_v20 = vadd.f32 %v6526_v56, %v2088_v51  ;;  %v2501_v38 = vpack.c.bf16 %v2142_v2, %v6527_v42  ;;  %v2217_v46 = vpack.c.bf16 %v2034_v0, %v6528_v9  ;;  %v6539_v57 = vld [vmem:[#allocation86_spill] sm:$0xff] }
 0x3ac   : > { %2708 = vmatpush.bf16.msrb.mxu3 %v2506_v54  ;;  %v2132_v39 = vadd.f32 %v6529_v43, %v2083_v16  ;;  %v6533_v54 = vpack.c.bf16 %v6531_v23, %v6532_v12  ;;  %v6540_v49 = vpack.c.bf16 %v6538_v44, %v6539_v57 }
 0x3ad   : > { %2428 = vmatpush.bf16.msrb.mxu1 %v2222_v28  ;;  %v2500_v52 = vpack.c.bf16 %v2137_v20, %v6530_v40  ;;  %v6536_v28 = vld [vmem:[#allocation83_spill] sm:$0xff] }
 0x3ae   : > { %v2499_v59 = vpack.c.bf16 %v2132_v39, %v6534_v4  ;;  %v6537_v17 = vpack.c.bf16 %v6535_v30, %v6536_v28 }
 0x3b0   : > { %2709 = vmatpush.bf16.msrb.mxu3 %v2505_v10 }
 0x3b1   : > { %2429 = vmatpush.bf16.msrb.mxu1 %v2221_v25 }
 0x3b4   : > { %2710 = vmatpush.bf16.msrb.mxu3 %v2504_v26  ;;  %2258 = vmatmul.bf16.gmra.mxu0 %v6518_v27 }
 0x3b5   : > { %2430 = vmatpush.bf16.msrb.mxu1 %v2220_v36 }
 0x3b8   : > { %2711 = vmatpush.bf16.msrb.mxu3 %v2503_v5 }
 0x3b9   : > { %2431 = vmatpush.bf16.msrb.mxu1 %v2219_v18 }
 0x3bb   : > { %2540 = vmatmul.bf16.gmra.mxu2 %v6524_v33 }
 0x3bc   : > { %2712 = vmatpush.bf16.msrb.mxu3 %v2502_v32 }
 0x3bd   : > { %2432 = vmatpush.bf16.msrb.mxu1 %v2218_v21 }
 0x3c0   : > { %2713 = vmatpush.bf16.msrb.mxu3 %v2501_v38 }
 0x3c1   : > { %2433 = vmatpush.bf16.msrb.mxu1 %v2217_v46 }
 0x3c4   : > { %2714 = vmatpush.bf16.msrb.mxu3 %v2500_v52  ;;  %2263 = vmatmul.bf16.gmra.mxu0 %v6533_v54 }
 0x3c8   : > { %2715 = vmatpush.bf16.msrb.mxu3 %v2499_v59 }
 0x3cb   : > { %2545 = vmatmul.bf16.gmra.mxu2 %v6537_v17 }
 0x3d4   : > { %2268 = vmatmul.bf16.gmra.mxu0 %v6540_v49 }
 0x3db   : > { %2550 = vmatmul.bf16.gmra.mxu2 %v6543_v60 }
 0x3e1   : > { %v2234_v55 = vpop.f32.mrf.mxu0 }
 0x3e2   : > { %2274 = vmax.xlane.f32.xlu2 %v2234_v55 }
 0x3e9   : > { %v2236_v10 = vpop.f32.mrf.mxu0 }
 0x3ea   : > { %2276 = vmax.xlane.f32.xlu0 %v2236_v10 }
 0x3ee   : > { %v2516_v35 = vpop.f32.mrf.mxu2 }
 0x3ef   : > { %2556 = vmax.xlane.f32.xlu1 %v2516_v35 }
 0x3f1   : > { %v2239_v53 = vpop.f32.mrf.mxu0 }
 0x3f2   : > { %2278 = vmax.xlane.f32.xlu0 %v2239_v53 }
 0x3f6   : > { %v2518_v63 = vpop.f32.mrf.mxu2 }
 0x3f7   : > { %2558 = vmax.xlane.f32.xlu2 %v2518_v63 }
 0x3f9   : > { %v5928_v25 = vpop.f32.mrf.mxu0 }
 0x3fa   : > { %2280 = vmax.xlane.f32.xlu1 %v5928_v25 }
 0x3fe   : > { %v5931_v37 = vpop.f32.mrf.mxu2 }
 0x3ff   : > { %2560 = vmax.xlane.f32.xlu2 %v5931_v37 }
 0x401   : > { %v5934_v6 = vpop.f32.mrf.mxu0 }
 0x402   : > { %2282 = vmax.xlane.f32.xlu1 %v5934_v6 }
 0x406   : > { %v5937_v47 = vpop.f32.mrf.mxu2 }
 0x407   : > { %2562 = vmax.xlane.f32.xlu0 %v5937_v47 }
 0x409   : > { %v5940_v19 = vpop.f32.mrf.mxu0 }
 0x40a   : > { %2284 = vmax.xlane.f32.xlu2 %v5940_v19 }
 0x40e   : > { %v5943_v26 = vpop.f32.mrf.mxu2 }
 0x40f   : > { %2564 = vmax.xlane.f32.xlu0 %v5943_v26 }
 0x411   : > { %v5946_v3 = vpop.f32.mrf.mxu0 }
 0x412   : > { %2286 = vmax.xlane.f32.xlu2 %v5946_v3 }
 0x416   : > { %v5949_v15 = vpop.f32.mrf.mxu2 }
 0x417   : > { %2566 = vmax.xlane.f32.xlu1 %v5949_v15 }
 0x419   : > { %v5952_v8 = vpop.f32.mrf.mxu0 }
 0x41a   : > { %2288 = vmax.xlane.f32.xlu0 %v5952_v8 }
 0x41e   : > { %v5955_v36 = vpop.f32.mrf.mxu2 }
 0x41f   : > { %2568 = vmax.xlane.f32.xlu1 %v5955_v36 }
 0x421   : > { %v5958_v14 = vpop.f32.mrf.mxu0 }
 0x426   : > { %v5960_v50 = vpop.f32.mrf.mxu2 }
 0x427   : > { %2570 = vmax.xlane.f32.xlu2 %v5960_v50  ;;  %2290 = vmax.xlane.f32.xlu1 %v5958_v14 }
 0x429   : > { %v5964_v62 = vpop.f32.mrf.mxu0 }
 0x42e   : > { %v5966_v27 = vpop.f32.mrf.mxu2 }
 0x42f   : > { %2572 = vmax.xlane.f32.xlu0 %v5966_v27  ;;  %2292 = vmax.xlane.f32.xlu2 %v5964_v62 }
 0x431   : > { %v5970_v22 = vpop.f32.mrf.mxu0 }
 0x436   : > { %v5972_v13 = vpop.f32.mrf.mxu2 }
 0x437   : > { %2574 = vmax.xlane.f32.xlu1 %v5972_v13  ;;  %2294 = vmax.xlane.f32.xlu0 %v5970_v22 }
 0x439   : > { %v5976_v5 = vpop.f32.mrf.mxu0 }
 0x43e   : > { %v5978_v48 = vpop.f32.mrf.mxu2 }
 0x43f   : > { %2576 = vmax.xlane.f32.xlu2 %v5978_v48  ;;  %2296 = vmax.xlane.f32.xlu1 %v5976_v5 }
 0x441   : > { %v6008_v44 = vpop.f32.mrf.mxu0 }
 0x446   : > { %v5985_v21 = vpop.f32.mrf.mxu2 }
 0x44e   : > { %v5993_v38 = vpop.f32.mrf.mxu2 }
 0x455   : > { %v2275_v1 = vpop.xlane.xlu2 %2274 }
 0x456   : > { %v2306_v58 = vsub.f32 %v2234_v55, %v2275_v1  ;;  %v6027_v1 = vpop.f32.mrf.mxu2 }
 0x458   : > { %v2322_v18 = vmul.f32 1.442695, %v2306_v58 }
 0x45a   : > { %4168 = vpow2.f32 %v2322_v18 }
 0x45d   : > { %v2277_v51 = vpop.xlane.xlu0 %2276 }
 0x45e   : > { %v2307_v2 = vsub.f32 %v2236_v10, %v2277_v51 }
 0x460   : > { %v5982_v61 = vpop.eup %4168  ;;  %v2324_v32 = vmul.f32 1.442695, %v2307_v2 }
 0x461   : > { %2354 = vadd.xlane.f32.xlu0 %v5982_v61 }
 0x462   : > { %4170 = vpow2.f32 %v2324_v32  ;;  %v2557_v11 = vpop.xlane.xlu1 %2556 }
 0x463   : > { %v2588_v0 = vsub.f32 %v2516_v35, %v2557_v11  ;;  %v6024_v35 = vpop.f32.mrf.mxu0 }
 0x465   : > { %v2604_v41 = vmul.f32 1.442695, %v2588_v0  ;;  %v2279_v45 = vpop.xlane.xlu0 %2278 }
 0x466   : > { %v2308_v29 = vsub.f32 %v2239_v53, %v2279_v45 }
 0x467   : > { %4172 = vpow2.f32 %v2604_v41 }
 0x468   : > { %v5987_v34 = vpop.eup %4170  ;;  %v2326_v33 = vmul.f32 1.442695, %v2308_v29 }
 0x469   : > { %2356 = vadd.xlane.f32.xlu1 %v5987_v34 }
 0x46a   : > { %v2559_v24 = vpop.xlane.xlu2 %2558  ;;  %4174 = vpow2.f32 %v2326_v33 }
 0x46b   : > { %v2589_v16 = vsub.f32 %v2518_v63, %v2559_v24 }
 0x46d   : > { %v5990_v56 = vpop.eup %4172  ;;  %v2606_v20 = vmul.f32 1.442695, %v2589_v16  ;;  %v2281_v42 = vpop.xlane.xlu1 %2280 }
 0x46e   : > { %2636 = vadd.xlane.f32.xlu2 %v5990_v56  ;;  %v2309_v40 = vsub.f32 %v5928_v25, %v2281_v42 }
 0x46f   : > { %4176 = vpow2.f32 %v2606_v20 }
 0x470   : > { %v5997_v43 = vpop.eup %4174  ;;  %v2328_v54 = vmul.f32 1.442695, %v2309_v40 }
 0x471   : > { %2580 = vmax.xlane.f32.xlu1 %v5993_v38 }
 0x472   : > { %v2561_v9 = vpop.xlane.xlu2 %2560 }
 0x473   : > { %v2590_v46 = vsub.f32 %v5931_v37, %v2561_v9 }
 0x475   : > { %v5999_v39 = vpop.eup %4176  ;;  %v2608_v52 = vmul.f32 1.442695, %v2590_v46  ;;  %v2283_v23 = vpop.xlane.xlu1 %2282 }
 0x476   : > { %v2310_v12 = vsub.f32 %v5934_v6, %v2283_v23  ;;  %2358 = vadd.xlane.f32.xlu2 %v5997_v43  ;;  %2638 = vadd.xlane.f32.xlu0 %v5999_v39 }
 0x477   : > { %4178 = vpow2.f32 %v2608_v52 }
 0x478   : > { %v2330_v4 = vmul.f32 1.442695, %v2310_v12  ;;  %4180 = vpow2.f32 %v2328_v54 }
 0x47a   : > { %v2563_v59 = vpop.xlane.xlu0 %2562  ;;  %4182 = vpow2.f32 %v2330_v4 }
 0x47b   : > { %v2591_v30 = vsub.f32 %v5937_v47, %v2563_v59 }
 0x47d   : > { %v6006_v28 = vpop.eup %4178  ;;  %v2610_v17 = vmul.f32 1.442695, %v2591_v30  ;;  %v2285_v57 = vpop.xlane.xlu2 %2284 }
 0x47e   : > { %2578 = vmax.xlane.f32.xlu0 %v5985_v21  ;;  %2640 = vadd.xlane.f32.xlu1 %v6006_v28  ;;  %v6013_v49 = vpop.eup %4180  ;;  %v2311_v10 = vsub.f32 %v5940_v19, %v2285_v57 }
 0x47f   : > { %4184 = vpow2.f32 %v2610_v17  ;;  %2298 = vmax.xlane.f32.xlu2 %v6008_v44 }
 0x480   : > { %v6015_v31 = vpop.eup %4182  ;;  %v2332_v37 = vmul.f32 1.442695, %v2311_v10 }
 0x482   : > { %v2565_v7 = vpop.xlane.xlu0 %2564 }
 0x483   : > { %v2592_v55 = vsub.f32 %v5943_v26, %v2565_v7 }
 0x485   : > { %v6017_v60 = vpop.eup %4184  ;;  %v2612_v53 = vmul.f32 1.442695, %v2592_v55  ;;  %v2287_v6 = vpop.xlane.xlu2 %2286 }
 0x486   : > { %2360 = vadd.xlane.f32.xlu0 %v6013_v49  ;;  %2362 = vadd.xlane.f32.xlu1 %v6015_v31  ;;  %v2312_v26 = vsub.f32 %v5946_v3, %v2287_v6 }
 0x487   : > { %2642 = vadd.xlane.f32.xlu2 %v6017_v60  ;;  %4186 = vpow2.f32 %v2612_v53 }
 0x488   : > { %v2334_v19 = vmul.f32 1.442695, %v2312_v26 }
 0x48a   : > { %v2567_v63 = vpop.xlane.xlu1 %2566 }
 0x48b   : > { %v2593_v25 = vsub.f32 %v5949_v15, %v2567_v63  ;;  %v6034_v15 = vpop.f32.mrf.mxu0 }
 0x48d   : > { %v2614_v47 = vmul.f32 1.442695, %v2593_v25  ;;  %v2289_v58 = vpop.xlane.xlu0 %2288  ;;  %v6032_v51 = vpop.eup %4186 }
 0x48e   : > { %2300 = vmax.xlane.f32.xlu0 %v6024_v35  ;;  %v2313_v11 = vsub.f32 %v5952_v8, %v2289_v58 }
 0x48f   : > { %4188 = vpow2.f32 %v2614_v47  ;;  %2582 = vmax.xlane.f32.xlu2 %v6027_v1 }
 0x490   : > { %4190 = vpow2.f32 %v2332_v37  ;;  %v2336_v0 = vmul.f32 1.442695, %v2313_v11 }
 0x491   : > { %4192 = vpow2.f32 %v2334_v19 }
 0x492   : > { %v2569_v18 = vpop.xlane.xlu1 %2568  ;;  %4194 = vpow2.f32 %v2336_v0 }
 0x493   : > { %v2594_v3 = vsub.f32 %v5955_v36, %v2569_v18  ;;  %v6048_v20 = vpop.f32.mrf.mxu0 }
 0x495   : > { %v6036_v2 = vpop.eup %4188  ;;  %v2616_v29 = vmul.f32 1.442695, %v2594_v3 }
 0x496   : > { %v6038_v32 = vpop.eup %4190  ;;  %2646 = vadd.xlane.f32.xlu1 %v6036_v2  ;;  %2644 = vadd.xlane.f32.xlu0 %v6032_v51 }
 0x497   : > { %2364 = vadd.xlane.f32.xlu2 %v6038_v32  ;;  %v6046_v33 = vpop.eup %4192 }
 0x498   : > { %v6056_v9 = vpop.eup %4194 }
 0x49a   : > { %v2571_v41 = vpop.xlane.xlu2 %2570  ;;  %v2291_v16 = vpop.xlane.xlu1 %2290 }
 0x49b   : > { %v2595_v45 = vsub.f32 %v5960_v50, %v2571_v41  ;;  %v2314_v8 = vsub.f32 %v5958_v14, %v2291_v16  ;;  %v6054_v50 = vpop.f32.mrf.mxu2 }
 0x49d   : > { %v2618_v24 = vmul.f32 1.442695, %v2595_v45  ;;  %v2338_v46 = vmul.f32 1.442695, %v2314_v8 }
 0x49e   : > { %2366 = vadd.xlane.f32.xlu0 %v6046_v33  ;;  %2302 = vmax.xlane.f32.xlu1 %v6034_v15 }
 0x49f   : > { %4196 = vpow2.f32 %v2618_v24  ;;  %2304 = vmax.xlane.f32.xlu2 %v6048_v20 }
 0x4a0   : > { %4198 = vpow2.f32 %v2616_v29 }
 0x4a1   : > { %4200 = vpow2.f32 %v2338_v46 }
 0x4a2   : > { %v2573_v36 = vpop.xlane.xlu0 %2572  ;;  %v2293_v42 = vpop.xlane.xlu2 %2292 }
 0x4a3   : > { %v2596_v52 = vsub.f32 %v5966_v27, %v2573_v36  ;;  %v2315_v12 = vsub.f32 %v5964_v62, %v2293_v42  ;;  %v6068_v17 = vpop.f32.mrf.mxu2 }
 0x4a5   : > { %v6058_v40 = vpop.eup %4196  ;;  %v2620_v14 = vmul.f32 1.442695, %v2596_v52  ;;  %v2340_v54 = vmul.f32 1.442695, %v2315_v12 }
 0x4a6   : > { %v6061_v23 = vpop.eup %4198  ;;  %2650 = vadd.xlane.f32.xlu0 %v6058_v40  ;;  %2368 = vadd.xlane.f32.xlu1 %v6056_v9 }
 0x4a7   : > { %2648 = vadd.xlane.f32.xlu2 %v6061_v23  ;;  %4202 = vpow2.f32 %v2620_v14  ;;  %v6070_v57 = vpop.eup %4200 }
 0x4a8   : > { %4204 = vpow2.f32 %v2340_v54 }
 0x4aa   : > { %v2575_v4 = vpop.xlane.xlu1 %2574  ;;  %v2295_v30 = vpop.xlane.xlu0 %2294 }
 0x4ab   : > { %v2597_v59 = vsub.f32 %v5972_v13, %v2575_v4  ;;  %v2316_v62 = vsub.f32 %v5970_v22, %v2295_v30 }
 0x4ad   : > { %v2622_v27 = vmul.f32 1.442695, %v2597_v59  ;;  %v2342_v7 = vmul.f32 1.442695, %v2316_v62  ;;  %v6076_v10 = vpop.eup %4202 }
 0x4ae   : > { %2584 = vmax.xlane.f32.xlu0 %v6054_v50  ;;  %2586 = vmax.xlane.f32.xlu1 %v6068_v17  ;;  %v6080_v25 = vpop.eup %4204 }
 0x4af   : > { %4206 = vpow2.f32 %v2622_v27  ;;  %2370 = vadd.xlane.f32.xlu2 %v6070_v57 }
 0x4b0   : > { %4208 = vpow2.f32 %v2342_v7 }
 0x4b2   : > { %v2577_v55 = vpop.xlane.xlu2 %2576  ;;  %v2297_v13 = vpop.xlane.xlu1 %2296 }
 0x4b3   : > { %v2598_v53 = vsub.f32 %v5978_v48, %v2577_v55  ;;  %v2317_v63 = vsub.f32 %v5976_v5, %v2297_v13 }
 0x4b5   : > { %v6082_v37 = vpop.eup %4206  ;;  %v2624_v22 = vmul.f32 1.442695, %v2598_v53  ;;  %v2344_v6 = vmul.f32 1.442695, %v2317_v63 }
 0x4b6   : > { %2372 = vadd.xlane.f32.xlu0 %v6080_v25  ;;  %2652 = vadd.xlane.f32.xlu1 %v6076_v10  ;;  %v6087_v47 = vpop.eup %4208 }
 0x4b7   : > { %4210 = vpow2.f32 %v2624_v22  ;;  %2654 = vadd.xlane.f32.xlu2 %v6082_v37 }
 0x4b8   : > { %4212 = vpow2.f32 %v2344_v6 }
 0x4bd   : > { %v6089_v48 = vpop.eup %4210 }
 0x4be   : > { %v6091_v5 = vpop.eup %4212  ;;  %2374 = vadd.xlane.f32.xlu0 %v6087_v47 }
 0x4bf   : > { %2376 = vadd.xlane.f32.xlu1 %v6091_v5  ;;  %2656 = vadd.xlane.f32.xlu2 %v6089_v48 }
 0x4d4   : > { %v2355_v26 = vpop.xlane.xlu0 %2354 }
 0x4d5   : > { %4214 = vrcp.f32 %v2355_v26 }
 0x4db   : > { %v4215_v58 = vpop.eup %4214 }
 0x4dc   : > { %v2357_v19 = vpop.xlane.xlu1 %2356  ;;  %v2402_v3 = vmul.f32 %v4215_v58, %v5982_v61 }
 0x4dd   : > { %4216 = vrcp.f32 %v2357_v19 }
 0x4e1   : > { %v2637_v18 = vpop.xlane.xlu2 %2636 }
 0x4e2   : > { %4218 = vrcp.f32 %v2637_v18 }
 0x4e3   : > { %v4217_v11 = vpop.eup %4216 }
 0x4e4   : > { %v2403_v0 = vmul.f32 %v4217_v11, %v5987_v34  ;;  %v2581_v24 = vpop.xlane.xlu1 %2580 }
 0x4e5   : > { %v2600_v4 = vsub.f32 %v5993_v38, %v2581_v24 }
 0x4e6   : > { %v2418_v41 = vpack.c.bf16 %v2403_v0, %v2402_v3 }
 0x4e8   : > { %2434 = vmatmul.bf16.vlgmr.msrb.gmra.mxu1 %v2418_v41  ;;  %v4219_v16 = vpop.eup %4218 }
 0x4e9   : > { %v2359_v45 = vpop.xlane.xlu2 %2358  ;;  %v2639_v29 = vpop.xlane.xlu0 %2638  ;;  %v2684_v42 = vmul.f32 %v4219_v16, %v5990_v56  ;;  %v2628_v56 = vmul.f32 1.442695, %v2600_v4 }
 0x4ea   : > { %4220 = vrcp.f32 %v2639_v29 }
 0x4f0   : > { %v4221_v8 = vpop.eup %4220 }
 0x4f1   : > { %v2579_v36 = vpop.xlane.xlu0 %2578  ;;  %v2685_v46 = vmul.f32 %v4221_v8, %v5999_v39  ;;  %v2641_v59 = vpop.xlane.xlu1 %2640 }
 0x4f2   : > { %v2599_v52 = vsub.f32 %v5985_v21, %v2579_v36  ;;  %v2299_v12 = vpop.xlane.xlu2 %2298 }
 0x4f3   : > { %v2318_v61 = vsub.f32 %v6008_v44, %v2299_v12  ;;  %v2700_v34 = vpack.c.bf16 %v2685_v46, %v2684_v42 }
 0x4f4   : > { %v2626_v14 = vmul.f32 1.442695, %v2599_v52 }
 0x4f5   : > { %v2346_v54 = vmul.f32 1.442695, %v2318_v61  ;;  %2716 = vmatmul.bf16.vlgmr.msrb.gmra.mxu3 %v2700_v34 }
 0x4f6   : > { %4222 = vpow2.f32 %v2626_v14 }
 0x4f7   : > { %4224 = vpow2.f32 %v2346_v54 }
 0x4f8   : > { %4226 = vrcp.f32 %v2359_v45 }
 0x4f9   : > { %4228 = vrcp.f32 %v2641_v59  ;;  %v2361_v30 = vpop.xlane.xlu0 %2360  ;;  %v2363_v7 = vpop.xlane.xlu1 %2362 }
 0x4fa   : > { %4230 = vrcp.f32 %v2361_v30  ;;  %v2643_v39 = vpop.xlane.xlu2 %2642 }
 0x4fb   : > { %4232 = vrcp.f32 %v2643_v39 }
 0x4fc   : > { %v6103_v27 = vpop.eup %4222  ;;  %4234 = vpow2.f32 %v2628_v56 }
 0x4fd   : > { %v6105_v21 = vpop.eup %4224  ;;  %2658 = vadd.xlane.f32.xlu0 %v6103_v27 }
 0x4fe   : > { %v4227_v44 = vpop.eup %4226  ;;  %2378 = vadd.xlane.f32.xlu1 %v6105_v21 }
 0x4ff   : > { %v4229_v38 = vpop.eup %4228  ;;  %v2404_v13 = vmul.f32 %v4227_v44, %v5997_v43 }
 0x500   : > { %v4231_v62 = vpop.eup %4230  ;;  %v2686_v58 = vmul.f32 %v4229_v38, %v6006_v28 }
 0x501   : > { %v2301_v55 = vpop.xlane.xlu0 %2300  ;;  %v2405_v53 = vmul.f32 %v4231_v62, %v6013_v49  ;;  %v4233_v63 = vpop.eup %4232 }
 0x502   : > { %v2583_v22 = vpop.xlane.xlu2 %2582  ;;  %v2319_v6 = vsub.f32 %v6024_v35, %v2301_v55  ;;  %v2687_v18 = vmul.f32 %v4233_v63, %v6017_v60  ;;  %v6115_v11 = vpop.eup %4234 }
 0x503   : > { %v2601_v26 = vsub.f32 %v6027_v1, %v2583_v22  ;;  %v2419_v19 = vpack.c.bf16 %v2405_v53, %v2404_v13 }
 0x504   : > { %v2348_v3 = vmul.f32 1.442695, %v2319_v6  ;;  %v2701_v41 = vpack.c.bf16 %v2687_v18, %v2686_v58  ;;  %v3885_v18 = vld [vmem:[#allocation11 + $0x70] sm:$0xf] }
 0x505   : > { %v2630_v0 = vmul.f32 1.442695, %v2601_v26  ;;  %2439 = vmatmul.bf16.gmra.mxu1 %v2419_v19  ;;  %2660 = vadd.xlane.f32.xlu0 %v6115_v11 }
 0x506   : > { %4236 = vpow2.f32 %v2348_v3  ;;  %2721 = vmatmul.bf16.gmra.mxu3 %v2701_v41  ;;  %v3877_v3 = vld [vmem:[#allocation11 + $0x60] sm:$0xf]  ;;  %v3821_v41 = vld [vmem:[#allocation11 + $0xf0] sm:$0xf] }
 0x507   : > { %4238 = vpow2.f32 %v2630_v0 }
 0x508   : > { %4240 = vrcp.f32 %v2363_v7 }
 0x509   : > { %v2647_v43 = vpop.xlane.xlu1 %2646  ;;  %v2645_v49 = vpop.xlane.xlu0 %2644 }
 0x50a   : > { %4242 = vrcp.f32 %v2647_v43  ;;  %v2365_v35 = vpop.xlane.xlu2 %2364 }
 0x50b   : > { %4244 = vrcp.f32 %v2365_v35  ;;  %v4004_v35 = vld [vmem:[#allocation11 + $0x54] sm:$0xf0] }
 0x50c   : > { %v6118_v28 = vpop.eup %4236  ;;  %4246 = vrcp.f32 %v2645_v49  ;;  %v3869_v49 = vld [vmem:[#allocation11 + $0x50] sm:$0xf] }
 0x50d   : > { %v6120_v60 = vpop.eup %4238  ;;  %2380 = vadd.xlane.f32.xlu2 %v6118_v28 }
 0x50e   : > { %2662 = vadd.xlane.f32.xlu1 %v6120_v60  ;;  %v4241_v1 = vpop.eup %4240 }
 0x50f   : > { %v2406_v52 = vmul.f32 %v4241_v1, %v6015_v31 }
 0x510   : > { %v4243_v45 = vpop.eup %4242 }
 0x511   : > { %v4245_v29 = vpop.eup %4244  ;;  %v2367_v24 = vpop.xlane.xlu0 %2366  ;;  %v2689_v8 = vmul.f32 %v4243_v45, %v6036_v2 }
 0x512   : > { %v2303_v16 = vpop.xlane.xlu1 %2302  ;;  %v4247_v36 = vpop.eup %4246  ;;  %v2407_v12 = vmul.f32 %v4245_v29, %v6038_v32 }
 0x513   : > { %v2320_v42 = vsub.f32 %v6034_v15, %v2303_v16  ;;  %v2305_v46 = vpop.xlane.xlu2 %2304  ;;  %v2688_v34 = vmul.f32 %v4247_v36, %v6032_v51  ;;  %v4002_v36 = vld [vmem:[#allocation11 + $0x44] sm:$0xf0] }
 0x514   : > { %v2321_v61 = vsub.f32 %v6048_v20, %v2305_v46  ;;  %v2420_v54 = vpack.c.bf16 %v2407_v12, %v2406_v52 }
 0x515   : > { %v2350_v14 = vmul.f32 1.442695, %v2320_v42  ;;  %v2702_v59 = vpack.c.bf16 %v2689_v8, %v2688_v34  ;;  %v3861_v8 = vld [vmem:[#allocation11 + $0x40] sm:$0xf] }
 0x516   : > { %v2352_v4 = vmul.f32 1.442695, %v2321_v61  ;;  %2444 = vmatmul.bf16.gmra.mxu1 %v2420_v54  ;;  %v3862_v61 = vor.u32 %v4002_v36, %v3861_v8  ;;  %v3853_v54 = vld [vmem:[#allocation11 + $0x30] sm:$0xf] }
 0x517   : > { %4248 = vpow2.f32 %v2350_v14  ;;  %2726 = vmatmul.bf16.gmra.mxu3 %v2702_v59 }
 0x518   : > { %4250 = vpow2.f32 %v2352_v4  ;;  %v4000_v4 = vld [vmem:[#allocation11 + $0x34] sm:$0xf0] }
 0x519   : > { %4252 = vrcp.f32 %v2367_v24  ;;  %v2651_v2 = vpop.xlane.xlu0 %2650  ;;  %v3870_v24 = vor.u32 %v4004_v35, %v3869_v49  ;;  %v3765_v49 = vld [vmem:[#allocation11 + $0x80] sm:$0xf]  ;;  %v4010_v35 = vld [vmem:[#allocation11 + $0x84] sm:$0xf0] }
 0x51a   : > { %v2369_v15 = vpop.xlane.xlu1 %2368  ;;  %4254 = vrcp.f32 %v2651_v2 }
 0x51b   : > { %v2649_v30 = vpop.xlane.xlu2 %2648  ;;  %4256 = vrcp.f32 %v2369_v15 }
 0x51c   : > { %4258 = vrcp.f32 %v2649_v30 }
 0x51d   : > { %v6130_v31 = vpop.eup %4248 }
 0x51e   : > { %v6132_v32 = vpop.eup %4250  ;;  %2382 = vadd.xlane.f32.xlu2 %v6130_v31 }
 0x51f   : > { %2384 = vadd.xlane.f32.xlu0 %v6132_v32  ;;  %v4253_v51 = vpop.eup %4252 }
 0x520   : > { %v4255_v20 = vpop.eup %4254  ;;  %v2408_v53 = vmul.f32 %v4253_v51, %v6046_v33 }
 0x521   : > { %v4257_v56 = vpop.eup %4256  ;;  %v2585_v39 = vpop.xlane.xlu0 %2584  ;;  %v2691_v38 = vmul.f32 %v4255_v20, %v6058_v40  ;;  %v4008_v40 = vld [vmem:[#allocation11 + $0x74] sm:$0xf0]  ;;  %v3854_v20 = vor.u32 %v4000_v4, %v3853_v54  ;;  %v4021_v54 = vld [vmem:[#allocation11 + $0xe4] sm:$0xf]  ;;  %v3815_v4 = vld [vmem:[#allocation11 + $0xe8] sm:$0xf0] }
 0x522   : > { %v2587_v44 = vpop.xlane.xlu1 %2586  ;;  %v4259_v62 = vpop.eup %4258  ;;  %v2602_v7 = vsub.f32 %v6054_v50, %v2585_v39  ;;  %v2409_v63 = vmul.f32 %v4257_v56, %v6056_v9  ;;  %v3886_v50 = vor.u32 %v4008_v40, %v3885_v18  ;;  %v4018_v18 = vld [vmem:[#allocation11 + $0xc4] sm:$0xf0] }
 0x523   : > { %v2603_v55 = vsub.f32 %v6068_v17, %v2587_v44  ;;  %v2371_v13 = vpop.xlane.xlu2 %2370  ;;  %v2690_v22 = vmul.f32 %v4259_v62, %v6061_v23  ;;  %v4006_v17 = vld [vmem:[#allocation11 + $0x64] sm:$0xf0]  ;;  %v4024_v23 = vld [vmem:[#allocation11 + $0xf4] sm:$0xf0]  ;;  %v3845_v44 = vld [vmem:[#allocation11 + $0x20] sm:$0xf] }
 0x524   : > { %v2632_v6 = vmul.f32 1.442695, %v2602_v7  ;;  %v2421_v19 = vpack.c.bf16 %v2409_v63, %v2408_v53  ;;  %3023 = vmatpush.bf16.msra.mxu2 %v3886_v50  ;;  %v3878_v9 = vor.u32 %v4006_v17, %v3877_v3  ;;  %v3822_v1 = vor.u32 %v4024_v23, %v3821_v41  ;;  %v3813_v62 = vld [vmem:[#allocation11 + $0xe0] sm:$0xf]  ;;  %v4022_v7 = vld [vmem:[#allocation11 + $0xe4] sm:$0xf0] }
 0x525   : > { %v2634_v26 = vmul.f32 1.442695, %v2603_v55  ;;  %v2703_v58 = vpack.c.bf16 %v2691_v38, %v2690_v22  ;;  %v3998_v38 = vld [vmem:[#allocation11 + $0x24] sm:$0xf0]  ;;  %v3837_v55 = vld [vmem:[#allocation11 + $0x10] sm:$0xf]  ;;  %v3814_v53 = vor.u32 %v4022_v7, %v3813_v62 }
 0x526   : > { %4260 = vpow2.f32 %v2632_v6  ;;  %2449 = vmatmul.bf16.gmra.mxu1 %v2421_v19  ;;  %2845 = vmatpush.bf16.msra.mxu0 %v3822_v1  ;;  %v3805_v63 = vld [vmem:[#allocation11 + $0xd0] sm:$0xf]  ;;  %v4020_v22 = vld [vmem:[#allocation11 + $0xd4] sm:$0xf0]  ;;  %v3766_v1 = vor.u32 %v4010_v35, %v3765_v49  ;;  %v4009_v35 = vld [vmem:[#allocation11 + $0x84] sm:$0xf] }
 0x527   : > { %4262 = vpow2.f32 %v2634_v26  ;;  %2731 = vmatmul.bf16.gmra.mxu3 %v2703_v58  ;;  %v3806_v26 = vor.u32 %v4020_v22, %v3805_v63  ;;  %v3797_v58 = vld [vmem:[#allocation11 + $0xc0] sm:$0xf]  ;;  %v3789_v3 = vld [vmem:[#allocation11 + $0xb0] sm:$0xf]  ;;  %v4016_v50 = vld [vmem:[#allocation11 + $0xb4] sm:$0xf0] }
 0x528   : > { %4264 = vrcp.f32 %v2371_v13  ;;  %3024 = vmatpush.bf16.msra.mxu2 %v3878_v9  ;;  %v3996_v13 = vld [vmem:[#allocation11 + $0x14] sm:$0xf0]  ;;  %v3798_v40 = vor.u32 %v4018_v18, %v3797_v58  ;;  %v3790_v17 = vor.u32 %v4016_v50, %v3789_v3  ;;  %v3773_v41 = vld [vmem:[#allocation11 + $0x90] sm:$0xf]  ;;  %v4011_v18 = vld [vmem:[#allocation11 + $0x94] sm:$0xf] }
 0x529   : > { %v2373_v0 = vpop.xlane.xlu0 %2372  ;;  %v3838_v6 = vor.u32 %v3996_v13, %v3837_v55  ;;  %v4012_v23 = vld [vmem:[#allocation11 + $0x94] sm:$0xf0]  ;;  %v4015_v13 = vld [vmem:[#allocation11 + $0xb4] sm:$0xf] }
 0x52a   : > { %v2653_v33 = vpop.xlane.xlu1 %2652  ;;  %4266 = vrcp.f32 %v2373_v0  ;;  %2846 = vmatpush.bf16.msra.mxu0 %v3814_v53  ;;  %v3781_v0 = vld [vmem:[#allocation11 + $0xa0] sm:$0xf]  ;;  %v3791_v53 = vld [vmem:[#allocation11 + $0xb8] sm:$0xf0]  ;;  %v4003_v3 = vld [vmem:[#allocation11 + $0x54] sm:$0xf] }
 0x52b   : > { %v2655_v43 = vpop.xlane.xlu2 %2654  ;;  %4268 = vrcp.f32 %v2653_v33  ;;  %v4014_v33 = vld [vmem:[#allocation11 + $0xa4] sm:$0xf0]  ;;  %v3794_v22 = vor.u32 %v4015_v13, %v3791_v53 }
 0x52c   : > { %v6142_v45 = vpop.eup %4260  ;;  %4270 = vrcp.f32 %v2655_v43  ;;  %3025 = vmatpush.bf16.msra.mxu2 %v3870_v24  ;;  %v3782_v9 = vor.u32 %v4014_v33, %v3781_v0  ;;  %v3774_v43 = vor.u32 %v4012_v23, %v3773_v41  ;;  %v4007_v24 = vld [vmem:[#allocation11 + $0x74] sm:$0xf]  ;;  %v3871_v0 = vld [vmem:[#allocation11 + $0x58] sm:$0xf0] }
 0x52d   : > { %v6144_v29 = vpop.eup %4262  ;;  %2664 = vadd.xlane.f32.xlu1 %v6142_v45 }
 0x52e   : > { %v4265_v16 = vpop.eup %4264  ;;  %2666 = vadd.xlane.f32.xlu2 %v6144_v29  ;;  %2847 = vmatpush.bf16.msra.mxu0 %v3806_v26  ;;  %v3783_v26 = vld [vmem:[#allocation11 + $0xa8] sm:$0xf0] }
 0x52f   : > { %v2410_v52 = vmul.f32 %v4265_v16, %v6070_v57  ;;  %v3887_v16 = vld [vmem:[#allocation11 + $0x78] sm:$0xf0] }
 0x530   : > { %v4267_v42 = vpop.eup %4266  ;;  %3026 = vmatpush.bf16.msra.mxu2 %v3862_v61  ;;  %v3890_v36 = vor.u32 %v4007_v24, %v3887_v16  ;;  %v4001_v24 = vld [vmem:[#allocation11 + $0x44] sm:$0xf] }
 0x531   : > { %v4269_v46 = vpop.eup %4268  ;;  %v2411_v12 = vmul.f32 %v4267_v42, %v6080_v25  ;;  %v2375_v59 = vpop.xlane.xlu0 %2374  ;;  %v4023_v42 = vld [vmem:[#allocation11 + $0xf4] sm:$0xf] }
 0x532   : > { %v4271_v34 = vpop.eup %4270  ;;  %v2692_v14 = vmul.f32 %v4269_v46, %v6076_v10  ;;  %v2377_v30 = vpop.xlane.xlu1 %2376  ;;  %4272 = vrcp.f32 %v2375_v59  ;;  %2848 = vmatpush.bf16.msra.mxu0 %v3798_v40  ;;  %3072 = vmatpush.bf16.msra.mxu3 %v3890_v36  ;;  %v3823_v46 = vld [vmem:[#allocation11 + $0xf8] sm:$0xf0]  ;;  %v3818_v59 = vor.u32 %v4021_v54, %v3815_v4 }
 0x533   : > { %v2422_v2 = vpack.c.bf16 %v2411_v12, %v2410_v52  ;;  %v2693_v15 = vmul.f32 %v4271_v34, %v6082_v37  ;;  %4274 = vrcp.f32 %v2377_v30  ;;  %v3846_v37 = vor.u32 %v3998_v38, %v3845_v44  ;;  %v2657_v52 = vpop.xlane.xlu2 %2656  ;;  %v4017_v44 = vld [vmem:[#allocation11 + $0xc4] sm:$0xf]  ;;  %v3799_v38 = vld [vmem:[#allocation11 + $0xc8] sm:$0xf0]  ;;  %v3775_v40 = vld [vmem:[#allocation11 + $0x98] sm:$0xf0] }
 0x534   : > { %3027 = vmatpush.bf16.msra.mxu2 %v3854_v20  ;;  %v3826_v12 = vor.u32 %v4023_v42, %v3823_v46  ;;  %4276 = vrcp.f32 %v2657_v52  ;;  %v4005_v20 = vld [vmem:[#allocation11 + $0x64] sm:$0xf]  ;;  %v3802_v7 = vor.u32 %v4017_v44, %v3799_v38  ;;  %v3863_v42 = vld [vmem:[#allocation11 + $0x48] sm:$0xf0] }
 0x535   : > { %v2704_v51 = vpack.c.bf16 %v2693_v15, %v2692_v14  ;;  %v3807_v15 = vld [vmem:[#allocation11 + $0xd8] sm:$0xf0]  ;;  %v3993_v38 = vld [vmem:[#allocation11 + $0x4] sm:$0xf] }
 0x536   : > { %2454 = vmatmul.bf16.gmra.mxu1 %v2422_v2  ;;  %2849 = vmatpush.bf16.msra.mxu0 %v3790_v17  ;;  %v4019_v2 = vld [vmem:[#allocation11 + $0xd4] sm:$0xf]  ;;  %v3778_v17 = vor.u32 %v4011_v18, %v3775_v40 }
 0x537   : > { %2736 = vmatmul.bf16.gmra.mxu3 %v2704_v51  ;;  %2894 = vmatpush.bf16.msra.mxu1 %v3826_v12  ;;  %v3810_v51 = vor.u32 %v4019_v2, %v3807_v15 }
 0x538   : > { %v4273_v57 = vpop.eup %4272  ;;  %3028 = vmatpush.bf16.msra.mxu2 %v3846_v37 }
 0x539   : > { %v4275_v25 = vpop.eup %4274  ;;  %v2412_v56 = vmul.f32 %v4273_v57, %v6087_v47  ;;  %v3829_v47 = vld [vmem:[#allocation11] sm:$0xf]  ;;  %v3879_v57 = vld [vmem:[#allocation11 + $0x68] sm:$0xf0] }
 0x53a   : > { %v2413_v10 = vmul.f32 %v4275_v25, %v6091_v5  ;;  %v3994_v5 = vld [vmem:[#allocation11 + $0x4] sm:$0xf0]  ;;  %2850 = vmatpush.bf16.msra.mxu0 %v3782_v9  ;;  %v4277_v30 = vpop.eup %4276  ;;  %v3882_v25 = vor.u32 %v4005_v20, %v3879_v57  ;;  %v3874_v9 = vor.u32 %v4003_v3, %v3871_v0  ;;  %v3995_v57 = vld [vmem:[#allocation11 + $0x14] sm:$0xf] }
 0x53b   : > { %v3830_v19 = vor.u32 %v3994_v5, %v3829_v47  ;;  %2895 = vmatpush.bf16.msra.mxu1 %v3818_v59  ;;  %v3847_v59 = vld [vmem:[#allocation11 + $0x28] sm:$0xf0] }
 0x53c   : > { %v2423_v39 = vpack.c.bf16 %v2413_v10, %v2412_v56  ;;  %3029 = vmatpush.bf16.msra.mxu2 %v3838_v6  ;;  %v2694_v10 = vmul.f32 %v4277_v30, %v6089_v48  ;;  %3073 = vmatpush.bf16.msra.mxu3 %v3882_v25  ;;  %v4013_v48 = vld [vmem:[#allocation11 + $0xa4] sm:$0xf]  ;;  %v3839_v25 = vld [vmem:[#allocation11 + $0x18] sm:$0xf0] }
 0x53d   : > { %v3786_v5 = vor.u32 %v4013_v48, %v3783_v26 }
 0x53e   : > { %2851 = vmatpush.bf16.msra.mxu0 %v3774_v43 }
 0x53f   : > { %2896 = vmatpush.bf16.msra.mxu1 %v3810_v51 }
 0x540   : > { %3030 = vmatpush.bf16.msra.mxu2 %v3830_v19  ;;  %3074 = vmatpush.bf16.msra.mxu3 %v3874_v9 }
 0x542   : > { %2852 = vmatpush.bf16.msra.mxu0 %v3766_v1  ;;  %v3767_v1 = vld [vmem:[#allocation11 + $0x88] sm:$0xf0] }
 0x543   : > { %2897 = vmatpush.bf16.msra.mxu1 %v3802_v7  ;;  %v3770_v36 = vor.u32 %v4009_v35, %v3767_v1 }
 0x546   : > { %2459 = vmatmul.bf16.gmra.mxu1 %v2423_v39 }
 0x547   : > { %2898 = vmatpush.bf16.msra.mxu1 %v3794_v22 }
 0x54b   : > { %2899 = vmatpush.bf16.msra.mxu1 %v3786_v5 }
 0x54f   : > { %2900 = vmatpush.bf16.msra.mxu1 %v3778_v17 }
 0x553   : > { %2901 = vmatpush.bf16.msra.mxu1 %v3770_v36  ;;  %v6544_v36 = vld [vmem:[#allocation19_spill] sm:$0xff] }
 0x565   : > { %v2435_v8 = vpop.f32.mrf.mxu1 }
 0x56d   : > { %v2437_v61 = vpop.f32.mrf.mxu1 }
 0x56e   : > { %v6154_v34 = vpack.c.bf16 %v2437_v61, %v2435_v8  ;;  %v3866_v61 = vor.u32 %v4001_v24, %v3863_v42 }
 0x570   : > { %v2659_v14 = vpop.xlane.xlu0 %2658  ;;  %3031 = vmatmul.bf16.vlgmr.msra.gmra.mxu2 %v6154_v34  ;;  %3075 = vmatpush.bf16.msra.mxu3 %v3866_v61 }
 0x571   : > { %4278 = vrcp.f32 %v2659_v14  ;;  %v2379_v62 = vpop.xlane.xlu1 %2378 }
 0x572   : > { %4280 = vrcp.f32 %v2379_v62  ;;  %v3831_v62 = vld [vmem:[#allocation11 + $0x8] sm:$0xf0] }
 0x573   : > { %v3834_v7 = vor.u32 %v3993_v38, %v3831_v62 }
 0x577   : > { %v4279_v56 = vpop.eup %4278 }
 0x578   : > { %v2695_v39 = vmul.f32 %v4279_v56, %v6103_v27  ;;  %v2717_v37 = vpop.f32.mrf.mxu3  ;;  %v2661_v63 = vpop.xlane.xlu0 %2660  ;;  %v3842_v56 = vor.u32 %v3995_v57, %v3839_v25 }
 0x579   : > { %4282 = vrcp.f32 %v2661_v63  ;;  %v4281_v50 = vpop.eup %4280 }
 0x57a   : > { %v2705_v55 = vpack.c.bf16 %v2695_v39, %v2694_v10  ;;  %v2414_v43 = vmul.f32 %v4281_v50, %v6105_v21  ;;  %v3999_v21 = vld [vmem:[#allocation11 + $0x34] sm:$0xf] }
 0x57c   : > { %2741 = vmatmul.bf16.gmra.mxu3 %v2705_v55 }
 0x57f   : > { %v4283_v33 = vpop.eup %4282 }
 0x580   : > { %v2381_v6 = vpop.xlane.xlu2 %2380  ;;  %v2719_v27 = vpop.f32.mrf.mxu3  ;;  %v2696_v16 = vmul.f32 %v4283_v33, %v6115_v11 }
 0x581   : > { %v2663_v47 = vpop.xlane.xlu1 %2662  ;;  %4284 = vrcp.f32 %v2381_v6  ;;  %v6159_v19 = vpack.c.bf16 %v2719_v27, %v2717_v37 }
 0x582   : > { %4286 = vrcp.f32 %v2663_v47  ;;  %v2440_v58 = vpop.f32.mrf.mxu1 }
 0x583   : > { %2853 = vmatmul.bf16.vlgmr.msra.gmra.mxu0 %v6159_v19 }
 0x587   : > { %v4285_v41 = vpop.eup %4284 }
 0x588   : > { %v4287_v23 = vpop.eup %4286  ;;  %v2415_v49 = vmul.f32 %v4285_v41, %v6118_v28  ;;  %v3855_v28 = vld [vmem:[#allocation11 + $0x38] sm:$0xf0] }
 0x589   : > { %v2697_v8 = vmul.f32 %v4287_v23, %v6120_v60  ;;  %v2722_v46 = vpop.f32.mrf.mxu3  ;;  %v3858_v11 = vor.u32 %v3999_v21, %v3855_v28  ;;  %v3997_v60 = vld [vmem:[#allocation11 + $0x24] sm:$0xf]  ;;  %v6545_v28 = vld [vmem:[#allocation21_spill] sm:$0xff] }
 0x58a   : > { %v2442_v52 = vpop.f32.mrf.mxu1  ;;  %v2424_v12 = vpack.c.bf16 %v2415_v49, %v2414_v43  ;;  %v3850_v15 = vor.u32 %v3997_v60, %v3847_v59 }
 0x58b   : > { %v6166_v14 = vpack.c.bf16 %v2442_v52, %v2440_v58  ;;  %v2706_v54 = vpack.c.bf16 %v2697_v8, %v2696_v16  ;;  %3076 = vmatpush.bf16.msra.mxu3 %v3858_v11 }
 0x58c   : > { %2464 = vmatmul.bf16.gmra.mxu1 %v2424_v12 }
 0x58d   : > { %2746 = vmatmul.bf16.gmra.mxu3 %v2706_v54  ;;  %3036 = vmatmul.bf16.gmra.mxu2 %v6166_v14 }
 0x58f   : > { %3077 = vmatpush.bf16.msra.mxu3 %v3850_v15 }
 0x591   : > { %v2383_v4 = vpop.xlane.xlu2 %2382  ;;  %v2724_v30 = vpop.f32.mrf.mxu3 }
 0x592   : > { %v2385_v2 = vpop.xlane.xlu0 %2384  ;;  %4288 = vrcp.f32 %v2383_v4  ;;  %v2758_v51 = vpack.c.bf16 %v2724_v30, %v2722_v46 }
 0x593   : > { %4290 = vrcp.f32 %v2385_v2  ;;  %v2445_v20 = vpop.f32.mrf.mxu1  ;;  %3078 = vmatpush.bf16.msra.mxu3 %v3842_v56 }
 0x594   : > { %2858 = vmatmul.bf16.gmra.mxu0 %v2758_v51 }
 0x597   : > { %3079 = vmatpush.bf16.msra.mxu3 %v3834_v7 }
 0x598   : > { %v4289_v10 = vpop.eup %4288 }
 0x599   : > { %v4291_v39 = vpop.eup %4290  ;;  %v2416_v44 = vmul.f32 %v4289_v10, %v6130_v31 }
 0x59a   : > { %v2417_v37 = vmul.f32 %v4291_v39, %v6132_v32  ;;  %v2727_v55 = vpop.f32.mrf.mxu3 }
 0x59b   : > { %v2447_v13 = vpop.f32.mrf.mxu1 }
 0x59c   : > { %v2425_v53 = vpack.c.bf16 %v2417_v37, %v2416_v44  ;;  %v2477_v63 = vpack.c.bf16 %v2447_v13, %v2445_v20  ;;  %v6546_v20 = vld [vmem:[#allocation23_spill] sm:$0xff]  ;;  %v6547_v37 = vld [vmem:[#allocation25_spill] sm:$0xff] }
 0x59e   : > { %2469 = vmatmul.bf16.gmra.mxu1 %v2425_v53  ;;  %3041 = vmatmul.bf16.gmra.mxu2 %v2477_v63 }
 0x5a0   : > { %v2665_v22 = vpop.xlane.xlu1 %2664 }
 0x5a1   : > { %4292 = vrcp.f32 %v2665_v22  ;;  %v2667_v6 = vpop.xlane.xlu2 %2666 }
 0x5a2   : > { %v2729_v48 = vpop.f32.mrf.mxu3  ;;  %4294 = vrcp.f32 %v2667_v6 }
 0x5a3   : > { %v2759_v26 = vpack.c.bf16 %v2729_v48, %v2727_v55  ;;  %v2450_v31 = vpop.f32.mrf.mxu1  ;;  %v6548_v48 = vld [vmem:[#allocation29_spill] sm:$0xff] }
 0x5a5   : > { %2863 = vmatmul.bf16.gmra.mxu0 %v2759_v26 }
 0x5a7   : > { %v4293_v27 = vpop.eup %4292 }
 0x5a8   : > { %v4295_v47 = vpop.eup %4294  ;;  %v2698_v32 = vmul.f32 %v4293_v27, %v6142_v45 }
 0x5a9   : > { %v2699_v5 = vmul.f32 %v4295_v47, %v6144_v29 }
 0x5aa   : > { %v2732_v58 = vpop.f32.mrf.mxu3 }
 0x5ab   : > { %v2452_v18 = vpop.f32.mrf.mxu1  ;;  %v2707_v40 = vpack.c.bf16 %v2699_v5, %v2698_v32 }
 0x5ac   : > { %v2478_v3 = vpack.c.bf16 %v2452_v18, %v2450_v31 }
 0x5ad   : > { %2751 = vmatmul.bf16.gmra.mxu3 %v2707_v40 }
 0x5ae   : > { %2902 = vmatmul.bf16.vlgmr.msra.gmra.mxu1 %v6159_v19  ;;  %3046 = vmatmul.bf16.gmra.mxu2 %v2478_v3 }
 0x5b2   : > { %v2734_v50 = vpop.f32.mrf.mxu3 }
 0x5b3   : > { %v2760_v17 = vpack.c.bf16 %v2734_v50, %v2732_v58  ;;  %v2455_v0 = vpop.f32.mrf.mxu1  ;;  %v6549_v58 = vld [vmem:[#allocation27_spill] sm:$0xff] }
 0x5b5   : > { %2868 = vmatmul.bf16.gmra.mxu0 %v2760_v17 }
 0x5ba   : > { %v2737_v33 = vpop.f32.mrf.mxu3 }
 0x5bb   : > { %v2457_v9 = vpop.f32.mrf.mxu1 }
 0x5bc   : > { %v2479_v41 = vpack.c.bf16 %v2457_v9, %v2455_v0  ;;  %v6550_v9 = vld [vmem:[#allocation33_spill] sm:$0xff] }
 0x5bd   : > { %3080 = vmatmul.bf16.vlgmr.msra.gmra.mxu3 %v6154_v34  ;;  %v6179_v34 = vld [vmem:[%s6327_s6] sm:$0x3] }
 0x5be   : > { %2907 = vmatmul.bf16.gmra.mxu1 %v2758_v51  ;;  %3051 = vmatmul.bf16.gmra.mxu2 %v2479_v41  ;;  %v6182_v1 = vperm.slane %v6179_v34, 0 }
 0x5c2   : > { %v2739_v45 = vpop.f32.mrf.mxu3 }
 0x5c3   : > { %v2761_v29 = vpack.c.bf16 %v2739_v45, %v2737_v33  ;;  %v2460_v23 = vpop.f32.mrf.mxu1 }
 0x5c5   : > { %2873 = vmatmul.bf16.gmra.mxu0 %v2761_v29 }
 0x5cb   : > { %v2462_v43 = vpop.f32.mrf.mxu1 }
 0x5cc   : > { %v2480_v49 = vpack.c.bf16 %v2462_v43, %v2460_v23 }
 0x5cd   : > { %3085 = vmatmul.bf16.gmra.mxu3 %v6166_v14 }
 0x5ce   : > { %2912 = vmatmul.bf16.gmra.mxu1 %v2759_v26  ;;  %3056 = vmatmul.bf16.gmra.mxu2 %v2480_v49 }
 0x5dd   : > { %3090 = vmatmul.bf16.gmra.mxu3 %v2477_v63 }
 0x5de   : > { %2917 = vmatmul.bf16.gmra.mxu1 %v2760_v17 }
 0x5ed   : > { %3095 = vmatmul.bf16.gmra.mxu3 %v2478_v3 }
 0x5ee   : > { %2922 = vmatmul.bf16.gmra.mxu1 %v2761_v29 }
 0x5f3   : > { %v3032_v19 = vpop.f32.mrf.mxu2 }
 0x5fb   : > { %v3034_v52 = vpop.f32.mrf.mxu2 }
 0x5fd   : > { %3100 = vmatmul.bf16.gmra.mxu3 %v2479_v41 }
 0x5ff   : > { %v2742_v35 = vpop.f32.mrf.mxu3 }
 0x600   : > { %v2854_v24 = vpop.f32.mrf.mxu0 }
 0x601   : > { %v3033_v16 = vadd.f32 %v3032_v19, %v2854_v24  ;;  %v6551_v24 = vld [vmem:[#allocation31_spill] sm:$0xff] }
 0x603   : > { %v3127_v8 = vadd.f32 %v6182_v1, %v3033_v16 }
 0x605   : > { %v3159_v42 = vadd.f32 %v3127_v8, %v6544_v36  ;;  %v6212_v8 = vperm.slane %v6179_v34, 1 }
 0x607   : > { %v2744_v46 = vpop.f32.mrf.mxu3  ;;  %3191 = vst [vmem:[%s6188_s21] sm:$0xff] %v3159_v42 }
 0x608   : > { %v2762_v12 = vpack.c.bf16 %v2744_v46, %v2742_v35  ;;  %v2856_v61 = vpop.f32.mrf.mxu0 }
 0x609   : > { %v2465_v14 = vpop.f32.mrf.mxu1  ;;  %v3035_v54 = vadd.f32 %v3034_v52, %v2856_v61 }
 0x60a   : > { %2878 = vmatmul.bf16.gmra.mxu0 %v2762_v12  ;;  %2927 = vmatmul.bf16.gmra.mxu1 %v2762_v12 }
 0x60b   : > { %v3129_v21 = vadd.f32 %v6182_v1, %v3035_v54 }
 0x60d   : > { %3105 = vmatmul.bf16.gmra.mxu3 %v2480_v49  ;;  %v3161_v11 = vadd.f32 %v3129_v21, %v6545_v28  ;;  %v6553_v28 = vld [vmem:[#allocation35_spill] sm:$0xff] }
 0x60f   : > { %3193 = vst [vmem:[%s6188_s21 + $0x10] sm:$0xff] %v3161_v11 }
 0x610   : > { %v2747_v4 = vpop.f32.mrf.mxu3  ;;  %v3037_v60 = vpop.f32.mrf.mxu2 }
 0x611   : > { %v2467_v59 = vpop.f32.mrf.mxu1  ;;  %v2859_v2 = vpop.f32.mrf.mxu0 }
 0x612   : > { %v2481_v15 = vpack.c.bf16 %v2467_v59, %v2465_v14  ;;  %v3038_v30 = vadd.f32 %v3037_v60, %v2859_v2  ;;  %v6552_v14 = vld [vmem:[#allocation20_spill] sm:$0xff] }
 0x614   : > { %3061 = vmatmul.bf16.gmra.mxu2 %v2481_v15  ;;  %v3131_v51 = vadd.f32 %v6182_v1, %v3038_v30 }
 0x616   : > { %v3163_v57 = vadd.f32 %v3131_v51, %v6546_v20  ;;  %v6554_v51 = vld [vmem:[#allocation22_spill] sm:$0xff] }
 0x618   : > { %v2749_v25 = vpop.f32.mrf.mxu3  ;;  %v3039_v56 = vpop.f32.mrf.mxu2  ;;  %3195 = vst [vmem:[%s6188_s21 + $0x20] sm:$0xff] %v3163_v57 }
 0x619   : > { %v2763_v10 = vpack.c.bf16 %v2749_v25, %v2747_v4  ;;  %v2861_v39 = vpop.f32.mrf.mxu0  ;;  %v6555_v25 = vld [vmem:[#allocation37_spill] sm:$0xff] }
 0x61a   : > { %v3040_v38 = vadd.f32 %v3039_v56, %v2861_v39 }
 0x61b   : > { %v2470_v44 = vpop.f32.mrf.mxu1  ;;  %2883 = vmatmul.bf16.gmra.mxu0 %v2763_v10  ;;  %2932 = vmatmul.bf16.gmra.mxu1 %v2763_v10 }
 0x61c   : > { %v3133_v62 = vadd.f32 %v6182_v1, %v3040_v38 }
 0x61d   : > { %3110 = vmatmul.bf16.gmra.mxu3 %v2481_v15 }
 0x61e   : > { %v3165_v7 = vadd.f32 %v3133_v62, %v6547_v37  ;;  %v6556_v62 = vld [vmem:[#allocation24_spill] sm:$0xff] }
 0x620   : > { %3197 = vst [vmem:[%s6188_s21 + $0x30] sm:$0xff] %v3165_v7 }
 0x621   : > { %v3042_v55 = vpop.f32.mrf.mxu2 }
 0x622   : > { %v2864_v13 = vpop.f32.mrf.mxu0 }
 0x623   : > { %v2472_v53 = vpop.f32.mrf.mxu1  ;;  %v3043_v63 = vadd.f32 %v3042_v55, %v2864_v13 }
 0x624   : > { %v2482_v22 = vpack.c.bf16 %v2472_v53, %v2470_v44 }
 0x625   : > { %v3135_v6 = vadd.f32 %v6182_v1, %v3043_v63  ;;  %v6557_v63 = vld [vmem:[#allocation26_spill] sm:$0xff] }
 0x626   : > { %3066 = vmatmul.bf16.gmra.mxu2 %v2482_v22 }
 0x627   : > { %v3167_v26 = vadd.f32 %v3135_v6, %v6548_v48 }
 0x629   : > { %3199 = vst [vmem:[%s6188_s21 + $0x40] sm:$0xff] %v3167_v26  ;;  %v3044_v31 = vpop.f32.mrf.mxu2 }
 0x62a   : > { %v2866_v27 = vpop.f32.mrf.mxu0 }
 0x62b   : > { %v2903_v47 = vpop.f32.mrf.mxu1  ;;  %v3045_v32 = vadd.f32 %v3044_v31, %v2866_v27  ;;  %v6558_v27 = vld [vmem:[#allocation30_spill] sm:$0xff] }
 0x62d   : > { %v3137_v5 = vadd.f32 %v6182_v1, %v3045_v32  ;;  %3115 = vmatmul.bf16.gmra.mxu3 %v2482_v22 }
 0x62f   : > { %v3169_v18 = vadd.f32 %v3137_v5, %v6549_v58 }
 0x630   : > { %v2752_v40 = vpop.f32.mrf.mxu3 }
 0x631   : > { %3201 = vst [vmem:[%s6188_s21 + $0x50] sm:$0xff] %v3169_v18  ;;  %v3047_v3 = vpop.f32.mrf.mxu2  ;;  %v6559_v18 = vld [vmem:[#allocation28_spill] sm:$0xff] }
 0x632   : > { %v2869_v50 = vpop.f32.mrf.mxu0 }
 0x633   : > { %v3048_v17 = vadd.f32 %v3047_v3, %v2869_v50  ;;  %v2905_v0 = vpop.f32.mrf.mxu1 }
 0x635   : > { %v3139_v33 = vadd.f32 %v6182_v1, %v3048_v17 }
 0x637   : > { %v3171_v41 = vadd.f32 %v3139_v33, %v6550_v9  ;;  %v6560_v33 = vld [vmem:[#allocation34_spill] sm:$0xff] }
 0x638   : > { %v2754_v45 = vpop.f32.mrf.mxu3 }
 0x639   : > { %3203 = vst [vmem:[%s6188_s21 + $0x60] sm:$0xff] %v3171_v41  ;;  %v2764_v29 = vpack.c.bf16 %v2754_v45, %v2752_v40  ;;  %v3049_v23 = vpop.f32.mrf.mxu2 }
 0x63a   : > { %v2871_v43 = vpop.f32.mrf.mxu0 }
 0x63b   : > { %v3050_v49 = vadd.f32 %v3049_v23, %v2871_v43  ;;  %2888 = vmatmul.bf16.gmra.mxu0 %v2764_v29  ;;  %2937 = vmatmul.bf16.gmra.mxu1 %v2764_v29  ;;  %v2908_v35 = vpop.f32.mrf.mxu1  ;;  %v6561_v43 = vld [vmem:[#allocation32_spill] sm:$0xff] }
 0x63d   : > { %v3141_v19 = vadd.f32 %v6182_v1, %v3050_v49 }
 0x63f   : > { %v3173_v16 = vadd.f32 %v3141_v19, %v6551_v24 }
 0x640   : > { %v3081_v36 = vpop.f32.mrf.mxu3 }
 0x641   : > { %3205 = vst [vmem:[%s6188_s21 + $0x70] sm:$0xff] %v3173_v16  ;;  %v3082_v42 = vadd.f32 %v3081_v36, %v2903_v47  ;;  %v3052_v46 = vpop.f32.mrf.mxu2 }
 0x642   : > { %v2874_v52 = vpop.f32.mrf.mxu0 }
 0x643   : > { %v3128_v12 = vadd.f32 %v6212_v8, %v3082_v42  ;;  %v3053_v61 = vadd.f32 %v3052_v46, %v2874_v52  ;;  %v2910_v4 = vpop.f32.mrf.mxu1  ;;  %v6562_v42 = vld [vmem:[#allocation36_spill] sm:$0xff] }
 0x645   : > { %v3160_v54 = vadd.f32 %v3128_v12, %v6552_v14  ;;  %v3143_v21 = vadd.f32 %v6182_v1, %v3053_v61 }
 0x647   : > { %3192 = vst [vmem:[%s6188_s21 + $0x8] sm:$0xff] %v3160_v54  ;;  %v3175_v11 = vadd.f32 %v3143_v21, %v6553_v28 }
 0x648   : > { %v3083_v34 = vpop.f32.mrf.mxu3 }
 0x649   : > { %3207 = vst [vmem:[%s6188_s21 + $0x80] sm:$0xff] %v3175_v11  ;;  %v3084_v60 = vadd.f32 %v3083_v34, %v2905_v0  ;;  %v3054_v59 = vpop.f32.mrf.mxu2  ;;  %v6563_v11 = vld [vmem:[#allocation44_spill] sm:$0xff]  ;;  %v6564_v34 = vld [vmem:[#allocation38_spill] sm:$0xff] }
 0x64a   : > { %v2876_v2 = vpop.f32.mrf.mxu0 }
 0x64b   : > { %v3130_v15 = vadd.f32 %v6212_v8, %v3084_v60  ;;  %v3055_v30 = vadd.f32 %v3054_v59, %v2876_v2  ;;  %v2913_v39 = vpop.f32.mrf.mxu1 }
 0x64d   : > { %v3162_v20 = vadd.f32 %v3130_v15, %v6554_v51  ;;  %v3145_v57 = vadd.f32 %v6182_v1, %v3055_v30 }
 0x64f   : > { %3194 = vst [vmem:[%s6188_s21 + $0x18] sm:$0xff] %v3162_v20  ;;  %v3177_v56 = vadd.f32 %v3145_v57, %v6555_v25  ;;  %v6565_v25 = vld [vmem:[#allocation46_spill] sm:$0xff] }
 0x650   : > { %v3086_v10 = vpop.f32.mrf.mxu3 }
 0x651   : > { %3209 = vst [vmem:[%s6188_s21 + $0x90] sm:$0xff] %v3177_v56  ;;  %v3087_v44 = vadd.f32 %v3086_v10, %v2908_v35  ;;  %v3057_v36 = vpop.f32.mrf.mxu2 }
 0x653   : > { %v3132_v38 = vadd.f32 %v6212_v8, %v3087_v44  ;;  %v2915_v13 = vpop.f32.mrf.mxu1 }
 0x655   : > { %v3164_v37 = vadd.f32 %v3132_v38, %v6556_v62 }
 0x657   : > { %3196 = vst [vmem:[%s6188_s21 + $0x28] sm:$0xff] %v3164_v37 }
 0x658   : > { %v3088_v7 = vpop.f32.mrf.mxu3 }
 0x659   : > { %v3089_v55 = vadd.f32 %v3088_v7, %v2910_v4  ;;  %v3059_v59 = vpop.f32.mrf.mxu2 }
 0x65b   : > { %v3134_v53 = vadd.f32 %v6212_v8, %v3089_v55  ;;  %v2918_v31 = vpop.f32.mrf.mxu1 }
 0x65d   : > { %v3166_v22 = vadd.f32 %v3134_v53, %v6557_v63  ;;  %v6567_v63 = vld [vmem:[#allocation54_spill] sm:$0xff] }
 0x65f   : > { %3198 = vst [vmem:[%s6188_s21 + $0x38] sm:$0xff] %v3166_v22 }
 0x660   : > { %v3091_v6 = vpop.f32.mrf.mxu3 }
 0x661   : > { %v3092_v48 = vadd.f32 %v3091_v6, %v2913_v39  ;;  %v6566_v39 = vld [vmem:[#allocation45_spill] sm:$0xff]  ;;  %v6568_v6 = vld [vmem:[#allocation47_spill] sm:$0xff] }
 0x663   : > { %v3136_v26 = vadd.f32 %v6212_v8, %v3092_v48  ;;  %v2920_v3 = vpop.f32.mrf.mxu1 }
 0x665   : > { %v3168_v47 = vadd.f32 %v3136_v26, %v6558_v27 }
 0x667   : > { %3200 = vst [vmem:[%s6188_s21 + $0x48] sm:$0xff] %v3168_v47 }
 0x668   : > { %v3093_v32 = vpop.f32.mrf.mxu3 }
 0x669   : > { %v3094_v5 = vadd.f32 %v3093_v32, %v2915_v13 }
 0x66b   : > { %v3138_v58 = vadd.f32 %v6212_v8, %v3094_v5  ;;  %v2923_v45 = vpop.f32.mrf.mxu1 }
 0x66d   : > { %v3170_v40 = vadd.f32 %v3138_v58, %v6559_v18 }
 0x66f   : > { %3202 = vst [vmem:[%s6188_s21 + $0x58] sm:$0xff] %v3170_v40  ;;  %v6569_v40 = vld [vmem:[#allocation56_spill] sm:$0xff] }
 0x670   : > { %v3096_v50 = vpop.f32.mrf.mxu3 }
 0x671   : > { %v3097_v17 = vadd.f32 %v3096_v50, %v2918_v31  ;;  %v6570_v50 = vld [vmem:[#allocation55_spill] sm:$0xff] }
 0x673   : > { %v3140_v0 = vadd.f32 %v6212_v8, %v3097_v17  ;;  %v2925_v24 = vpop.f32.mrf.mxu1 }
 0x675   : > { %v3172_v9 = vadd.f32 %v3140_v0, %v6560_v33 }
 0x677   : > { %3204 = vst [vmem:[%s6188_s21 + $0x68] sm:$0xff] %v3172_v9 }
 0x678   : > { %v3098_v41 = vpop.f32.mrf.mxu3 }
 0x679   : > { %v3099_v29 = vadd.f32 %v3098_v41, %v2920_v3 }
 0x67b   : > { %v3142_v23 = vadd.f32 %v6212_v8, %v3099_v29 }
 0x67d   : > { %v3174_v49 = vadd.f32 %v3142_v23, %v6561_v43 }
 0x67f   : > { %3206 = vst [vmem:[%s6188_s21 + $0x78] sm:$0xff] %v3174_v49 }
 0x680   : > { %v3101_v19 = vpop.f32.mrf.mxu3 }
 0x681   : > { %v3102_v35 = vadd.f32 %v3101_v19, %v2923_v45  ;;  %v6571_v45 = vld [vmem:[#allocation57_spill] sm:$0xff] }
 0x683   : > { %v3144_v16 = vadd.f32 %v6212_v8, %v3102_v35 }
 0x685   : > { %v3176_v46 = vadd.f32 %v3144_v16, %v6562_v42  ;;  %v6572_v42 = vld [vmem:[#allocation66_spill] sm:$0xff] }
 0x687   : > { %3208 = vst [vmem:[%s6188_s21 + $0x88] sm:$0xff] %v3176_v46  ;;  %v2879_v52 = vpop.f32.mrf.mxu0  ;;  %v2928_v21 = vpop.f32.mrf.mxu1 }
 0x688   : > { %v3058_v12 = vadd.f32 %v3057_v36, %v2879_v52  ;;  %v3103_v61 = vpop.f32.mrf.mxu3  ;;  %v6573_v52 = vld [vmem:[#allocation67_spill] sm:$0xff] }
 0x689   : > { %v3104_v14 = vadd.f32 %v3103_v61, %v2925_v24 }
 0x68a   : > { %v3147_v54 = vadd.f32 %v6182_v1, %v3058_v12 }
 0x68b   : > { %v3146_v28 = vadd.f32 %v6212_v8, %v3104_v14 }
 0x68c   : > { %v3179_v4 = vadd.f32 %v3147_v54, %v6563_v11 }
 0x68d   : > { %v3178_v60 = vadd.f32 %v3146_v28, %v6564_v34 }
 0x68e   : > { %3211 = vst [vmem:[%s6188_s21 + $0xa0] sm:$0xff] %v3179_v4 }
 0x68f   : > { %3210 = vst [vmem:[%s6188_s21 + $0x98] sm:$0xff] %v3178_v60  ;;  %v2881_v2 = vpop.f32.mrf.mxu0  ;;  %v2930_v10 = vpop.f32.mrf.mxu1  ;;  %v6574_v60 = vld [vmem:[#allocation64_spill] sm:$0xff] }
 0x690   : > { %v3060_v15 = vadd.f32 %v3059_v59, %v2881_v2  ;;  %v3106_v30 = vpop.f32.mrf.mxu3  ;;  %v6575_v2 = vld [vmem:[#allocation65_spill] sm:$0xff] }
 0x691   : > { %v3107_v51 = vadd.f32 %v3106_v30, %v2928_v21 }
 0x692   : > { %v3149_v20 = vadd.f32 %v6182_v1, %v3060_v15 }
 0x693   : > { %v3148_v57 = vadd.f32 %v6212_v8, %v3107_v51 }
 0x694   : > { %v3181_v56 = vadd.f32 %v3149_v20, %v6565_v25 }
 0x695   : > { %v3180_v44 = vadd.f32 %v3148_v57, %v6566_v39 }
 0x696   : > { %3213 = vst [vmem:[%s6188_s21 + $0xb0] sm:$0xff] %v3181_v56 }
 0x697   : > { %3212 = vst [vmem:[%s6188_s21 + $0xa8] sm:$0xff] %v3180_v44  ;;  %v3062_v38 = vpop.f32.mrf.mxu2 }
 0x698   : > { %v2884_v62 = vpop.f32.mrf.mxu0  ;;  %v3108_v7 = vpop.f32.mrf.mxu3 }
 0x699   : > { %v3063_v37 = vadd.f32 %v3062_v38, %v2884_v62  ;;  %v3109_v55 = vadd.f32 %v3108_v7, %v2930_v10  ;;  %v2933_v26 = vpop.f32.mrf.mxu1 }
 0x69b   : > { %v3151_v13 = vadd.f32 %v6182_v1, %v3063_v37  ;;  %v3150_v53 = vadd.f32 %v6212_v8, %v3109_v55 }
 0x69d   : > { %v3183_v22 = vadd.f32 %v3151_v13, %v6567_v63  ;;  %v3182_v48 = vadd.f32 %v3150_v53, %v6568_v6 }
 0x69f   : > { %3215 = vst [vmem:[%s6188_s21 + $0xc0] sm:$0xff] %v3183_v22  ;;  %v3064_v31 = vpop.f32.mrf.mxu2 }
 0x6a0   : > { %3214 = vst [vmem:[%s6188_s21 + $0xb8] sm:$0xff] %v3182_v48  ;;  %v2886_v27 = vpop.f32.mrf.mxu0  ;;  %v3111_v32 = vpop.f32.mrf.mxu3 }
 0x6a1   : > { %v3065_v47 = vadd.f32 %v3064_v31, %v2886_v27  ;;  %v3112_v5 = vadd.f32 %v3111_v32, %v2933_v26  ;;  %v2935_v0 = vpop.f32.mrf.mxu1 }
 0x6a3   : > { %v3153_v58 = vadd.f32 %v6182_v1, %v3065_v47  ;;  %v3152_v18 = vadd.f32 %v6212_v8, %v3112_v5 }
 0x6a5   : > { %v3185_v3 = vadd.f32 %v3153_v58, %v6569_v40  ;;  %v3184_v17 = vadd.f32 %v3152_v18, %v6570_v50 }
 0x6a7   : > { %3217 = vst [vmem:[%s6188_s21 + $0xd0] sm:$0xff] %v3185_v3 }
 0x6a8   : > { %3216 = vst [vmem:[%s6188_s21 + $0xc8] sm:$0xff] %v3184_v17  ;;  %v3113_v33 = vpop.f32.mrf.mxu3 }
 0x6a9   : > { %v3114_v9 = vadd.f32 %v3113_v33, %v2935_v0  ;;  %v3067_v23 = vpop.f32.mrf.mxu2 }
 0x6ab   : > { %v3154_v41 = vadd.f32 %v6212_v8, %v3114_v9 }
 0x6ad   : > { %v3186_v29 = vadd.f32 %v3154_v41, %v6571_v45 }
 0x6af   : > { %3218 = vst [vmem:[%s6188_s21 + $0xd8] sm:$0xff] %v3186_v29 }
 0x6b0   : > { %v3116_v43 = vpop.f32.mrf.mxu3 }
 0x6b1   : > { %v3069_v61 = vpop.f32.mrf.mxu2 }
 0x6b8   : > { %v2889_v49 = vpop.f32.mrf.mxu0  ;;  %v2938_v19 = vpop.f32.mrf.mxu1 }
 0x6b9   : > { %v3068_v35 = vadd.f32 %v3067_v23, %v2889_v49  ;;  %v3117_v24 = vadd.f32 %v3116_v43, %v2938_v19  ;;  %v3118_v14 = vpop.f32.mrf.mxu3 }
 0x6bb   : > { %v3155_v16 = vadd.f32 %v6182_v1, %v3068_v35  ;;  %v3156_v36 = vadd.f32 %v6212_v8, %v3117_v24 }
 0x6bd   : > { %v3187_v46 = vadd.f32 %v3155_v16, %v6572_v42  ;;  %v3188_v12 = vadd.f32 %v3156_v36, %v6573_v52 }
 0x6bf   : > { %3219 = vst [vmem:[%s6188_s21 + $0xe0] sm:$0xff] %v3187_v46 }
 0x6c0   : > { %3220 = vst [vmem:[%s6188_s21 + $0xe8] sm:$0xff] %v3188_v12  ;;  %v2891_v54 = vpop.f32.mrf.mxu0  ;;  %v2940_v21 = vpop.f32.mrf.mxu1 }
 0x6c1   : > { %v3070_v28 = vadd.f32 %v3069_v61, %v2891_v54  ;;  %v3119_v11 = vadd.f32 %v3118_v14, %v2940_v21 }
 0x6c3   : > { %v3157_v4 = vadd.f32 %v6182_v1, %v3070_v28  ;;  %v3158_v34 = vadd.f32 %v6212_v8, %v3119_v11 }
 0x6c5   : > { %v3189_v59 = vadd.f32 %v3157_v4, %v6574_v60  ;;  %v3190_v15 = vadd.f32 %v3158_v34, %v6575_v2 }
 0x6c7   : > { %3221 = vst [vmem:[%s6188_s21 + $0xf0] sm:$0xff] %v3189_v59 }
 0x6c8   : > { %3222 = vst [vmem:[%s6188_s21 + $0xf8] sm:$0xff] %v3190_v15 }
 0x6c9   : > { %4503 = shalt.err (!%p4500_p9)
}
 0x6ca   : > { %s4570_s22 = smov 256   ;;  %s4571_s15 = smov 16  }
 0x6cb   : > { %4048 = dma.vmem_to_hbm [thread:$0]  (%p4702_p0), %s3237_s8, 4096, %s3239_s18, %s3224_s19, %s4570_s22, %s4570_s22, %s4571_s15  }
 0x6cc PF: > { %s3253_s21 = sand.u32 1, %s4542_s24   ;;  %p6576_p10 = scmp.ge.s32.totalorder %s4554_s27, 2 }
 0x6cd   : > { %s3254_s29 = scalar_lea.sflag [#allocation4], %s3253_s21 }
 0x6ce   : > { %p4071_p11 = pnand %p6576_p10, %p4708_p6 }
 0x6d0   : > { %p4072_p12 = pneg %p4071_p11 }
 0x6d2   : > { %4537 = dma.done.wait (%p4072_p12), %s3254_s29, 4096  }
 0x6d3   : > { %4539 = vsyncadd (%p4072_p12), %s3254_s29, 4294963200  ;;  %p23_p2 = scmp.ge.s32.totalorder %s4678_s28, 4   ;;  %s6577_s24 = smov %s4546_s25 }
 0x6d4   : > { %s6578_s25 = smov %s4550_s26  ;;  %s6579_s26 = smov %s4690_s12 }
 0x6d5   : > { %s6580_s27 = smov %s4678_s28  ;;  %25 = sbr.rel (!%p23_p2) target bundleno = 11 (0xb), region = 113 }
 0x6da   :  { %3260 = vsyncpa [#allocation3], 1 }
 0x6db   :  { %3262 = vsyncpa [#allocation3 + $0x1], 1 }
 0x6dc   :  { %3263 = vsyncpa [#allocation6], 1 }
 0x6dd   :  { %3264 = vsyncpa [#allocation9], 1 }
 0x6de   :  { %3265 = vsyncpa [#allocation12], 1 }
 0x6df   :  { %3266 = vsyncpa [#allocation4], 1 }
 0x6e0   :  { %3268 = vsyncpa [#allocation4 + $0x1], 1 }

</bundles_post_ra>
